<compile_context>
chip_gen: v7x
topology: tpu7x:2x2x1
jax: 0.10.0
libtpu: 0.0.40
codegen_flags: <defaults>
</compile_context>

<pallas_src>
from functools import partial

import jax
import jax.numpy as jnp
from jax.experimental import pallas as pl
from jax.experimental.pallas import tpu as pltpu

# Normalization constants (module defaults: pred = GAN output stats,
# real_mean/std = None -> ImageNet stats).
PRED_MEAN = jnp.array([0.5, 0.5, 0.5], dtype=jnp.float32)
PRED_STD = jnp.array([0.225, 0.225, 0.225], dtype=jnp.float32)
REAL_MEAN = jnp.array([0.485, 0.456, 0.406], dtype=jnp.float32)
REAL_STD = jnp.array([0.229, 0.224, 0.225], dtype=jnp.float32)

FEAT_DTYPE = jnp.bfloat16   # bf16 feature storage between layers


# ---------------------------------------------------------------------------
# Pallas kernels
# ---------------------------------------------------------------------------
def conv3x3_bn_relu_kernel(x_ref, w_ref, scale_ref, bias_ref, o_ref):
    """Fused 3x3 conv (stride 1) + folded BatchNorm(eval) + ReLU.

    One grid step = one image of the concatenated (pred ++ target) batch.

    x_ref:     (1, H+2, W+2, Cin)   zero-border padded input feature map
    w_ref:     (9*Cin, Cout)        im2col-packed weights (bf16)
    scale_ref: (1, Cout)  f32       gamma / sqrt(var + eps)
    bias_ref:  (1, Cout)  f32       beta + (conv_bias - mean) * scale
    o_ref:     (1, H+2, W+2, Cout)  padded output (border written as zeros,
                                    so downstream layers never re-pad in HBM)
    """
    Hp, Wp, Cout = o_ref.shape[1], o_ref.shape[2], o_ref.shape[3]
    H, W = Hp - 2, Wp - 2
    Cin = x_ref.shape[3]

    # Elementwise/layout work in f32 (v5e-friendly); MXU operands in bf16.
    x = x_ref[0].astype(jnp.float32)                      # (H+2, W+2, Cin)

    # 9 shifted windows (the 3x3 taps).  W % 8 == 0 -> the (H,W,Cin)->(H*W,Cin)
    # reshape is layout-preserving (no relayout copy).
    shifts = [x[dy:dy + H, dx:dx + W, :].reshape(H * W, Cin)
              for dy in range(3) for dx in range(3)]

    if Cin % 128 == 0:
        # im2col: lane-aligned concat -> single big-K matmul (K = 9*Cin),
        # one MXU pass / one result drain instead of 9 tiny-K matmuls.
        patches = jnp.concatenate(shifts, axis=-1).astype(jnp.bfloat16)
        acc = jnp.dot(patches, w_ref[...],
                      preferred_element_type=jnp.float32)  # (H*W, Cout)
    else:
        # 3-channel stem: keep the simple shift-accumulate form (avoids
        # sub-lane-width lane concats; K is tiny either way).
        w32 = w_ref[...].astype(jnp.float32)               # (9*Cin, Cout)
        acc = jnp.zeros((H * W, Cout), jnp.float32)
        for t, p in enumerate(shifts):
            acc = acc + jnp.dot(p, w32[t * Cin:(t + 1) * Cin, :],
                                preferred_element_type=jnp.float32)

    y = jnp.maximum(acc * scale_ref[...] + bias_ref[...], 0.0)  # BN + ReLU
    y = y.reshape(H, W, Cout)

    # Emit the 1-px zero border here (register-level concats, one full store)
    # so the next layer consumes a ready-padded map: no jnp.pad HBM pass.
    zc = jnp.zeros((H, 1, Cout), jnp.float32)
    zr = jnp.zeros((1, Wp, Cout), jnp.float32)
    yp = jnp.concatenate([zr, jnp.concatenate([zc, y, zc], axis=1), zr], axis=0)
    o_ref[0] = yp.astype(o_ref.dtype)


def softmax_mse_kernel(p_ref, t_ref, o_ref, *, apply_norm):
    """Per image-pair: SoftMaxNorm (softmax over spatial, per channel, *H*W)
    on pred and target features, then sum of squared differences, accumulated
    into a resident (1, 128) output block (P3 accumulator pattern)."""
    n = pl.program_id(0)

    @pl.when(n == 0)
    def _():
        o_ref[...] = jnp.zeros_like(o_ref)

    Hp, Wp, C = p_ref.shape[1], p_ref.shape[2], p_ref.shape[3]
    H, W = Hp - 2, Wp - 2

    # Cast the whole padded block to f32 first, then slice the interior:
    # keeps all elementwise math in f32 and slicing off the packed-dtype path.
    p = p_ref[0].astype(jnp.float32)[1:H + 1, 1:W + 1, :].reshape(H * W, C)
    t = t_ref[0].astype(jnp.float32)[1:H + 1, 1:W + 1, :].reshape(H * W, C)

    if apply_norm:
        def smn(z):  # softmax over spatial (axis 0) per channel, scaled by H*W
            m = jnp.max(z, axis=0, keepdims=True)
            e = jnp.exp(z - m)                                  # EUP
            s = jnp.sum(e, axis=0, keepdims=True)
            return e * pl.reciprocal(s, approx=True) * float(H * W)
        p, t = smn(p), smn(t)

    d = p - t
    o_ref[...] = o_ref[...] + jnp.sum(d * d)   # broadcast to all lanes


# ---------------------------------------------------------------------------
# pallas_call wrappers
# ---------------------------------------------------------------------------
def conv3x3_bn_relu(x_pad, w_packed, scale, bias):
    """x_pad: (NB, H+2, W+2, Cin) padded; returns (NB, H+2, W+2, Cout) bf16."""
    NB, Hp, Wp, Cin = x_pad.shape
    H, W = Hp - 2, Wp - 2
    Cout = w_packed.shape[-1]

    in_blk = Hp * Wp * Cin * x_pad.dtype.itemsize
    out_blk = Hp * Wp * Cout * 2
    w_bytes = w_packed.size * 2 + 2 * Cout * 4
    scratch = H * W * 9 * Cin * 6 + H * W * Cout * 4 + 4 * in_blk
    vmem_limit = int(min(2 * (in_blk + out_blk) + w_bytes + scratch + (8 << 20),
                         64 << 20))

    cost = pl.CostEstimate(
        flops=int(2 * NB * H * W * 9 * Cin * Cout),
        transcendentals=0,
        bytes_accessed=int(NB * in_blk + NB * out_blk + w_bytes))

    return pl.pallas_call(
        conv3x3_bn_relu_kernel,
        out_shape=jax.ShapeDtypeStruct((NB, Hp, Wp, Cout), FEAT_DTYPE),
        grid_spec=pltpu.PrefetchScalarGridSpec(
            num_scalar_prefetch=0,
            grid=(NB,),
            in_specs=[
                pl.BlockSpec((1, Hp, Wp, Cin), lambda n: (n, 0, 0, 0)),
                pl.BlockSpec((9 * Cin, Cout), lambda n: (0, 0)),
                pl.BlockSpec((1, Cout), lambda n: (0, 0)),
                pl.BlockSpec((1, Cout), lambda n: (0, 0)),
            ],
            out_specs=pl.BlockSpec((1, Hp, Wp, Cout), lambda n: (n, 0, 0, 0)),
        ),
        compiler_params=pltpu.CompilerParams(
            dimension_semantics=("parallel",),      # megacore over batch
            vmem_limit_bytes=vmem_limit),
        cost_estimate=cost,
    )(x_pad, w_packed, scale, bias)


def squared_error_sum(feats, n_pairs, apply_norm=True):
    """Sum over all pred/target pairs of SoftMaxNorm'd squared differences.

    feats: (2*n_pairs, H+2, W+2, C) padded features (pred half, target half).
    The same array is passed twice with index_maps selecting block n and
    block n + n_pairs; the scalar result lives in lane [0, 0].
    """
    NB, Hp, Wp, C = feats.shape
    H, W = Hp - 2, Wp - 2
    blk = Hp * Wp * C * feats.dtype.itemsize
    vmem_limit = int(min(4 * blk + 6 * H * W * C * 4 + (8 << 20), 64 << 20))
    cost = pl.CostEstimate(
        flops=int(12 * n_pairs * H * W * C),
        transcendentals=int(2 * n_pairs * H * W * C) if apply_norm else 0,
        bytes_accessed=int(2 * n_pairs * blk + 128 * 4))

    out = pl.pallas_call(
        partial(softmax_mse_kernel, apply_norm=apply_norm),
        out_shape=jax.ShapeDtypeStruct((1, 128), jnp.float32),
        grid_spec=pltpu.PrefetchScalarGridSpec(
            num_scalar_prefetch=0,
            grid=(n_pairs,),
            in_specs=[
                pl.BlockSpec((1, Hp, Wp, C), lambda n: (n, 0, 0, 0)),
                pl.BlockSpec((1, Hp, Wp, C), lambda n: (n + n_pairs, 0, 0, 0)),
            ],
            out_specs=pl.BlockSpec((1, 128), lambda n: (0, 0)),
        ),
        compiler_params=pltpu.CompilerParams(
            dimension_semantics=("arbitrary",),     # resident accumulator
            vmem_limit_bytes=vmem_limit),
        cost_estimate=cost,
    )(feats, feats)
    return out[0, 0]


# ---------------------------------------------------------------------------
# Deterministic parameter init (synthetic stand-in weights), im2col-packed
# ---------------------------------------------------------------------------
def init_params(key, cin=3, channels=(128, 128, 128, 128)):
    params = []
    for cout in channels:
        key, kw, kb, kg, kbt, km, kv = jax.random.split(key, 7)
        w = jax.random.normal(kw, (3, 3, cin, cout), jnp.float32) / jnp.sqrt(
            9.0 * cin)
        conv_b = jax.random.normal(kb, (cout,), jnp.float32) * 0.1
        gamma = jax.random.uniform(kg, (cout,), jnp.float32, 0.5, 1.5)
        beta = jax.random.normal(kbt, (cout,), jnp.float32) * 0.1
        r_mean = jax.random.normal(km, (cout,), jnp.float32) * 0.1
        r_var = jax.random.uniform(kv, (cout,), jnp.float32, 0.5, 1.5)
        scale = gamma / jnp.sqrt(r_var + 1e-5)          # folded BN (eval mode)
        bias = beta + (conv_b - r_mean) * scale
        # im2col packing: row index = (ky*3 + kx)*Cin + cin  (matches the
        # kernel's shift ordering); stored as a dense 2D bf16 slab.
        w_packed = w.reshape(9 * cin, cout).astype(jnp.bfloat16)
        params.append((w_packed, scale.reshape(1, cout), bias.reshape(1, cout)))
        cin = cout
    return params


# ---------------------------------------------------------------------------
# SWAGContentLoss forward
# ---------------------------------------------------------------------------
def layer_weights(layers):
    # SWAGContentLoss.__init__: normalized reversed powers of 1/2, keys are
    # layers[:-1] + ['output'].
    ws = list(reversed([1.0 / 2 ** i for i in range(len(layers))]))
    s = sum(ws)
    ws = [w / s for w in ws]
    return dict(zip(list(layers[:-1]) + ["output"], ws))


def swag_content_loss(pred, target, params,
                      layers=("feat1", "feat2", "feat3"), apply_norm=True):
    """pred/target: NCHW float images.  Returns the scalar SWAG content loss."""
    n_pairs = pred.shape[0]
    lw = layer_weights(layers)

    # NCHW -> NHWC, per-side input normalization, batch concat, single pad.
    # (All of this fuses into one cheap XLA pass over the 3-channel input;
    #  the conv kernels keep feature maps padded from then on.)
    def prep(x, mean, std):
        x = jnp.transpose(x, (0, 2, 3, 1)).astype(jnp.float32)
        return (x - mean) / std

    x = jnp.concatenate([prep(pred, PRED_MEAN, PRED_STD),
                         prep(target, REAL_MEAN, REAL_STD)], axis=0)
    x = jnp.pad(x, ((0, 0), (1, 1), (1, 1), (0, 0)))

    # Perception stand-in: taps at `layers` + final 'output'; pred & target
    # run through the stack together (one pallas_call per layer).
    names = list(layers) + ["output"]
    feats = {}
    f = x
    for name, p in zip(names, params):
        f = conv3x3_bn_relu(f, *p)
        feats[name] = f

    # Loss: weighted MSE of SoftMaxNorm'd features (target pass is no_grad in
    # the reference; inference-only here).
    loss = jnp.float32(0.0)
    for name, w in lw.items():
        fm = feats[name]
        Hp, Wp, C = fm.shape[1], fm.shape[2], fm.shape[3]
        ssd = squared_error_sum(fm, n_pairs, apply_norm=apply_norm)
        loss = loss + w * ssd / float(n_pairs * C * (Hp - 2) * (Wp - 2))
    return loss


# ---------------------------------------------------------------------------
if __name__ == "__main__":
    key = jax.random.PRNGKey(0)
    k_pred, k_tgt, k_par = jax.random.split(key, 3)

    pred = jax.random.uniform(k_pred, (2, 3, 16, 16), jnp.float32)    # NCHW
    target = jax.random.uniform(k_tgt, (2, 3, 16, 16), jnp.float32)   # NCHW
    params = init_params(k_par)

    loss = jax.jit(swag_content_loss)(pred, target, params)
    jax.block_until_ready(loss)
    print("KERNEL_OK")
</pallas_src>

<mosaic_0001>
module attributes {stable_mosaic.version = 11 : i64} {
  func.func @softmax_mse_kernel(%arg0: i32, %arg1: memref<1x18x18x128xbf16, #tpu.memory_space<vmem>>, %arg2: memref<1x18x18x128xbf16, #tpu.memory_space<vmem>>, %arg3: memref<1x128xf32, #tpu.memory_space<vmem>>) attributes {dimension_semantics = [#tpu.dimension_semantics<arbitrary>], iteration_bounds = array<i64: 2>, scalar_prefetch = 0 : i64, scratch_operands = 0 : i64, tpu.core_type = #tpu.core_type<tc>, window_params = [{transform_indices = @transform_0, window_bounds = array<i64: 1, 18, 18, 128>}, {transform_indices = @transform_1, window_bounds = array<i64: 1, 18, 18, 128>}, {pipeline_mode = #tpu.pipeline_mode<synchronous>, transform_indices = @transform_2, window_bounds = array<i64: 1, 128>}]} {
    %c0_i32 = arith.constant 0 : i32
    %0 = arith.cmpi eq, %arg0, %c0_i32 : i32
    %1 = arith.extui %0 : i1 to i32
    %c0_i32_0 = arith.constant 0 : i32
    %2 = arith.cmpi ne, %1, %c0_i32_0 : i32
    scf.if %2 {
      %cst_18 = arith.constant 0.000000e+00 : f32
      %47 = vector.broadcast %cst_18 : f32 to vector<1x128xf32>
      %c0_19 = arith.constant 0 : index
      %c0_20 = arith.constant 0 : index
      %48 = vector.load %arg3[%c0_19, %c0_20] : memref<1x128xf32, #tpu.memory_space<vmem>>, vector<1x128xf32>
      tpu.vector_store %arg3[%c0_19, %c0_20], %47 {strides = array<i32>} : memref<1x128xf32, #tpu.memory_space<vmem>>, vector<1x128xf32>,
    } else {
    }
    %c0 = arith.constant 0 : index
    %c0_1 = arith.constant 0 : index
    %c0_2 = arith.constant 0 : index
    %c0_3 = arith.constant 0 : index
    %3 = vector.load %arg1[%c0, %c0_1, %c0_2, %c0_3] : memref<1x18x18x128xbf16, #tpu.memory_space<vmem>>, vector<1x18x18x128xbf16>
    %4 = vector.shape_cast %3 : vector<1x18x18x128xbf16> to vector<18x18x128xbf16>
    %5 = arith.extf %4 : vector<18x18x128xbf16> to vector<18x18x128xf32>
    %6 = vector.extract_strided_slice %5 {offsets = [1, 1, 0], sizes = [16, 16, 128], strides = [1, 1, 1]} : vector<18x18x128xf32> to vector<16x16x128xf32>
    %7 = vector.shape_cast %6 : vector<16x16x128xf32> to vector<256x128xf32>
    %c0_4 = arith.constant 0 : index
    %c0_5 = arith.constant 0 : index
    %c0_6 = arith.constant 0 : index
    %c0_7 = arith.constant 0 : index
    %8 = vector.load %arg2[%c0_4, %c0_5, %c0_6, %c0_7] : memref<1x18x18x128xbf16, #tpu.memory_space<vmem>>, vector<1x18x18x128xbf16>
    %9 = vector.shape_cast %8 : vector<1x18x18x128xbf16> to vector<18x18x128xbf16>
    %10 = arith.extf %9 : vector<18x18x128xbf16> to vector<18x18x128xf32>
    %11 = vector.extract_strided_slice %10 {offsets = [1, 1, 0], sizes = [16, 16, 128], strides = [1, 1, 1]} : vector<18x18x128xf32> to vector<16x16x128xf32>
    %12 = vector.shape_cast %11 : vector<16x16x128xf32> to vector<256x128xf32>
    %cst = arith.constant dense<0xFF800000> : vector<128xf32>
    %13 = vector.multi_reduction <maximumf>, %7, %cst [0] : vector<256x128xf32> to vector<128xf32>
    %14 = vector.shape_cast %13 : vector<128xf32> to vector<1x128xf32>
    %15 = vector.broadcast %14 : vector<1x128xf32> to vector<256x128xf32>
    %16 = arith.subf %7, %15 : vector<256x128xf32>
    %17 = math.exp %16 : vector<256x128xf32>
    %cst_8 = arith.constant dense<0.000000e+00> : vector<128xf32>
    %18 = vector.multi_reduction <add>, %17, %cst_8 [0] : vector<256x128xf32> to vector<128xf32>
    %19 = vector.shape_cast %18 : vector<128xf32> to vector<1x128xf32>
    %20 = tpu.reciprocal %19 {approx = true} : vector<1x128xf32> -> vector<1x128xf32>
    %21 = vector.broadcast %20 : vector<1x128xf32> to vector<256x128xf32>
    %22 = arith.mulf %17, %21 : vector<256x128xf32>
    %cst_9 = arith.constant 2.560000e+02 : f32
    %23 = vector.broadcast %cst_9 : f32 to vector<256x128xf32>
    %24 = arith.mulf %22, %23 : vector<256x128xf32>
    %cst_10 = arith.constant dense<0xFF800000> : vector<128xf32>
    %25 = vector.multi_reduction <maximumf>, %12, %cst_10 [0] : vector<256x128xf32> to vector<128xf32>
    %26 = vector.shape_cast %25 : vector<128xf32> to vector<1x128xf32>
    %27 = vector.broadcast %26 : vector<1x128xf32> to vector<256x128xf32>
    %28 = arith.subf %12, %27 : vector<256x128xf32>
    %29 = math.exp %28 : vector<256x128xf32>
    %cst_11 = arith.constant dense<0.000000e+00> : vector<128xf32>
    %30 = vector.multi_reduction <add>, %29, %cst_11 [0] : vector<256x128xf32> to vector<128xf32>
    %31 = vector.shape_cast %30 : vector<128xf32> to vector<1x128xf32>
    %32 = tpu.reciprocal %31 {approx = true} : vector<1x128xf32> -> vector<1x128xf32>
    %33 = vector.broadcast %32 : vector<1x128xf32> to vector<256x128xf32>
    %34 = arith.mulf %29, %33 : vector<256x128xf32>
    %cst_12 = arith.constant 2.560000e+02 : f32
    %35 = vector.broadcast %cst_12 : f32 to vector<256x128xf32>
    %36 = arith.mulf %34, %35 : vector<256x128xf32>
    %37 = arith.subf %24, %36 : vector<256x128xf32>
    %c0_13 = arith.constant 0 : index
    %c0_14 = arith.constant 0 : index
    %38 = vector.load %arg3[%c0_13, %c0_14] : memref<1x128xf32, #tpu.memory_space<vmem>>, vector<1x128xf32>
    %39 = arith.mulf %37, %37 : vector<256x128xf32>
    %40 = vector.shape_cast %39 : vector<256x128xf32> to vector<1x256x128xf32>
    %cst_15 = arith.constant dense<0.000000e+00> : vector<1xf32>
    %41 = vector.multi_reduction <add>, %40, %cst_15 [1, 2] : vector<1x256x128xf32> to vector<1xf32>
    %42 = vector.shape_cast %41 : vector<1xf32> to vector<1x1x1xf32>
    %43 = vector.extract %42[0, 0, 0] : f32 from vector<1x1x1xf32>
    %44 = vector.broadcast %43 : f32 to vector<1x128xf32>
    %45 = arith.addf %38, %44 : vector<1x128xf32>
    %c0_16 = arith.constant 0 : index
    %c0_17 = arith.constant 0 : index
    %46 = vector.load %arg3[%c0_16, %c0_17] : memref<1x128xf32, #tpu.memory_space<vmem>>, vector<1x128xf32>
    tpu.vector_store %arg3[%c0_16, %c0_17], %45 {strides = array<i32>} : memref<1x128xf32, #tpu.memory_space<vmem>>, vector<1x128xf32>,
    return
  }
  func.func @transform_0(%arg0: i32) -> (i32, i32, i32, i32) {
    %c0_i32 = arith.constant 0 : i32
    %c0_i32_0 = arith.constant 0 : i32
    %c0_i32_1 = arith.constant 0 : i32
    %c0_i32_2 = arith.constant 0 : i32
    return %arg0, %c0_i32, %c0_i32_0, %c0_i32_1 : i32, i32, i32, i32
  }
  func.func @transform_1(%arg0: i32) -> (i32, i32, i32, i32) {
    %c2_i32 = arith.constant 2 : i32
    %0 = arith.addi %arg0, %c2_i32 : i32
    %c0_i32 = arith.constant 0 : i32
    %c0_i32_0 = arith.constant 0 : i32
    %c0_i32_1 = arith.constant 0 : i32
    %c0_i32_2 = arith.constant 0 : i32
    return %0, %c0_i32, %c0_i32_0, %c0_i32_1 : i32, i32, i32, i32
  }
  func.func @transform_2(%arg0: i32) -> (i32, i32) {
    %c0_i32 = arith.constant 0 : i32
    %c0_i32_0 = arith.constant 0 : i32
    %c0_i32_1 = arith.constant 0 : i32
    return %c0_i32, %c0_i32_0 : i32, i32
  }
}

module attributes {stable_mosaic.version = 11 : i64} {
  func.func @conv3x3_bn_relu_kernel(%arg0: i32, %arg1: memref<1x18x18x3xf32, #tpu.memory_space<vmem>>, %arg2: memref<27x128xbf16, #tpu.memory_space<vmem>>, %arg3: memref<1x128xf32, #tpu.memory_space<vmem>>, %arg4: memref<1x128xf32, #tpu.memory_space<vmem>>, %arg5: memref<1x18x18x128xbf16, #tpu.memory_space<vmem>>) attributes {dimension_semantics = [#tpu.dimension_semantics<parallel>], iteration_bounds = array<i64: 4>, scalar_prefetch = 0 : i64, scratch_operands = 0 : i64, tpu.core_type = #tpu.core_type<tc>, window_params = [{transform_indices = @transform_0, window_bounds = array<i64: 1, 18, 18, 3>}, {pipeline_mode = #tpu.pipeline_mode<synchronous>, transform_indices = @transform_1, window_bounds = array<i64: 27, 128>}, {pipeline_mode = #tpu.pipeline_mode<synchronous>, transform_indices = @transform_2, window_bounds = array<i64: 1, 128>}, {pipeline_mode = #tpu.pipeline_mode<synchronous>, transform_indices = @transform_3, window_bounds = array<i64: 1, 128>}, {transform_indices = @transform_4, window_bounds = array<i64: 1, 18, 18, 128>}]} {
    %c0 = arith.constant 0 : index
    %c0_0 = arith.constant 0 : index
    %c0_1 = arith.constant 0 : index
    %c0_2 = arith.constant 0 : index
    %0 = vector.load %arg1[%c0, %c0_0, %c0_1, %c0_2] : memref<1x18x18x3xf32, #tpu.memory_space<vmem>>, vector<1x18x18x3xf32>
    %1 = vector.shape_cast %0 : vector<1x18x18x3xf32> to vector<18x18x3xf32>
    %2 = vector.extract_strided_slice %1 {offsets = [0, 0, 0], sizes = [16, 16, 3], strides = [1, 1, 1]} : vector<18x18x3xf32> to vector<16x16x3xf32>
    %3 = vector.shape_cast %2 : vector<16x16x3xf32> to vector<256x3xf32>
    %4 = vector.extract_strided_slice %1 {offsets = [0, 1, 0], sizes = [16, 16, 3], strides = [1, 1, 1]} : vector<18x18x3xf32> to vector<16x16x3xf32>
    %5 = vector.shape_cast %4 : vector<16x16x3xf32> to vector<256x3xf32>
    %6 = vector.extract_strided_slice %1 {offsets = [0, 2, 0], sizes = [16, 16, 3], strides = [1, 1, 1]} : vector<18x18x3xf32> to vector<16x16x3xf32>
    %7 = vector.shape_cast %6 : vector<16x16x3xf32> to vector<256x3xf32>
    %8 = vector.extract_strided_slice %1 {offsets = [1, 0, 0], sizes = [16, 16, 3], strides = [1, 1, 1]} : vector<18x18x3xf32> to vector<16x16x3xf32>
    %9 = vector.shape_cast %8 : vector<16x16x3xf32> to vector<256x3xf32>
    %10 = vector.extract_strided_slice %1 {offsets = [1, 1, 0], sizes = [16, 16, 3], strides = [1, 1, 1]} : vector<18x18x3xf32> to vector<16x16x3xf32>
    %11 = vector.shape_cast %10 : vector<16x16x3xf32> to vector<256x3xf32>
    %12 = vector.extract_strided_slice %1 {offsets = [1, 2, 0], sizes = [16, 16, 3], strides = [1, 1, 1]} : vector<18x18x3xf32> to vector<16x16x3xf32>
    %13 = vector.shape_cast %12 : vector<16x16x3xf32> to vector<256x3xf32>
    %14 = vector.extract_strided_slice %1 {offsets = [2, 0, 0], sizes = [16, 16, 3], strides = [1, 1, 1]} : vector<18x18x3xf32> to vector<16x16x3xf32>
    %15 = vector.shape_cast %14 : vector<16x16x3xf32> to vector<256x3xf32>
    %16 = vector.extract_strided_slice %1 {offsets = [2, 1, 0], sizes = [16, 16, 3], strides = [1, 1, 1]} : vector<18x18x3xf32> to vector<16x16x3xf32>
    %17 = vector.shape_cast %16 : vector<16x16x3xf32> to vector<256x3xf32>
    %18 = vector.extract_strided_slice %1 {offsets = [2, 2, 0], sizes = [16, 16, 3], strides = [1, 1, 1]} : vector<18x18x3xf32> to vector<16x16x3xf32>
    %19 = vector.shape_cast %18 : vector<16x16x3xf32> to vector<256x3xf32>
    %c0_3 = arith.constant 0 : index
    %c0_4 = arith.constant 0 : index
    %20 = vector.load %arg2[%c0_3, %c0_4] : memref<27x128xbf16, #tpu.memory_space<vmem>>, vector<27x128xbf16>
    %21 = arith.extf %20 : vector<27x128xbf16> to vector<27x128xf32>
    %cst = arith.constant 0.000000e+00 : f32
    %22 = vector.broadcast %cst : f32 to vector<256x128xf32>
    %23 = vector.extract_strided_slice %21 {offsets = [0, 0], sizes = [3, 128], strides = [1, 1]} : vector<27x128xf32> to vector<3x128xf32>
    %cst_5 = arith.constant dense<0.000000e+00> : vector<256x128xf32>
    %24 = tpu.matmul %3, %23, %cst_5 {dimension_numbers = #tpu.dot_dimension_numbers<[1], [0], [0], [1], [0, 0, 1, 1], [], []>} : vector<256x3xf32>, vector<3x128xf32>, vector<256x128xf32> -> vector<256x128xf32>
    %25 = arith.addf %22, %24 : vector<256x128xf32>
    %26 = vector.extract_strided_slice %21 {offsets = [3, 0], sizes = [3, 128], strides = [1, 1]} : vector<27x128xf32> to vector<3x128xf32>
    %cst_6 = arith.constant dense<0.000000e+00> : vector<256x128xf32>
    %27 = tpu.matmul %5, %26, %cst_6 {dimension_numbers = #tpu.dot_dimension_numbers<[1], [0], [0], [1], [0, 0, 1, 1], [], []>} : vector<256x3xf32>, vector<3x128xf32>, vector<256x128xf32> -> vector<256x128xf32>
    %28 = arith.addf %25, %27 : vector<256x128xf32>
    %29 = vector.extract_strided_slice %21 {offsets = [6, 0], sizes = [3, 128], strides = [1, 1]} : vector<27x128xf32> to vector<3x128xf32>
    %cst_7 = arith.constant dense<0.000000e+00> : vector<256x128xf32>
    %30 = tpu.matmul %7, %29, %cst_7 {dimension_numbers = #tpu.dot_dimension_numbers<[1], [0], [0], [1], [0, 0, 1, 1], [], []>} : vector<256x3xf32>, vector<3x128xf32>, vector<256x128xf32> -> vector<256x128xf32>
    %31 = arith.addf %28, %30 : vector<256x128xf32>
    %32 = vector.extract_strided_slice %21 {offsets = [9, 0], sizes = [3, 128], strides = [1, 1]} : vector<27x128xf32> to vector<3x128xf32>
    %cst_8 = arith.constant dense<0.000000e+00> : vector<256x128xf32>
    %33 = tpu.matmul %9, %32, %cst_8 {dimension_numbers = #tpu.dot_dimension_numbers<[1], [0], [0], [1], [0, 0, 1, 1], [], []>} : vector<256x3xf32>, vector<3x128xf32>, vector<256x128xf32> -> vector<256x128xf32>
    %34 = arith.addf %31, %33 : vector<256x128xf32>
    %35 = vector.extract_strided_slice %21 {offsets = [12, 0], sizes = [3, 128], strides = [1, 1]} : vector<27x128xf32> to vector<3x128xf32>
    %cst_9 = arith.constant dense<0.000000e+00> : vector<256x128xf32>
    %36 = tpu.matmul %11, %35, %cst_9 {dimension_numbers = #tpu.dot_dimension_numbers<[1], [0], [0], [1], [0, 0, 1, 1], [], []>} : vector<256x3xf32>, vector<3x128xf32>, vector<256x128xf32> -> vector<256x128xf32>
    %37 = arith.addf %34, %36 : vector<256x128xf32>
    %38 = vector.extract_strided_slice %21 {offsets = [15, 0], sizes = [3, 128], strides = [1, 1]} : vector<27x128xf32> to vector<3x128xf32>
    %cst_10 = arith.constant dense<0.000000e+00> : vector<256x128xf32>
    %39 = tpu.matmul %13, %38, %cst_10 {dimension_numbers = #tpu.dot_dimension_numbers<[1], [0], [0], [1], [0, 0, 1, 1], [], []>} : vector<256x3xf32>, vector<3x128xf32>, vector<256x128xf32> -> vector<256x128xf32>
    %40 = arith.addf %37, %39 : vector<256x128xf32>
    %41 = vector.extract_strided_slice %21 {offsets = [18, 0], sizes = [3, 128], strides = [1, 1]} : vector<27x128xf32> to vector<3x128xf32>
    %cst_11 = arith.constant dense<0.000000e+00> : vector<256x128xf32>
    %42 = tpu.matmul %15, %41, %cst_11 {dimension_numbers = #tpu.dot_dimension_numbers<[1], [0], [0], [1], [0, 0, 1, 1], [], []>} : vector<256x3xf32>, vector<3x128xf32>, vector<256x128xf32> -> vector<256x128xf32>
    %43 = arith.addf %40, %42 : vector<256x128xf32>
    %44 = vector.extract_strided_slice %21 {offsets = [21, 0], sizes = [3, 128], strides = [1, 1]} : vector<27x128xf32> to vector<3x128xf32>
    %cst_12 = arith.constant dense<0.000000e+00> : vector<256x128xf32>
    %45 = tpu.matmul %17, %44, %cst_12 {dimension_numbers = #tpu.dot_dimension_numbers<[1], [0], [0], [1], [0, 0, 1, 1], [], []>} : vector<256x3xf32>, vector<3x128xf32>, vector<256x128xf32> -> vector<256x128xf32>
    %46 = arith.addf %43, %45 : vector<256x128xf32>
    %47 = vector.extract_strided_slice %21 {offsets = [24, 0], sizes = [3, 128], strides = [1, 1]} : vector<27x128xf32> to vector<3x128xf32>
    %cst_13 = arith.constant dense<0.000000e+00> : vector<256x128xf32>
    %48 = tpu.matmul %19, %47, %cst_13 {dimension_numbers = #tpu.dot_dimension_numbers<[1], [0], [0], [1], [0, 0, 1, 1], [], []>} : vector<256x3xf32>, vector<3x128xf32>, vector<256x128xf32> -> vector<256x128xf32>
    %49 = arith.addf %46, %48 : vector<256x128xf32>
    %c0_14 = arith.constant 0 : index
    %c0_15 = arith.constant 0 : index
    %50 = vector.load %arg3[%c0_14, %c0_15] : memref<1x128xf32, #tpu.memory_space<vmem>>, vector<1x128xf32>
    %51 = vector.broadcast %50 : vector<1x128xf32> to vector<256x128xf32>
    %52 = arith.mulf %49, %51 : vector<256x128xf32>
    %c0_16 = arith.constant 0 : index
    %c0_17 = arith.constant 0 : index
    %53 = vector.load %arg4[%c0_16, %c0_17] : memref<1x128xf32, #tpu.memory_space<vmem>>, vector<1x128xf32>
    %54 = vector.broadcast %53 : vector<1x128xf32> to vector<256x128xf32>
    %55 = arith.addf %52, %54 : vector<256x128xf32>
    %cst_18 = arith.constant 0.000000e+00 : f32
    %56 = vector.broadcast %cst_18 : f32 to vector<256x128xf32>
    %57 = arith.maximumf %55, %56 : vector<256x128xf32>
    %58 = vector.shape_cast %57 : vector<256x128xf32> to vector<16x16x128xf32>
    %cst_19 = arith.constant 0.000000e+00 : f32
    %59 = vector.broadcast %cst_19 : f32 to vector<16x1x128xf32>
    %cst_20 = arith.constant 0.000000e+00 : f32
    %60 = vector.broadcast %cst_20 : f32 to vector<1x18x128xf32>
    %61 = tpu.concatenate %59, %58, %59 in 1 : vector<16x1x128xf32>, vector<16x16x128xf32>, vector<16x1x128xf32> -> vector<16x18x128xf32>
    %62 = tpu.concatenate %60, %61, %60 in 0 : vector<1x18x128xf32>, vector<16x18x128xf32>, vector<1x18x128xf32> -> vector<18x18x128xf32>
    %63 = arith.truncf %62 : vector<18x18x128xf32> to vector<18x18x128xbf16>
    %c0_21 = arith.constant 0 : index
    %c0_22 = arith.constant 0 : index
    %c0_23 = arith.constant 0 : index
    %c0_24 = arith.constant 0 : index
    %64 = vector.load %arg5[%c0_21, %c0_22, %c0_23, %c0_24] : memref<1x18x18x128xbf16, #tpu.memory_space<vmem>>, vector<1x18x18x128xbf16>
    %65 = vector.shape_cast %64 : vector<1x18x18x128xbf16> to vector<18x18x128xbf16>
    %66 = vector.shape_cast %63 : vector<18x18x128xbf16> to vector<1x18x18x128xbf16>
    tpu.vector_store %arg5[%c0_21, %c0_22, %c0_23, %c0_24], %66 {strides = array<i32>} : memref<1x18x18x128xbf16, #tpu.memory_space<vmem>>, vector<1x18x18x128xbf16>,
    return
  }
  func.func @transform_0(%arg0: i32) -> (i32, i32, i32, i32) {
    %c0_i32 = arith.constant 0 : i32
    %c0_i32_0 = arith.constant 0 : i32
    %c0_i32_1 = arith.constant 0 : i32
    %c0_i32_2 = arith.constant 0 : i32
    return %arg0, %c0_i32, %c0_i32_0, %c0_i32_1 : i32, i32, i32, i32
  }
  func.func @transform_1(%arg0: i32) -> (i32, i32) {
    %c0_i32 = arith.constant 0 : i32
    %c0_i32_0 = arith.constant 0 : i32
    %c0_i32_1 = arith.constant 0 : i32
    return %c0_i32, %c0_i32_0 : i32, i32
  }
  func.func @transform_2(%arg0: i32) -> (i32, i32) {
    %c0_i32 = arith.constant 0 : i32
    %c0_i32_0 = arith.constant 0 : i32
    %c0_i32_1 = arith.constant 0 : i32
    return %c0_i32, %c0_i32_0 : i32, i32
  }
  func.func @transform_3(%arg0: i32) -> (i32, i32) {
    %c0_i32 = arith.constant 0 : i32
    %c0_i32_0 = arith.constant 0 : i32
    %c0_i32_1 = arith.constant 0 : i32
    return %c0_i32, %c0_i32_0 : i32, i32
  }
  func.func @transform_4(%arg0: i32) -> (i32, i32, i32, i32) {
    %c0_i32 = arith.constant 0 : i32
    %c0_i32_0 = arith.constant 0 : i32
    %c0_i32_1 = arith.constant 0 : i32
    %c0_i32_2 = arith.constant 0 : i32
    return %arg0, %c0_i32, %c0_i32_0, %c0_i32_1 : i32, i32, i32, i32
  }
}

module attributes {stable_mosaic.version = 11 : i64} {
  func.func @conv3x3_bn_relu_kernel(%arg0: i32, %arg1: memref<1x18x18x128xbf16, #tpu.memory_space<vmem>>, %arg2: memref<1152x128xbf16, #tpu.memory_space<vmem>>, %arg3: memref<1x128xf32, #tpu.memory_space<vmem>>, %arg4: memref<1x128xf32, #tpu.memory_space<vmem>>, %arg5: memref<1x18x18x128xbf16, #tpu.memory_space<vmem>>) attributes {dimension_semantics = [#tpu.dimension_semantics<parallel>], iteration_bounds = array<i64: 4>, scalar_prefetch = 0 : i64, scratch_operands = 0 : i64, tpu.core_type = #tpu.core_type<tc>, window_params = [{transform_indices = @transform_0, window_bounds = array<i64: 1, 18, 18, 128>}, {pipeline_mode = #tpu.pipeline_mode<synchronous>, transform_indices = @transform_1, window_bounds = array<i64: 1152, 128>}, {pipeline_mode = #tpu.pipeline_mode<synchronous>, transform_indices = @transform_2, window_bounds = array<i64: 1, 128>}, {pipeline_mode = #tpu.pipeline_mode<synchronous>, transform_indices = @transform_3, window_bounds = array<i64: 1, 128>}, {transform_indices = @transform_4, window_bounds = array<i64: 1, 18, 18, 128>}]} {
    %c0 = arith.constant 0 : index
    %c0_0 = arith.constant 0 : index
    %c0_1 = arith.constant 0 : index
    %c0_2 = arith.constant 0 : index
    %0 = vector.load %arg1[%c0, %c0_0, %c0_1, %c0_2] : memref<1x18x18x128xbf16, #tpu.memory_space<vmem>>, vector<1x18x18x128xbf16>
    %1 = vector.shape_cast %0 : vector<1x18x18x128xbf16> to vector<18x18x128xbf16>
    %2 = arith.extf %1 : vector<18x18x128xbf16> to vector<18x18x128xf32>
    %3 = vector.extract_strided_slice %2 {offsets = [0, 0, 0], sizes = [16, 16, 128], strides = [1, 1, 1]} : vector<18x18x128xf32> to vector<16x16x128xf32>
    %4 = vector.shape_cast %3 : vector<16x16x128xf32> to vector<256x128xf32>
    %5 = vector.extract_strided_slice %2 {offsets = [0, 1, 0], sizes = [16, 16, 128], strides = [1, 1, 1]} : vector<18x18x128xf32> to vector<16x16x128xf32>
    %6 = vector.shape_cast %5 : vector<16x16x128xf32> to vector<256x128xf32>
    %7 = vector.extract_strided_slice %2 {offsets = [0, 2, 0], sizes = [16, 16, 128], strides = [1, 1, 1]} : vector<18x18x128xf32> to vector<16x16x128xf32>
    %8 = vector.shape_cast %7 : vector<16x16x128xf32> to vector<256x128xf32>
    %9 = vector.extract_strided_slice %2 {offsets = [1, 0, 0], sizes = [16, 16, 128], strides = [1, 1, 1]} : vector<18x18x128xf32> to vector<16x16x128xf32>
    %10 = vector.shape_cast %9 : vector<16x16x128xf32> to vector<256x128xf32>
    %11 = vector.extract_strided_slice %2 {offsets = [1, 1, 0], sizes = [16, 16, 128], strides = [1, 1, 1]} : vector<18x18x128xf32> to vector<16x16x128xf32>
    %12 = vector.shape_cast %11 : vector<16x16x128xf32> to vector<256x128xf32>
    %13 = vector.extract_strided_slice %2 {offsets = [1, 2, 0], sizes = [16, 16, 128], strides = [1, 1, 1]} : vector<18x18x128xf32> to vector<16x16x128xf32>
    %14 = vector.shape_cast %13 : vector<16x16x128xf32> to vector<256x128xf32>
    %15 = vector.extract_strided_slice %2 {offsets = [2, 0, 0], sizes = [16, 16, 128], strides = [1, 1, 1]} : vector<18x18x128xf32> to vector<16x16x128xf32>
    %16 = vector.shape_cast %15 : vector<16x16x128xf32> to vector<256x128xf32>
    %17 = vector.extract_strided_slice %2 {offsets = [2, 1, 0], sizes = [16, 16, 128], strides = [1, 1, 1]} : vector<18x18x128xf32> to vector<16x16x128xf32>
    %18 = vector.shape_cast %17 : vector<16x16x128xf32> to vector<256x128xf32>
    %19 = vector.extract_strided_slice %2 {offsets = [2, 2, 0], sizes = [16, 16, 128], strides = [1, 1, 1]} : vector<18x18x128xf32> to vector<16x16x128xf32>
    %20 = vector.shape_cast %19 : vector<16x16x128xf32> to vector<256x128xf32>
    %21 = tpu.concatenate %4, %6, %8, %10, %12, %14, %16, %18, %20 in 1 : vector<256x128xf32>, vector<256x128xf32>, vector<256x128xf32>, vector<256x128xf32>, vector<256x128xf32>, vector<256x128xf32>, vector<256x128xf32>, vector<256x128xf32>, vector<256x128xf32> -> vector<256x1152xf32>
    %22 = arith.truncf %21 : vector<256x1152xf32> to vector<256x1152xbf16>
    %c0_3 = arith.constant 0 : index
    %c0_4 = arith.constant 0 : index
    %23 = vector.load %arg2[%c0_3, %c0_4] : memref<1152x128xbf16, #tpu.memory_space<vmem>>, vector<1152x128xbf16>
    %cst = arith.constant dense<0.000000e+00> : vector<256x128xf32>
    %24 = tpu.matmul %22, %23, %cst {dimension_numbers = #tpu.dot_dimension_numbers<[1], [0], [0], [1], [0, 0, 1, 1], [], []>} : vector<256x1152xbf16>, vector<1152x128xbf16>, vector<256x128xf32> -> vector<256x128xf32>
    %c0_5 = arith.constant 0 : index
    %c0_6 = arith.constant 0 : index
    %25 = vector.load %arg3[%c0_5, %c0_6] : memref<1x128xf32, #tpu.memory_space<vmem>>, vector<1x128xf32>
    %26 = vector.broadcast %25 : vector<1x128xf32> to vector<256x128xf32>
    %27 = arith.mulf %24, %26 : vector<256x128xf32>
    %c0_7 = arith.constant 0 : index
    %c0_8 = arith.constant 0 : index
    %28 = vector.load %arg4[%c0_7, %c0_8] : memref<1x128xf32, #tpu.memory_space<vmem>>, vector<1x128xf32>
    %29 = vector.broadcast %28 : vector<1x128xf32> to vector<256x128xf32>
    %30 = arith.addf %27, %29 : vector<256x128xf32>
    %cst_9 = arith.constant 0.000000e+00 : f32
    %31 = vector.broadcast %cst_9 : f32 to vector<256x128xf32>
    %32 = arith.maximumf %30, %31 : vector<256x128xf32>
    %33 = vector.shape_cast %32 : vector<256x128xf32> to vector<16x16x128xf32>
    %cst_10 = arith.constant 0.000000e+00 : f32
    %34 = vector.broadcast %cst_10 : f32 to vector<16x1x128xf32>
    %cst_11 = arith.constant 0.000000e+00 : f32
    %35 = vector.broadcast %cst_11 : f32 to vector<1x18x128xf32>
    %36 = tpu.concatenate %34, %33, %34 in 1 : vector<16x1x128xf32>, vector<16x16x128xf32>, vector<16x1x128xf32> -> vector<16x18x128xf32>
    %37 = tpu.concatenate %35, %36, %35 in 0 : vector<1x18x128xf32>, vector<16x18x128xf32>, vector<1x18x128xf32> -> vector<18x18x128xf32>
    %38 = arith.truncf %37 : vector<18x18x128xf32> to vector<18x18x128xbf16>
    %c0_12 = arith.constant 0 : index
    %c0_13 = arith.constant 0 : index
    %c0_14 = arith.constant 0 : index
    %c0_15 = arith.constant 0 : index
    %39 = vector.load %arg5[%c0_12, %c0_13, %c0_14, %c0_15] : memref<1x18x18x128xbf16, #tpu.memory_space<vmem>>, vector<1x18x18x128xbf16>
    %40 = vector.shape_cast %39 : vector<1x18x18x128xbf16> to vector<18x18x128xbf16>
    %41 = vector.shape_cast %38 : vector<18x18x128xbf16> to vector<1x18x18x128xbf16>
    tpu.vector_store %arg5[%c0_12, %c0_13, %c0_14, %c0_15], %41 {strides = array<i32>} : memref<1x18x18x128xbf16, #tpu.memory_space<vmem>>, vector<1x18x18x128xbf16>,
    return
  }
  func.func @transform_0(%arg0: i32) -> (i32, i32, i32, i32) {
    %c0_i32 = arith.constant 0 : i32
    %c0_i32_0 = arith.constant 0 : i32
    %c0_i32_1 = arith.constant 0 : i32
    %c0_i32_2 = arith.constant 0 : i32
    return %arg0, %c0_i32, %c0_i32_0, %c0_i32_1 : i32, i32, i32, i32
  }
  func.func @transform_1(%arg0: i32) -> (i32, i32) {
    %c0_i32 = arith.constant 0 : i32
    %c0_i32_0 = arith.constant 0 : i32
    %c0_i32_1 = arith.constant 0 : i32
    return %c0_i32, %c0_i32_0 : i32, i32
  }
  func.func @transform_2(%arg0: i32) -> (i32, i32) {
    %c0_i32 = arith.constant 0 : i32
    %c0_i32_0 = arith.constant 0 : i32
    %c0_i32_1 = arith.constant 0 : i32
    return %c0_i32, %c0_i32_0 : i32, i32
  }
  func.func @transform_3(%arg0: i32) -> (i32, i32) {
    %c0_i32 = arith.constant 0 : i32
    %c0_i32_0 = arith.constant 0 : i32
    %c0_i32_1 = arith.constant 0 : i32
    return %c0_i32, %c0_i32_0 : i32, i32
  }
  func.func @transform_4(%arg0: i32) -> (i32, i32, i32, i32) {
    %c0_i32 = arith.constant 0 : i32
    %c0_i32_0 = arith.constant 0 : i32
    %c0_i32_1 = arith.constant 0 : i32
    %c0_i32_2 = arith.constant 0 : i32
    return %arg0, %c0_i32, %c0_i32_0, %c0_i32_1 : i32, i32, i32, i32
  }
}

</mosaic_0001>

<bundles_post_ra>
// kernel: swag_content_loss.11
= control target key start
LH: loop header
LB: loop body
LE: loop exit
PB: predicated region body
PF: predicated region fallthrough
CT: control target
= control target key end

     0   :  { %s1550_s9 = smov 0   ;;  %s2555_s0 = inlined_call_operand.vmem [shape: bf16[4,18,18,128], index: 0, kind: input, shape index: {}, may-alias: {0,1}]   ;;  %s2556_s1 = inlined_call_operand.vmem [shape: bf16[4,18,18,128], index: 1, kind: input, shape index: {}, may-alias: {0,1}]   ;;  %s2557_s2 = inlined_call_operand.vmem [shape: f32[1,128], index: 2, kind: output, shape index: {}]  }
   0x1 LB: > { %s1292_s10 = sadd.s32 4294967295, %s1532_s9   ;;  %p1295_p0 = scmp.ge.s32.totalorder %s1532_s9, 1  ;;  %s1532_s9 = sphi %s1550_s9, %s12_s9  }
   0x2   : > { %p121_p1 = scmp.lt.s32.totalorder %s1532_s9, 3 }
   0x4   : > { %p122_p2 = pnand %p1295_p0, %p121_p1 }
   0x6   : > { %125 = sbr.rel (%p122_p2) target bundleno = 543 (0x21f), region = 28 }
   0xd   : > { %p144_p3 = scmp.lt.s32.totalorder %s1292_s10, 3  ;;  %s149_s11 = sadd.s32 2, %s1292_s10 }
   0xe   : > { %p150_p4 = scmp.lt.s32.totalorder %s149_s11, 3  ;;  %p1298_p5 = scmp.ne.s32.totalorder %s1292_s10, 0 }
   0xf   : > { %s145_s12 = scalar_select %p144_p3, %s1292_s10, 3 }
  0x10   : > { %s2711_s11 = smov (!%p150_p4, %s149_s11), 3  ;;  %159 = sbr.rel (%p1298_p5) target bundleno = 23 (0x17), region = 32 }
  0x11   : > { %s1381_s13 = smul.u32 216, %s145_s12  ;;  %v1534_v0 = vmov (!%p1298_p5), 0.0  }
  0x12   : > { %s1382_s14 = smul.u32 216, %s2711_s11  ;;  %160 = vst [vmem:[%s2557_s2] sm:$0x1] (!%p1298_p5), %v1534_v0 }
  0x13   : > { %s1561_s17 = scalar_lea.vmem %s2555_s0, %s1381_s13 }
  0x14   : > { %s1566_s20 = scalar_lea.vmem %s2556_s1, %s1382_s14 }
  0x17 PF: > { %v173_v1 = vld [vmem:[%s1561_s17 + $0x3c] sm:$0xff]   ;;  %v175_v2 = vld [vmem:[%s1561_s17 + $0x44] sm:$0x1]  ;;  %v1367_v3 = vld [vmem:[%s1561_s17 + $0x48] sm:$0xff]   ;;  %vm305_vm0 = vcmask 1046528  }
  0x18   : > { %v178_v4 = vld [vmem:[%s1561_s17 + $0x50] sm:$0x1]  ;;  %v179_v5 = vld [vmem:[%s1561_s17 + $0x54] sm:$0xff]   ;;  %v221_v6 = vunpack.c.l.bf16 %v173_v1  ;;  %v222_v7 = vunpack.c.h.bf16 %v173_v1  ;;  %v1311_v8 = vunpack.c.l.bf16 %v1367_v3  ;;  %v1312_v9 = vunpack.c.h.bf16 %v1367_v3  ;;  %v181_v11 = vld [vmem:[%s1561_s17 + $0x5c] sm:$0x1] }
  0x19   : > { %v223_v10 = vunpack.c.l.bf16 %v175_v2  ;;  %v226_v12 = vunpack.c.l.bf16 %v178_v4  ;;  %v1368_v13 = vld [vmem:[%s1561_s17 + $0x60] sm:$0xff]   ;;  %v227_v14 = vunpack.c.l.bf16 %v179_v5  ;;  %v228_v15 = vunpack.c.h.bf16 %v179_v5  ;;  %v184_v24 = vld [vmem:[%s1561_s17 + $0x68] sm:$0x1]  ;;  %v185_v27 = vld [vmem:[%s1561_s17 + $0x6c] sm:$0xff]  }
  0x1a   : > { %v326_v16 = vrot.slane %v221_v6, 1  ;;  %v327_v17 = vrot.slane %v222_v7, 1  ;;  %v229_v18 = vunpack.c.l.bf16 %v181_v11  ;;  %v331_v20 = vrot.slane %v1311_v8, 1  ;;  %v187_v36 = vld [vmem:[%s1561_s17 + $0x74] sm:$0x1]  ;;  %v1369_v39 = vld [vmem:[%s1561_s17 + $0x78] sm:$0xff]  }
  0x1b   : > { %v329_v19 = vrot.slane %v223_v10, 1  ;;  %v332_v21 = vrot.slane %v1312_v9, 1  ;;  %v1315_v22 = vunpack.c.l.bf16 %v1368_v13  ;;  %v1316_v23 = vunpack.c.h.bf16 %v1368_v13  ;;  %v190_v49 = vld [vmem:[%s1561_s17 + $0x80] sm:$0x1]  ;;  %v1607_v51 = vld [vmem:[%s1561_s17 + $0x18] sm:$0xff]   ;;  %v191_v53 = vld [vmem:[%s1561_s17 + $0x84] sm:$0xff]  }
  0x1c   : > { %v1580_v25 = vsel %vm305_vm0, %v326_v16, %v327_v17  ;;  %v334_v26 = vrot.slane %v226_v12, 1  ;;  %v336_v30 = vrot.slane %v227_v14, 1  ;;  %v337_v31 = vrot.slane %v228_v15, 1  ;;  %v1615_v58 = vld [vmem:[%s1561_s17 + $0xc] sm:$0xff]   ;;  %v1621_v62 = vld [vmem:[%s1561_s17 + $0x14] sm:$0x1] }
  0x1d   : > { %v1584_v28 = vsel %vm305_vm0, %v327_v17, %v329_v19  ;;  %v1587_v29 = vsel %vm305_vm0, %v331_v20, %v332_v21  ;;  %v232_v33 = vunpack.c.l.bf16 %v184_v24  ;;  %v339_v35 = vrot.slane %v229_v18, 1  ;;  %v193_v0 = vld [vmem:[%s1561_s17 + $0x8c] sm:$0x1]  ;;  %v1627_v3 = vld [vmem:[%s1561_s17 + $0x20] sm:$0x1]  ;;  %v1630_v4 = vld [vmem:[%s1561_s17 + $0x24] sm:$0xff]  }
  0x1e   : > { %v678_v32 = vmax.f32 %v1584_v28, %v1580_v25  ;;  %v1592_v34 = vsel %vm305_vm0, %v332_v21, %v334_v26  ;;  %v233_v37 = vunpack.c.l.bf16 %v185_v27  ;;  %v234_v40 = vunpack.c.h.bf16 %v185_v27  ;;  %v1370_v5 = vld [vmem:[%s1561_s17 + $0x90] sm:$0xff]   ;;  %v1648_v19 = vld [vmem:[%s1561_s17 + $0x2c] sm:$0x1]  ;;  %v196_v21 = vld [vmem:[%s1561_s17 + $0x98] sm:$0x1] }
  0x1f   : > { %v1598_v41 = vsel %vm305_vm0, %v336_v30, %v337_v31  ;;  %v341_v42 = vrot.slane %v1315_v22, 1  ;;  %v342_v43 = vrot.slane %v1316_v23, 1  ;;  %v235_v45 = vunpack.c.l.bf16 %v187_v36  ;;  %v1641_v14 = vld [vmem:[%s1561_s17 + $0x30] sm:$0xff]   ;;  %v1655_v26 = vld [vmem:[%s1561_s17 + $0x38] sm:$0x1]  ;;  %v197_v30 = vld [vmem:[%s1561_s17 + $0x9c] sm:$0xff]  }
  0x20   : > { %v679_v38 = vmax.f32 %v1587_v29, %v678_v32  ;;  %v1602_v46 = vsel %vm305_vm0, %v337_v31, %v339_v35  ;;  %v344_v47 = vrot.slane %v232_v33, 1  ;;  %v1319_v48 = vunpack.c.l.bf16 %v1369_v39  ;;  %v1371_v31 = vld [vmem:[%s1561_s17 + $0xa8] sm:$0xff]  }
  0x21   : > { %v1320_v52 = vunpack.c.h.bf16 %v1369_v39  ;;  %v1611_v54 = vsel %vm305_vm0, %v341_v42, %v342_v43  ;;  %v346_v55 = vrot.slane %v233_v37, 1  ;;  %v347_v56 = vrot.slane %v234_v40, 1  ;;  %v1667_v40 = vld [vmem:[%s1561_s17 + $0xc0] sm:$0xff]   ;;  %v442_v42 = vld [vmem:[%s1566_s20 + $0x6c] sm:$0xff]  }
  0x22   : > { %v680_v44 = vmax.f32 %v1592_v34, %v679_v38  ;;  %v238_v59 = vunpack.c.l.bf16 %v190_v49  ;;  %v1618_v60 = vsel %vm305_vm0, %v342_v43, %v344_v47  ;;  %v349_v61 = vrot.slane %v235_v45, 1  ;;  %v199_v47 = vld [vmem:[%s1561_s17 + $0xa4] sm:$0x1]  ;;  %v202_v49 = vld [vmem:[%s1561_s17 + $0xb0] sm:$0x1] }
  0x23   : > { %v1303_v63 = vunpack.c.l.bf16 %v1607_v51  ;;  %v239_v1 = vunpack.c.l.bf16 %v191_v53  ;;  %v240_v6 = vunpack.c.h.bf16 %v191_v53  ;;  %v1634_v7 = vsel %vm305_vm0, %v346_v55, %v347_v56  ;;  %v203_v55 = vld [vmem:[%s1561_s17 + $0xb4] sm:$0xff]  }
  0x24   : > { %v681_v50 = vmax.f32 %v1598_v41, %v680_v44  ;;  %v351_v8 = vrot.slane %v1319_v48, 1  ;;  %v352_v9 = vrot.slane %v1320_v52, 1  ;;  %v1304_v10 = vunpack.c.h.bf16 %v1607_v51 }
  0x25   : > { %v209_v11 = vunpack.c.l.bf16 %v1615_v58  ;;  %v210_v12 = vunpack.c.h.bf16 %v1615_v58  ;;  %v211_v15 = vunpack.c.l.bf16 %v1621_v62  ;;  %v241_v16 = vunpack.c.l.bf16 %v193_v0 }
  0x26   : > { %v682_v57 = vmax.f32 %v1602_v46, %v681_v50  ;;  %v1645_v17 = vsel %vm305_vm0, %v347_v56, %v349_v61  ;;  %v354_v18 = vrot.slane %v238_v59, 1  ;;  %v1323_v20 = vunpack.c.l.bf16 %v1370_v5  ;;  %v205_v56 = vld [vmem:[%s1561_s17 + $0xbc] sm:$0x1] }
  0x27   : > { %v214_v22 = vunpack.c.l.bf16 %v1627_v3  ;;  %v215_v23 = vunpack.c.l.bf16 %v1630_v4  ;;  %v1324_v27 = vunpack.c.h.bf16 %v1370_v5  ;;  %v1660_v32 = vsel %vm305_vm0, %v351_v8, %v352_v9 }
  0x28   : > { %v683_v2 = vmax.f32 %v1611_v54, %v682_v57  ;;  %v356_v33 = vrot.slane %v239_v1, 1  ;;  %v357_v35 = vrot.slane %v240_v6, 1  ;;  %v216_v38 = vunpack.c.h.bf16 %v1630_v4 }
  0x29   : > { %v244_v43 = vunpack.c.l.bf16 %v196_v21  ;;  %v1671_v44 = vsel %vm305_vm0, %v352_v9, %v354_v18  ;;  %v359_v45 = vrot.slane %v241_v16, 1  ;;  %v1327_v48 = vunpack.c.l.bf16 %v1371_v31 }
  0x2a   : > { %v684_v13 = vmax.f32 %v1618_v60, %v683_v2  ;;  %v245_v52 = vunpack.c.l.bf16 %v197_v30  ;;  %v246_v57 = vunpack.c.h.bf16 %v197_v30  ;;  %v1680_v58 = vsel %vm305_vm0, %v356_v33, %v357_v35  ;;  %v1685_v2 = vld [vmem:[%s1561_s17 + $0xc8] sm:$0x1] }
  0x2b   : > { %v361_v59 = vrot.slane %v1323_v20, 1  ;;  %v362_v61 = vrot.slane %v1324_v27, 1  ;;  %v1328_v62 = vunpack.c.h.bf16 %v1371_v31  ;;  %v1331_v0 = vunpack.c.l.bf16 %v1667_v40 }
  0x2c   : > { %v685_v24 = vmax.f32 %v1634_v7, %v684_v13  ;;  %v1332_v1 = vunpack.c.h.bf16 %v1667_v40  ;;  %v247_v4 = vunpack.c.l.bf16 %v199_v47  ;;  %v250_v5 = vunpack.c.l.bf16 %v202_v49 }
  0x2d   : > { %v1689_v6 = vsel %vm305_vm0, %v357_v35, %v359_v45  ;;  %v364_v8 = vrot.slane %v244_v43, 1  ;;  %v251_v9 = vunpack.c.l.bf16 %v203_v55  ;;  %v252_v13 = vunpack.c.h.bf16 %v203_v55 }
  0x2e   : > { %v686_v39 = vmax.f32 %v1645_v17, %v685_v24  ;;  %v253_v16 = vunpack.c.l.bf16 %v205_v56  ;;  %v1694_v21 = vsel %vm305_vm0, %v361_v59, %v362_v61  ;;  %v366_v24 = vrot.slane %v245_v52, 1 }
  0x2f   : > { %v367_v27 = vrot.slane %v246_v57, 1  ;;  %v1696_v30 = vrot.slane %v209_v11, 1  ;;  %v1698_v31 = vrot.slane %v210_v12, 1  ;;  %v1700_v33 = vrot.slane %v211_v15, 1  ;;  %v430_v12 = vld [vmem:[%s1566_s20 + $0x3c] sm:$0xff]  }
  0x30   : > { %v687_v53 = vmax.f32 %v1660_v32, %v686_v39  ;;  %v1705_v39 = vrot.slane %v1303_v63, 1  ;;  %v1709_v43 = vrot.slane %v1304_v10, 1  ;;  %v1712_v45 = vsel %vm305_vm0, %v362_v61, %v364_v8  ;;  %v1375_v63 = vld [vmem:[%s1566_s20 + $0x48] sm:$0xff]   ;;  %v435_v57 = vld [vmem:[%s1566_s20 + $0x50] sm:$0x1] }
  0x31   : > { %v369_v11 = vrot.slane %v247_v4, 1  ;;  %v1715_v47 = vrot.slane %v214_v22, 1  ;;  %v371_v49 = vrot.slane %v1327_v48, 1  ;;  %v372_v52 = vrot.slane %v1328_v62, 1 }
  0x32   : > { %v688_v3 = vmax.f32 %v1671_v44, %v687_v53  ;;  %v432_v53 = vld [vmem:[%s1566_s20 + $0x44] sm:$0x1]  ;;  %v1720_v55 = vrot.slane %v215_v23, 1  ;;  %v1722_v51 = vrot.slane %v216_v38, 1  ;;  %v1725_v10 = vsel %vm305_vm0, %v366_v24, %v367_v27 }
  0x33   : > { %v374_v56 = vrot.slane %v250_v5, 1  ;;  %v376_v59 = vrot.slane %v251_v9, 1  ;;  %v377_v61 = vrot.slane %v252_v13, 1  ;;  %v478_v48 = vunpack.c.l.bf16 %v430_v12  ;;  %v1376_v23 = vld [vmem:[%s1566_s20 + $0x60] sm:$0xff]  }
  0x34   : > { %v689_v18 = vmax.f32 %v1680_v58, %v688_v3  ;;  %v436_v3 = vld [vmem:[%s1566_s20 + $0x54] sm:$0xff]   ;;  %v1731_v62 = vsel %vm305_vm0, %v367_v27, %v369_v11  ;;  %v1343_v4 = vunpack.c.l.bf16 %v1375_v63  ;;  %v479_v8 = vunpack.c.h.bf16 %v430_v12 }
  0x35   : > { %v480_v38 = vunpack.c.l.bf16 %v432_v53  ;;  %v1736_v24 = vsel %vm305_vm0, %v371_v49, %v372_v52  ;;  %v1344_v5 = vunpack.c.h.bf16 %v1375_v63  ;;  %v1740_v9 = vsel %vm305_vm0, %v372_v52, %v374_v56  ;;  %v441_v52 = vld [vmem:[%s1566_s20 + $0x68] sm:$0x1] }
  0x36   : > { %v690_v35 = vmax.f32 %v1689_v6, %v689_v18  ;;  %v379_v13 = vrot.slane %v253_v16, 1  ;;  %v484_v27 = vunpack.c.l.bf16 %v436_v3  ;;  %v485_v11 = vunpack.c.h.bf16 %v436_v3 }
  0x37   : > { %v1744_v12 = vsel %vm305_vm0, %v376_v59, %v377_v61  ;;  %v1347_v53 = vunpack.c.l.bf16 %v1376_v23  ;;  %v583_v37 = vrot.slane %v479_v8, 1  ;;  %v585_v63 = vrot.slane %v480_v38, 1 }
  0x38   : > { %v691_v15 = vmax.f32 %v1694_v21, %v690_v35  ;;  %v438_v35 = vld [vmem:[%s1566_s20 + $0x5c] sm:$0x1]  ;;  %v587_v36 = vrot.slane %v1343_v4, 1  ;;  %v1348_v20 = vunpack.c.h.bf16 %v1376_v23  ;;  %v588_v56 = vrot.slane %v1344_v5, 1 }
  0x39   : > { %v486_v49 = vunpack.c.l.bf16 %v438_v35  ;;  %v1753_v59 = vsel %vm305_vm0, %v583_v37, %v585_v63  ;;  %v382_v38 = vrot.slane %v1332_v1, 1  ;;  %v489_v5 = vunpack.c.l.bf16 %v441_v52  ;;  %v1377_v63 = vld [vmem:[%s1566_s20 + $0x78] sm:$0xff]  }
  0x3a   : > { %v692_v22 = vmax.f32 %v1712_v45, %v691_v15  ;;  %v483_v15 = vunpack.c.l.bf16 %v435_v57  ;;  %2593 = vst [vmem:[#allocation2_spill] sm:$0xff] %v1753_v59  ;;  %v1761_v23 = vsel %vm305_vm0, %v587_v36, %v588_v56  ;;  %v491_v36 = vunpack.c.h.bf16 %v442_v42 }
  0x3b   : > { %2594 = vst [vmem:[#allocation3_spill] sm:$0xff] %v1761_v23  ;;  %v595_v35 = vrot.slane %v486_v49, 1  ;;  %v597_v1 = vrot.slane %v1347_v53, 1  ;;  %v1781_v49 = vsel %vm305_vm0, %v1696_v30, %v1698_v31 }
  0x3c   : > { %v693_v18 = vmax.f32 %v1725_v10, %v692_v22  ;;  %v582_v22 = vrot.slane %v478_v48, 1  ;;  %v590_v16 = vrot.slane %v483_v15, 1  ;;  %v592_v48 = vrot.slane %v484_v27, 1 }
  0x3d   : > { %v1770_v27 = vsel %vm305_vm0, %v377_v61, %v379_v13  ;;  %v1786_v61 = vsel %vm305_vm0, %v1698_v31, %v1700_v33  ;;  %v2598_v13 = vunpack.c.l.bf16 %v1648_v19  ;;  %v1351_v31 = vunpack.c.l.bf16 %v1377_v63  ;;  %v447_v33 = vld [vmem:[%s1566_s20 + $0x80] sm:$0x1] }
  0x3e   : > { %v694_v50 = vmax.f32 %v1731_v62, %v693_v18  ;;  %v1750_v3 = vsel %vm305_vm0, %v582_v22, %v583_v37  ;;  %v593_v18 = vrot.slane %v485_v11, 1  ;;  %v1766_v37 = vsel %vm305_vm0, %v588_v56, %v590_v16  ;;  %2596 = vst [vmem:[#allocation5_spill] sm:$0xff] %v1770_v27 }
  0x3f   : > { %v913_v4 = vmax.f32 %v1753_v59, %v1750_v3  ;;  %2595 = vst [vmem:[#allocation4_spill] sm:$0xff] %v1766_v37  ;;  %v490_v11 = vunpack.c.l.bf16 %v442_v42  ;;  %v319_v52 = vrot.slane %v2598_v13, 1  ;;  %v600_v16 = vrot.slane %v489_v5, 1 }
  0x40   : > { %v695_v57 = vmax.f32 %v1736_v24, %v694_v50  ;;  %v381_v50 = vrot.slane %v1331_v0, 1  ;;  %v444_v0 = vld [vmem:[%s1566_s20 + $0x74] sm:$0x1]  ;;  %v1776_v40 = vsel %vm305_vm0, %v592_v48, %v593_v18  ;;  %v2601_v48 = vunpack.c.l.bf16 %v1685_v2 }
  0x41   : > { %v914_v22 = vmax.f32 %v1761_v23, %v913_v4  ;;  %2597 = vst [vmem:[#allocation6_spill] sm:$0xff] %v1776_v40  ;;  %v492_v53 = vunpack.c.l.bf16 %v444_v0  ;;  %v1352_v4 = vunpack.c.h.bf16 %v1377_v63  ;;  %v2603_v2 = vunpack.c.l.bf16 %v1641_v14 }
  0x42   : > { %v696_v8 = vmax.f32 %v1740_v9, %v695_v57  ;;  %v598_v57 = vrot.slane %v1348_v20, 1  ;;  %v1793_v20 = vsel %vm305_vm0, %v593_v18, %v595_v35  ;;  %v1796_v30 = vsel %vm305_vm0, %v381_v50, %v382_v38 }
  0x43   : > { %v915_v42 = vmax.f32 %v1766_v37, %v914_v22  ;;  %2599 = vst [vmem:[#allocation7_spill] sm:$0xff] %v1793_v20  ;;  %2600 = vst [vmem:[#allocation8_spill] sm:$0xff] %v1796_v30  ;;  %v448_v22 = vld [vmem:[%s1566_s20 + $0x84] sm:$0xff]   ;;  %v602_v18 = vrot.slane %v490_v11, 1  ;;  %v603_v35 = vrot.slane %v491_v36, 1  ;;  %v1809_v50 = vsel %vm305_vm0, %v1705_v39, %v1709_v43 }
  0x44   : > { %v697_v15 = vmax.f32 %v1744_v12, %v696_v8  ;;  %v384_v8 = vrot.slane %v2601_v48, 1  ;;  %v321_v5 = vrot.slane %v2603_v2, 1  ;;  %v2604_v0 = vunpack.c.h.bf16 %v1641_v14  ;;  %v450_v14 = vld [vmem:[%s1566_s20 + $0x8c] sm:$0x1] }
  0x45   : > { %v916_v19 = vmax.f32 %v1776_v40, %v915_v42  ;;  %v1818_v48 = vsel %vm305_vm0, %v598_v57, %v600_v16  ;;  %v605_v11 = vrot.slane %v492_v53, 1  ;;  %v1823_v39 = vsel %vm305_vm0, %v1720_v55, %v1722_v51 }
  0x46   : > { %v698_v56 = vmax.f32 %v1770_v27, %v697_v15  ;;  %v1804_v15 = vsel %vm305_vm0, %v597_v1, %v598_v57  ;;  %v322_v13 = vrot.slane %v2604_v0, 1  ;;  %v495_v1 = vunpack.c.l.bf16 %v447_v33  ;;  %2605 = vst [vmem:[#allocation10_spill] sm:$0xff] %v1818_v48  ;;  %v1378_v0 = vld [vmem:[%s1566_s20 + $0x90] sm:$0xff]   ;;  %v429_v27 = vld [vmem:[%s1566_s20 + $0x38] sm:$0x1] }
  0x47   : > { %2602 = vst [vmem:[#allocation9_spill] sm:$0xff] %v1804_v15  ;;  %v917_v63 = vmax.f32 %v1793_v20, %v916_v19  ;;  %v1826_v36 = vsel %vm305_vm0, %v382_v38, %v384_v8  ;;  %v496_v2 = vunpack.c.l.bf16 %v448_v22  ;;  %v1832_v33 = vsel %vm305_vm0, %v602_v18, %v603_v35 }
  0x48   : > { %v699_v42 = vmax.f32 %v1796_v30, %v698_v56  ;;  %2606 = vst [vmem:[#allocation11_spill] sm:$0xff] %v1826_v36  ;;  %v497_v56 = vunpack.c.h.bf16 %v448_v22  ;;  %2607 = vst [vmem:[#allocation12_spill] sm:$0xff] %v1832_v33  ;;  %v607_v57 = vrot.slane %v1351_v31, 1  ;;  %v608_v53 = vrot.slane %v1352_v4, 1 }
  0x49   : > { %v918_v19 = vmax.f32 %v1804_v15, %v917_v63  ;;  %v1836_v16 = vsel %vm305_vm0, %v1722_v51, %v319_v52  ;;  %v1839_v55 = vsel %vm305_vm0, %v321_v5, %v322_v13  ;;  %v2608_v38 = vunpack.c.l.bf16 %v1655_v26  ;;  %v453_v15 = vld [vmem:[%s1566_s20 + $0x98] sm:$0x1]  ;;  %v454_v5 = vld [vmem:[%s1566_s20 + $0x9c] sm:$0xff]  }
  0x4a   : > { %v700_v22 = vmax.f32 %v1826_v36, %v699_v42  ;;  %v498_v18 = vunpack.c.l.bf16 %v450_v14  ;;  %v1847_v20 = vsel %vm305_vm0, %v603_v35, %v605_v11  ;;  %v610_v31 = vrot.slane %v495_v1, 1 }
  0x4b   : > { %v324_v8 = vrot.slane %v2608_v38, 1  ;;  %v919_v63 = vmax.f32 %v1818_v48, %v918_v19  ;;  %2609 = vst [vmem:[#allocation13_spill] sm:$0xff] %v1847_v20  ;;  %v1355_v4 = vunpack.c.l.bf16 %v1378_v0  ;;  %v1356_v40 = vunpack.c.h.bf16 %v1378_v0 }
  0x4c   : > { %v612_v52 = vrot.slane %v496_v2, 1  ;;  %v1852_v26 = vsel %vm305_vm0, %v607_v57, %v608_v53  ;;  %v613_v38 = vrot.slane %v497_v56, 1  ;;  %v674_v42 = vmax.f32 %v1781_v49, %v1823_v39 }
  0x4d   : > { %v920_v51 = vmax.f32 %v1832_v33, %v919_v63  ;;  %2610 = vst [vmem:[#allocation14_spill] sm:$0xff] %v1852_v26  ;;  %v675_v35 = vmax.f32 %v1786_v61, %v1836_v16  ;;  %v1861_v1 = vsel %vm305_vm0, %v1709_v43, %v1715_v47  ;;  %v1864_v11 = vsel %vm305_vm0, %v322_v13, %v324_v8  ;;  %v456_v63 = vld [vmem:[%s1566_s20 + $0xa4] sm:$0x1]  ;;  %v1379_v13 = vld [vmem:[%s1566_s20 + $0xa8] sm:$0xff]  }
  0x4e   : > { %v501_v14 = vunpack.c.l.bf16 %v453_v15  ;;  %v1868_v19 = vsel %vm305_vm0, %v608_v53, %v610_v31  ;;  %v615_v0 = vrot.slane %v498_v18, 1  ;;  %v701_v56 = vmax.f32 %v674_v42, %v700_v22 }
  0x4f   : > { %v921_v2 = vmax.f32 %v1847_v20, %v920_v51  ;;  %2611 = vst [vmem:[#allocation15_spill] sm:$0xff] %v1868_v19  ;;  %v676_v57 = vmax.f32 %v1809_v50, %v1839_v55  ;;  %v502_v33 = vunpack.c.l.bf16 %v454_v5  ;;  %v503_v48 = vunpack.c.h.bf16 %v454_v5  ;;  %v460_v20 = vld [vmem:[%s1566_s20 + $0xb4] sm:$0xff]  }
  0x50   : > { %v617_v47 = vrot.slane %v1355_v4, 1  ;;  %v1876_v15 = vsel %vm305_vm0, %v612_v52, %v613_v38  ;;  %v618_v8 = vrot.slane %v1356_v40, 1  ;;  %v702_v53 = vmax.f32 %v675_v35, %v701_v56 }
  0x51   : > { %v922_v43 = vmax.f32 %v1852_v26, %v921_v2  ;;  %2612 = vst [vmem:[#allocation16_spill] sm:$0xff] %v1876_v15  ;;  %v677_v22 = vmax.f32 %v1861_v1, %v1864_v11  ;;  %v504_v31 = vunpack.c.l.bf16 %v456_v63  ;;  %v1882_v51 = vsel %vm305_vm0, %v613_v38, %v615_v0  ;;  %v459_v26 = vld [vmem:[%s1566_s20 + $0xb0] sm:$0x1] }
  0x52   : > { %2613 = vst [vmem:[#allocation17_spill] sm:$0xff] %v1882_v51  ;;  %v620_v5 = vrot.slane %v501_v14, 1  ;;  %v703_v42 = vmax.f32 %v676_v57, %v702_v53  ;;  %v1359_v2 = vunpack.c.l.bf16 %v1379_v13  ;;  %v1360_v4 = vunpack.c.h.bf16 %v1379_v13  ;;  %v462_v57 = vld [vmem:[%s1566_s20 + $0xbc] sm:$0x1] }
  0x53   : > { %v923_v18 = vmax.f32 %v1868_v19, %v922_v43  ;;  %v1888_v40 = vsel %vm305_vm0, %v617_v47, %v618_v8  ;;  %v622_v35 = vrot.slane %v502_v33, 1  ;;  %v623_v56 = vrot.slane %v503_v48, 1 }
  0x54   : > { %2614 = vst [vmem:[#allocation18_spill] sm:$0xff] %v1888_v40  ;;  %v704_v36 = vmax.f32 %v677_v22, %v703_v42  ;;  %v507_v43 = vunpack.c.l.bf16 %v459_v26  ;;  %v1892_v38 = vsel %vm305_vm0, %v618_v8, %v620_v5  ;;  %v625_v14 = vrot.slane %v504_v31, 1 }
  0x55   : > { %v924_v52 = vmax.f32 %v1876_v15, %v923_v18  ;;  %2615 = vst [vmem:[#allocation19_spill] sm:$0xff] %v1892_v38  ;;  %v508_v13 = vunpack.c.l.bf16 %v460_v20  ;;  %v509_v53 = vunpack.c.h.bf16 %v460_v20  ;;  %v1897_v47 = vsel %vm305_vm0, %v622_v35, %v623_v56  ;;  %v1380_v20 = vld [vmem:[%s1566_s20 + $0xc0] sm:$0xff]  }
  0x56   : > { %v705_v0 = vrot.slane %v704_v36, 4  ;;  %2616 = vst [vmem:[#allocation20_spill] sm:$0xff] %v1897_v47  ;;  %v627_v48 = vrot.slane %v1359_v2, 1  ;;  %v628_v33 = vrot.slane %v1360_v4, 1  ;;  %v510_v8 = vunpack.c.l.bf16 %v462_v57 }
  0x57   : > { %v925_v63 = vmax.f32 %v1882_v51, %v924_v52  ;;  %v1901_v5 = vsel %vm305_vm0, %v623_v56, %v625_v14  ;;  %v630_v31 = vrot.slane %v507_v43, 1  ;;  %v632_v2 = vrot.slane %v508_v13, 1  ;;  %v424_v14 = vld [vmem:[%s1566_s20 + $0x24] sm:$0xff]  }
  0x58   : > { %v706_v22 = vmax.f32 %v704_v36, %v705_v0  ;;  %2617 = vst [vmem:[#allocation21_spill] sm:$0xff] %v1901_v5  ;;  %v1906_v35 = vsel %vm305_vm0, %v627_v48, %v628_v33  ;;  %v633_v4 = vrot.slane %v509_v53, 1  ;;  %v1363_v0 = vunpack.c.l.bf16 %v1380_v20 }
  0x59   : > { %v926_v18 = vmax.f32 %v1888_v40, %v925_v63  ;;  %2618 = vst [vmem:[#allocation22_spill] sm:$0xff] %v1906_v35  ;;  %v418_v63 = vld [vmem:[%s1566_s20 + $0xc] sm:$0xff]   ;;  %v1364_v43 = vunpack.c.h.bf16 %v1380_v20  ;;  %v1912_v57 = vsel %vm305_vm0, %v628_v33, %v630_v31  ;;  %v472_v20 = vunpack.c.l.bf16 %v424_v14 }
  0x5a   : > { %v707_v42 = vrot.slane %v706_v22, 2  ;;  %2619 = vst [vmem:[#allocation23_spill] sm:$0xff] %v1912_v57  ;;  %v466_v53 = vunpack.c.l.bf16 %v418_v63  ;;  %v473_v40 = vunpack.c.h.bf16 %v424_v14  ;;  %v426_v31 = vld [vmem:[%s1566_s20 + $0x2c] sm:$0x1] }
  0x5b   : > { %v927_v26 = vmax.f32 %v1892_v38, %v926_v18  ;;  %v635_v18 = vrot.slane %v510_v8, 1  ;;  %v423_v38 = vld [vmem:[%s1566_s20 + $0x20] sm:$0x1]  ;;  %v474_v14 = vunpack.c.l.bf16 %v426_v31 }
  0x5c   : > { %v708_v36 = vmax.f32 %v706_v22, %v707_v42  ;;  %v1918_v22 = vsel %vm305_vm0, %v632_v2, %v633_v4  ;;  %v1373_v42 = vld [vmem:[%s1566_s20 + $0x18] sm:$0xff]   ;;  %v471_v23 = vunpack.c.l.bf16 %v423_v38  ;;  %v562_v59 = vrot.slane %v466_v53, 1 }
  0x5d   : > { %v928_v52 = vmax.f32 %v1897_v47, %v927_v26  ;;  %v465_v26 = vld [vmem:[%s1566_s20 + $0xc8] sm:$0x1]  ;;  %v420_v47 = vld [vmem:[%s1566_s20 + $0x14] sm:$0x1]  ;;  %v1926_v51 = vsel %vm305_vm0, %v633_v4, %v635_v18  ;;  %v1335_v37 = vunpack.c.l.bf16 %v1373_v42  ;;  %v1336_v30 = vunpack.c.h.bf16 %v1373_v42 }
  0x5e   : > { %v709_v13 = vrot.slane %v708_v36, 1  ;;  %v513_v8 = vunpack.c.l.bf16 %v465_v26  ;;  %v468_v15 = vunpack.c.l.bf16 %v420_v47  ;;  %v573_v4 = vrot.slane %v473_v40, 1 }
  0x5f   : > { %v929_v56 = vmax.f32 %v1901_v5, %v928_v52  ;;  %v1374_v52 = vld [vmem:[%s1566_s20 + $0x30] sm:$0xff]   ;;  %v467_v5 = vunpack.c.h.bf16 %v418_v63  ;;  %v567_v53 = vrot.slane %v1335_v37, 1 }
  0x60   : > { %v1929_v19 = vmax.f32 %v708_v36, %v709_v13  ;;  %v1339_v63 = vunpack.c.l.bf16 %v1374_v52  ;;  %v640_v47 = vrot.slane %v513_v8, 1  ;;  %v1340_v13 = vunpack.c.h.bf16 %v1374_v52 }
  0x61   : > { %v930_v48 = vmax.f32 %v1906_v35, %v929_v56  ;;  %v637_v56 = vrot.slane %v1363_v0, 1  ;;  %v638_v35 = vrot.slane %v1364_v43, 1  ;;  %v565_v43 = vrot.slane %v468_v15, 1 }
  0x62   : > { %v711_v36 = vsub.f32 %v1781_v49, %v1929_v19  ;;  %v712_v18 = vsub.f32 %v1786_v61, %v1929_v19  ;;  %v713_v38 = vsub.f32 %v1809_v50, %v1929_v19  ;;  %v714_v40 = vsub.f32 %v1861_v1, %v1929_v19 }
  0x63   : > { %v931_v33 = vmax.f32 %v1912_v57, %v930_v48  ;;  %v563_v48 = vrot.slane %v467_v5, 1  ;;  %v572_v57 = vrot.slane %v472_v20, 1  ;;  %v1934_v0 = vsel %vm305_vm0, %v637_v56, %v638_v35 }
  0x64   : > { %v477_v5 = vunpack.c.l.bf16 %v429_v27  ;;  %v568_v20 = vrot.slane %v1336_v30, 1  ;;  %v575_v15 = vrot.slane %v474_v14, 1  ;;  %v570_v49 = vrot.slane %v471_v23, 1 }
  0x65   : > { %v932_v2 = vmax.f32 %v1918_v22, %v931_v33  ;;  %v1945_v42 = vsel %vm305_vm0, %v562_v59, %v563_v48  ;;  %v1949_v31 = vsel %vm305_vm0, %v572_v57, %v573_v4  ;;  %v1952_v61 = vsel %vm305_vm0, %v638_v35, %v640_v47 }
  0x66   : > { %v715_v37 = vsub.f32 %v1823_v39, %v1929_v19  ;;  %v1957_v27 = vsel %vm305_vm0, %v563_v48, %v565_v43  ;;  %v743_v50 = vmul.f32 1.442695, %v711_v36  ;;  %v745_v59 = vmul.f32 1.442695, %v712_v18 }
  0x67   : > { %v933_v26 = vmax.f32 %v1926_v51, %v932_v2  ;;  %v747_v1 = vmul.f32 1.442695, %v713_v38  ;;  %v577_v30 = vrot.slane %v1339_v63, 1  ;;  %v578_v52 = vrot.slane %v1340_v13, 1 }
  0x68   : > { %v716_v23 = vsub.f32 %v1836_v16, %v1929_v19  ;;  %v749_v8 = vmul.f32 1.442695, %v714_v40  ;;  %v1962_v57 = vsel %vm305_vm0, %v573_v4, %v575_v15  ;;  %1394 = vpow2.f32 %v743_v50 }
  0x69   : > { %v934_v33 = vmax.f32 %v1934_v0, %v933_v26  ;;  %v909_v39 = vmax.f32 %v1945_v42, %v1949_v31  ;;  %v580_v56 = vrot.slane %v477_v5, 1  ;;  %v717_v2 = vsub.f32 %v1839_v55, %v1929_v19 }
  0x6a   : > { %1396 = vpow2.f32 %v745_v59  ;;  %v751_v63 = vmul.f32 1.442695, %v715_v37  ;;  %v1970_v14 = vsel %vm305_vm0, %v567_v53, %v568_v20  ;;  %v1973_v16 = vsel %vm305_vm0, %v577_v30, %v578_v52 }
  0x6b   : > { %v935_v35 = vmax.f32 %v1952_v61, %v934_v33  ;;  %1398 = vpow2.f32 %v747_v1  ;;  %v718_v48 = vsub.f32 %v1864_v11, %v1929_v19  ;;  %v753_v26 = vmul.f32 1.442695, %v716_v23 }
  0x6c   : > { %1400 = vpow2.f32 %v749_v8  ;;  %v1978_v4 = vsel %vm305_vm0, %v568_v20, %v570_v49  ;;  %v910_v55 = vmax.f32 %v1957_v27, %v1962_v57  ;;  %v1983_v43 = vsel %vm305_vm0, %v578_v52, %v580_v56 }
  0x6d   : > { %v936_v47 = vmax.f32 %v909_v39, %v935_v35  ;;  %v719_v36 = vsub.f32 %v1580_v25, %v1929_v19  ;;  %1402 = vpow2.f32 %v751_v63  ;;  %v755_v18 = vmul.f32 1.442695, %v717_v2 }
  0x6e   : > { %v911_v11 = vmax.f32 %v1970_v14, %v1973_v16  ;;  %v720_v38 = vsub.f32 %v1584_v28, %v1929_v19  ;;  %1404 = vpow2.f32 %v753_v26  ;;  %v757_v13 = vmul.f32 1.442695, %v718_v48 }
  0x6f   : > { %v937_v5 = vmax.f32 %v910_v55, %v936_v47  ;;  %v912_v53 = vmax.f32 %v1978_v4, %v1983_v43  ;;  %v721_v40 = vsub.f32 %v1587_v29, %v1929_v19  ;;  %1406 = vpow2.f32 %v755_v18 }
  0x70   : > { %v759_v20 = vmul.f32 1.442695, %v719_v36  ;;  %v722_v49 = vsub.f32 %v1592_v34, %v1929_v19  ;;  %1408 = vpow2.f32 %v757_v13  ;;  %v761_v28 = vmul.f32 1.442695, %v720_v38 }
  0x71   : > { %v938_v15 = vmax.f32 %v911_v11, %v937_v5  ;;  %v723_v29 = vsub.f32 %v1598_v41, %v1929_v19  ;;  %v763_v30 = vmul.f32 1.442695, %v721_v40  ;;  %v724_v34 = vsub.f32 %v1602_v46, %v1929_v19 }
  0x72   : > { %v1995_v25 = vpop.eup %1394  ;;  %1410 = vpow2.f32 %v759_v20  ;;  %v765_v35 = vmul.f32 1.442695, %v722_v49  ;;  %v725_v41 = vsub.f32 %v1611_v54, %v1929_v19  ;;  %v726_v46 = vsub.f32 %v1618_v60, %v1929_v19 }
  0x73   : > { %v939_v59 = vmax.f32 %v912_v53, %v938_v15  ;;  %1412 = vpow2.f32 %v761_v28  ;;  %v767_v63 = vmul.f32 1.442695, %v723_v29  ;;  %v769_v55 = vmul.f32 1.442695, %v724_v34 }
  0x74   : > { %v1997_v33 = vpop.eup %1396  ;;  %1414 = vpow2.f32 %v763_v30  ;;  %v727_v11 = vsub.f32 %v1634_v7, %v1929_v19  ;;  %v771_v54 = vmul.f32 1.442695, %v725_v41  ;;  %v728_v53 = vsub.f32 %v1645_v17, %v1929_v19 }
  0x75   : > { %v2001_v37 = vpop.eup %1398  ;;  %v807_v50 = vadd.f32 %v1997_v33, %v1995_v25  ;;  %v940_v23 = vrot.slane %v939_v59, 4  ;;  %1416 = vpow2.f32 %v765_v35  ;;  %v773_v60 = vmul.f32 1.442695, %v726_v46 }
  0x76   : > { %v2005_v1 = vpop.eup %1400  ;;  %1418 = vpow2.f32 %v767_v63  ;;  %v729_v15 = vsub.f32 %v1660_v32, %v1929_v19  ;;  %v775_v7 = vmul.f32 1.442695, %v727_v11  ;;  %v777_v17 = vmul.f32 1.442695, %v728_v53 }
  0x77   : > { %v808_v52 = vadd.f32 %v2001_v37, %v807_v50  ;;  %v2010_v8 = vpop.eup %1402  ;;  %v941_v56 = vmax.f32 %v939_v59, %v940_v23  ;;  %1420 = vpow2.f32 %v769_v55  ;;  %v730_v59 = vsub.f32 %v1671_v44, %v1929_v19 }
  0x78   : > { %v2015_v2 = vpop.eup %1404  ;;  %1422 = vpow2.f32 %v771_v54  ;;  %v731_v29 = vsub.f32 %v1680_v58, %v1929_v19  ;;  %v732_v30 = vsub.f32 %v1689_v6, %v1929_v19  ;;  %v779_v23 = vmul.f32 1.442695, %v729_v15 }
  0x79   : > { %v809_v39 = vadd.f32 %v2005_v1, %v808_v52  ;;  %v942_v26 = vrot.slane %v941_v56, 2  ;;  %v2020_v47 = vpop.eup %1406  ;;  %1424 = vpow2.f32 %v773_v60  ;;  %v733_v35 = vsub.f32 %v1694_v21, %v1929_v19 }
  0x7a   : > { %v2025_v18 = vpop.eup %1408  ;;  %1426 = vpow2.f32 %v775_v7  ;;  %v781_v58 = vmul.f32 1.442695, %v730_v59  ;;  %v785_v41 = vmul.f32 1.442695, %v732_v30  ;;  %v734_v54 = vsub.f32 %v1712_v45, %v1929_v19 }
  0x7b   : > { %v810_v48 = vadd.f32 %v2010_v8, %v809_v39  ;;  %v943_v38 = vmax.f32 %v941_v56, %v942_v26  ;;  %1428 = vpow2.f32 %v777_v17  ;;  %v783_v56 = vmul.f32 1.442695, %v731_v29 }
  0x7c   : > { %v2030_v5 = vpop.eup %1410  ;;  %1430 = vpow2.f32 %v779_v23  ;;  %v787_v46 = vmul.f32 1.442695, %v733_v35  ;;  %v736_v15 = vsub.f32 %v1731_v62, %v1929_v19  ;;  %v789_v7 = vmul.f32 1.442695, %v734_v54  ;;  %v2622_v54 = vld [vmem:[#allocation3_spill] sm:$0xff] }
  0x7d   : > { %v811_v36 = vadd.f32 %v2015_v2, %v810_v48  ;;  %v2035_v20 = vpop.eup %1412  ;;  %v944_v49 = vrot.slane %v943_v38, 1  ;;  %1432 = vpow2.f32 %v781_v58 }
  0x7e   : > { %v2040_v50 = vpop.eup %1414  ;;  %1434 = vpow2.f32 %v783_v56  ;;  %v793_v23 = vmul.f32 1.442695, %v736_v15 }
  0x7f   : > { %v812_v13 = vadd.f32 %v2020_v47, %v811_v36  ;;  %v2049_v52 = vpop.eup %1416  ;;  %v2051_v34 = vmax.f32 %v943_v38, %v944_v49  ;;  %1436 = vpow2.f32 %v785_v41 }
  0x80   : > { %v2056_v39 = vpop.eup %1418  ;;  %1438 = vpow2.f32 %v787_v46 }
  0x81   : > { %v813_v40 = vadd.f32 %v2025_v18, %v812_v13  ;;  %v2059_v63 = vpop.eup %1420  ;;  %v946_v48 = vsub.f32 %v1945_v42, %v2051_v34  ;;  %v947_v26 = vsub.f32 %v1957_v27, %v2051_v34  ;;  %v948_v21 = vsub.f32 %v1970_v14, %v2051_v34 }
  0x82   : > { %v949_v36 = vsub.f32 %v1978_v4, %v2051_v34  ;;  %v2070_v11 = vpop.eup %1422  ;;  %v735_v42 = vsub.f32 %v1725_v10, %v1929_v19  ;;  %v950_v14 = vsub.f32 %v1949_v31, %v2051_v34  ;;  %v951_v45 = vsub.f32 %v1962_v57, %v2051_v34 }
  0x83   : > { %v814_v28 = vadd.f32 %v2030_v5, %v813_v40  ;;  %v2079_v38 = vpop.eup %1424  ;;  %v978_v13 = vmul.f32 1.442695, %v946_v48  ;;  %v980_v4 = vmul.f32 1.442695, %v947_v26  ;;  %v982_v53 = vmul.f32 1.442695, %v948_v21 }
  0x84   : > { %v984_v40 = vmul.f32 1.442695, %v949_v36  ;;  %v2084_v10 = vpop.eup %1426  ;;  %v952_v49 = vsub.f32 %v1973_v16, %v2051_v34  ;;  %v737_v57 = vsub.f32 %v1736_v24, %v1929_v19  ;;  %v791_v17 = vmul.f32 1.442695, %v735_v42 }
  0x85   : > { %v815_v32 = vadd.f32 %v2035_v20, %v814_v28  ;;  %1440 = vpow2.f32 %v978_v13  ;;  %v986_v28 = vmul.f32 1.442695, %v950_v14  ;;  %v2091_v59 = vpop.eup %1428  ;;  %v953_v62 = vsub.f32 %v1983_v43, %v2051_v34  ;;  %v2623_v13 = vld [vmem:[#allocation8_spill] sm:$0xff] }
  0x86   : > { %1442 = vpow2.f32 %v980_v4  ;;  %v988_v30 = vmul.f32 1.442695, %v951_v45  ;;  %v738_v16 = vsub.f32 %v1740_v9, %v1929_v19  ;;  %v954_v24 = vsub.f32 %v1750_v3, %v2051_v34  ;;  %v2621_v3 = vld [vmem:[#allocation5_spill] sm:$0xff] }
  0x87   : > { %v816_v44 = vadd.f32 %v2040_v50, %v815_v32  ;;  %1444 = vpow2.f32 %v982_v53  ;;  %v2098_v32 = vpop.eup %1430  ;;  %v739_v43 = vsub.f32 %v1744_v12, %v1929_v19  ;;  %v795_v56 = vmul.f32 1.442695, %v737_v57 }
  0x88   : > { %1446 = vpow2.f32 %v984_v40  ;;  %v2105_v58 = vpop.eup %1432  ;;  %v992_v26 = vmul.f32 1.442695, %v953_v62  ;;  %v740_v46 = vsub.f32 %v2621_v3, %v1929_v19  ;;  %v956_v42 = vsub.f32 %v2622_v54, %v2051_v34  ;;  %v2624_v40 = vld [vmem:[#allocation4_spill] sm:$0xff] }
  0x89   : > { %v817_v6 = vadd.f32 %v2049_v52, %v816_v44  ;;  %1448 = vpow2.f32 %v789_v7  ;;  %v990_v44 = vmul.f32 1.442695, %v952_v49  ;;  %v2109_v41 = vpop.eup %1434  ;;  %v741_v4 = vsub.f32 %v2623_v13, %v1929_v19  ;;  %v2625_v49 = vld [vmem:[#allocation11_spill] sm:$0xff] }
  0x8a   : > { %1450 = vpow2.f32 %v986_v28  ;;  %v2114_v21 = vpop.eup %1436  ;;  %v799_v53 = vmul.f32 1.442695, %v739_v43  ;;  %v957_v15 = vsub.f32 %v2624_v40, %v2051_v34  ;;  %v742_v28 = vsub.f32 %v2625_v49, %v1929_v19 }
  0x8b   : > { %v818_v55 = vadd.f32 %v2056_v39, %v817_v6  ;;  %1452 = vpow2.f32 %v791_v17  ;;  %v2620_v6 = vld [vmem:[#allocation2_spill] sm:$0xff]  ;;  %v2118_v36 = vpop.eup %1438  ;;  %v801_v57 = vmul.f32 1.442695, %v740_v46 }
  0x8c   : > { %v955_v48 = vsub.f32 %v2620_v6, %v2051_v34  ;;  %1454 = vpow2.f32 %v988_v30  ;;  %v2626_v30 = vld [vmem:[#allocation6_spill] sm:$0xff]  ;;  %v1000_v6 = vmul.f32 1.442695, %v957_v15 }
  0x8d   : > { %v819_v27 = vadd.f32 %v2059_v63, %v818_v55  ;;  %1456 = vpow2.f32 %v793_v23  ;;  %v797_v55 = vmul.f32 1.442695, %v738_v16  ;;  %v958_v16 = vsub.f32 %v2626_v30, %v2051_v34 }
  0x8e   : > { %1458 = vpow2.f32 %v990_v44  ;;  %v996_v7 = vmul.f32 1.442695, %v955_v48  ;;  %v998_v23 = vmul.f32 1.442695, %v956_v42 }
  0x8f   : > { %v820_v60 = vadd.f32 %v2070_v11, %v819_v27  ;;  %v994_v27 = vmul.f32 1.442695, %v954_v24  ;;  %v2123_v14 = vpop.eup %1440  ;;  %1460 = vpow2.f32 %v795_v56  ;;  %v803_v24 = vmul.f32 1.442695, %v741_v4  ;;  %v2627_v56 = vld [vmem:[#allocation7_spill] sm:$0xff] }
  0x90   : > { %1462 = vpow2.f32 %v992_v26  ;;  %v805_v26 = vmul.f32 1.442695, %v742_v28  ;;  %v1002_v42 = vmul.f32 1.442695, %v958_v16 }
  0x91   : > { %v821_v31 = vadd.f32 %v2079_v38, %v820_v60  ;;  %v2127_v60 = vpop.eup %1442  ;;  %1464 = vpow2.f32 %v797_v55 }
  0x92   : > { %v1042_v17 = vadd.f32 %v2127_v60, %v2123_v14  ;;  %1466 = vpow2.f32 %v994_v27 }
  0x93   : > { %v822_v29 = vadd.f32 %v2084_v10, %v821_v31  ;;  %v2132_v31 = vpop.eup %1444  ;;  %1468 = vpow2.f32 %v799_v53 }
  0x94   : > { %v1043_v19 = vadd.f32 %v2132_v31, %v1042_v17  ;;  %1470 = vpow2.f32 %v996_v7  ;;  %v2633_v17 = vld [vmem:[#allocation12_spill] sm:$0xff] }
  0x95   : > { %v823_v35 = vadd.f32 %v2091_v59, %v822_v29  ;;  %v2138_v29 = vpop.eup %1446  ;;  %1472 = vpow2.f32 %v801_v57 }
  0x96   : > { %v1044_v3 = vadd.f32 %v2138_v29, %v1043_v19  ;;  %1474 = vpow2.f32 %v998_v23 }
  0x97   : > { %v824_v9 = vadd.f32 %v2098_v32, %v823_v35  ;;  %v2143_v35 = vpop.eup %1448  ;;  %1476 = vpow2.f32 %v803_v24 }
  0x98   : > { %v2146_v44 = vpop.eup %1450  ;;  %1478 = vpow2.f32 %v1000_v6 }
  0x99   : > { %v825_v12 = vadd.f32 %v2105_v58, %v824_v9  ;;  %v959_v9 = vsub.f32 %v2627_v56, %v2051_v34  ;;  %v2151_v48 = vpop.eup %1452  ;;  %v1045_v13 = vadd.f32 %v2146_v44, %v1044_v3  ;;  %1480 = vpow2.f32 %v805_v26 }
  0x9a   : > { %v2154_v46 = vpop.eup %1454  ;;  %1482 = vpow2.f32 %v1002_v42 }
  0x9b   : > { %v826_v45 = vadd.f32 %v2109_v41, %v825_v12  ;;  %2628 = vst [vmem:[#allocation2_spill] sm:$0xff] %v2154_v46  ;;  %v2629_v12 = vld [vmem:[#allocation9_spill] sm:$0xff]  ;;  %v2159_v27 = vpop.eup %1456  ;;  %v1004_v15 = vmul.f32 1.442695, %v959_v9  ;;  %v1046_v49 = vadd.f32 %v2154_v46, %v1045_v13 }
  0x9c   : > { %v960_v54 = vsub.f32 %v2629_v12, %v2051_v34  ;;  %v2162_v4 = vpop.eup %1458  ;;  %v2637_v12 = vld [vmem:[#allocation14_spill] sm:$0xff] }
  0x9d   : > { %v827_v62 = vadd.f32 %v2114_v21, %v826_v45  ;;  %2630 = vst [vmem:[#allocation5_spill] sm:$0xff] %v2162_v4  ;;  %v2631_v45 = vld [vmem:[#allocation10_spill] sm:$0xff]  ;;  %v2167_v7 = vpop.eup %1460  ;;  %v1047_v23 = vadd.f32 %v2162_v4, %v1046_v49  ;;  %1484 = vpow2.f32 %v1004_v15  ;;  %v2639_v15 = vld [vmem:[#allocation15_spill] sm:$0xff] }
  0x9e   : > { %v961_v40 = vsub.f32 %v2631_v45, %v2051_v34  ;;  %v2170_v28 = vpop.eup %1462  ;;  %v1006_v30 = vmul.f32 1.442695, %v960_v54  ;;  %v964_v54 = vsub.f32 %v2637_v12, %v2051_v34  ;;  %v965_v49 = vsub.f32 %v2639_v15, %v2051_v34 }
  0x9f   : > { %v828_v43 = vadd.f32 %v2118_v36, %v827_v62  ;;  %2632 = vst [vmem:[#allocation3_spill] sm:$0xff] %v2170_v28  ;;  %v962_v62 = vsub.f32 %v2633_v17, %v2051_v34  ;;  %v2175_v16 = vpop.eup %1464  ;;  %v1048_v26 = vadd.f32 %v2170_v28, %v1047_v23 }
  0xa0   : > { %v2178_v24 = vpop.eup %1466  ;;  %v1008_v9 = vmul.f32 1.442695, %v961_v40  ;;  %1486 = vpow2.f32 %v1006_v30  ;;  %v2641_v30 = vld [vmem:[#allocation16_spill] sm:$0xff] }
  0xa1   : > { %v829_v55 = vadd.f32 %v2143_v35, %v828_v43  ;;  %2634 = vst [vmem:[#allocation8_spill] sm:$0xff] %v2178_v24  ;;  %v2635_v43 = vld [vmem:[#allocation13_spill] sm:$0xff]  ;;  %v2183_v6 = vpop.eup %1468  ;;  %v1010_v42 = vmul.f32 1.442695, %v962_v62 }
  0xa2   : > { %v963_v56 = vsub.f32 %v2635_v43, %v2051_v34  ;;  %v2186_v3 = vpop.eup %1470  ;;  %1488 = vpow2.f32 %v1008_v9  ;;  %v966_v43 = vsub.f32 %v2641_v30, %v2051_v34  ;;  %v2643_v9 = vld [vmem:[#allocation17_spill] sm:$0xff] }
  0xa3   : > { %v830_v53 = vadd.f32 %v2151_v48, %v829_v55  ;;  %2636 = vst [vmem:[#allocation4_spill] sm:$0xff] %v2186_v3  ;;  %v2191_v13 = vpop.eup %1472  ;;  %1490 = vpow2.f32 %v1010_v42 }
  0xa4   : > { %v2194_v45 = vpop.eup %1474 }
  0xa5   : > { %v831_v57 = vadd.f32 %v2159_v27, %v830_v53  ;;  %v1049_v53 = vadd.f32 %v2178_v24, %v1048_v26  ;;  %2638 = vst [vmem:[#allocation11_spill] sm:$0xff] %v2194_v45  ;;  %v2199_v17 = vpop.eup %1476  ;;  %v1014_v26 = vmul.f32 1.442695, %v964_v54  ;;  %v2644_v54 = vld [vmem:[#allocation18_spill] sm:$0xff] }
  0xa6   : > { %v968_v30 = vsub.f32 %v2644_v54, %v2051_v34 }
  0xa7   : > { %v832_v19 = vadd.f32 %v2167_v7, %v831_v57  ;;  %v1012_v57 = vmul.f32 1.442695, %v963_v56  ;;  %v1050_v23 = vadd.f32 %v2186_v3, %v1049_v53  ;;  %v967_v53 = vsub.f32 %v2643_v9, %v2051_v34  ;;  %v2645_v9 = vld [vmem:[#allocation19_spill] sm:$0xff] }
  0xa8   : > { %v1016_v3 = vmul.f32 1.442695, %v965_v49  ;;  %v1022_v4 = vmul.f32 1.442695, %v968_v30 }
  0xa9   : > { %v833_v55 = vadd.f32 %v2175_v16, %v832_v19  ;;  %v2202_v19 = vpop.eup %1478  ;;  %1492 = vpow2.f32 %v1012_v57  ;;  %v969_v57 = vsub.f32 %v2645_v9, %v2051_v34  ;;  %v1020_v49 = vmul.f32 1.442695, %v967_v53 }
  0xaa   : > { %2640 = vst [vmem:[#allocation6_spill] sm:$0xff] %v2202_v19  ;;  %v2207_v12 = vpop.eup %1480  ;;  %1494 = vpow2.f32 %v1014_v26 }
  0xab   : > { %v834_v40 = vadd.f32 %v2183_v6, %v833_v55  ;;  %v1051_v55 = vadd.f32 %v2194_v45, %v1050_v23  ;;  %v2210_v15 = vpop.eup %1482  ;;  %v1018_v23 = vmul.f32 1.442695, %v966_v43  ;;  %1496 = vpow2.f32 %v1016_v3 }
  0xac   : > { %2642 = vst [vmem:[#allocation7_spill] sm:$0xff] %v2210_v15  ;;  %v2216_v24 = vpop.eup %1484  ;;  %v1024_v54 = vmul.f32 1.442695, %v969_v57 }
  0xad   : > { %v835_v62 = vadd.f32 %v2191_v13, %v834_v40  ;;  %v1052_v40 = vadd.f32 %v2202_v19, %v1051_v55  ;;  %v2222_v28 = vpop.eup %1486  ;;  %1498 = vpow2.f32 %v1018_v23 }
  0xae   : > { %v2227_v19 = vpop.eup %1488  ;;  %1500 = vpow2.f32 %v1020_v49 }
  0xaf   : > { %v836_v56 = vadd.f32 %v2199_v17, %v835_v62  ;;  %v1053_v45 = vadd.f32 %v2210_v15, %v1052_v40  ;;  %v2230_v43 = vpop.eup %1490  ;;  %1502 = vpow2.f32 %v1022_v4 }
  0xb0   : > { %1504 = vpow2.f32 %v1024_v54 }
  0xb1   : > { %v837_v42 = vadd.f32 %v2207_v12, %v836_v56  ;;  %v1054_v55 = vadd.f32 %v2216_v24, %v1053_v45 }
  0xb3   : > { %v838_v62 = vrot.slane %v837_v42, 4  ;;  %v1055_v26 = vadd.f32 %v2222_v28, %v1054_v55  ;;  %v2233_v46 = vpop.eup %1492 }
  0xb4   : > { %v2236_v53 = vpop.eup %1494 }
  0xb5   : > { %v839_v56 = vadd.f32 %v838_v62, %v837_v42  ;;  %v1056_v15 = vadd.f32 %v2227_v19, %v1055_v26  ;;  %2646 = vst [vmem:[#allocation9_spill] sm:$0xff] %v2236_v53  ;;  %v2239_v23 = vpop.eup %1496 }
  0xb6   : > { %2647 = vst [vmem:[#allocation10_spill] sm:$0xff] %v2239_v23 }
  0xb7   : > { %v840_v40 = vrot.slane %v839_v56, 2  ;;  %v1057_v45 = vadd.f32 %v2230_v43, %v1056_v15  ;;  %v2242_v57 = vpop.eup %1498 }
  0xb8   : > { %2648 = vst [vmem:[#allocation12_spill] sm:$0xff] %v2242_v57  ;;  %v2245_v55 = vpop.eup %1500 }
  0xb9   : > { %v841_v3 = vadd.f32 %v840_v40, %v839_v56  ;;  %v1058_v30 = vadd.f32 %v2233_v46, %v1057_v45  ;;  %2649 = vst [vmem:[#allocation13_spill] sm:$0xff] %v2245_v55  ;;  %v2248_v15 = vpop.eup %1502  ;;  %v2650_v56 = vld [vmem:[#allocation20_spill] sm:$0xff]  ;;  %v2651_v40 = vld [vmem:[#allocation21_spill] sm:$0xff] }
  0xba   : > { %v970_v26 = vsub.f32 %v2650_v56, %v2051_v34  ;;  %v971_v54 = vsub.f32 %v2651_v40, %v2051_v34  ;;  %v2255_v45 = vpop.eup %1504 }
  0xbb   : > { %v842_v42 = vrot.slane %v841_v3, 1  ;;  %v1059_v9 = vadd.f32 %v2236_v53, %v1058_v30 }
  0xbc   : > { %v1028_v56 = vmul.f32 1.442695, %v971_v54 }
  0xbd   : > { %v843_v62 = vadd.f32 %v842_v42, %v841_v3  ;;  %v1060_v49 = vadd.f32 %v2239_v23, %v1059_v9  ;;  %v2652_v42 = vld [vmem:[#allocation22_spill] sm:$0xff]  ;;  %v974_v23 = vsub.f32 %v1918_v22, %v2051_v34 }
  0xbe   : > { %v972_v30 = vsub.f32 %v2652_v42, %v2051_v34 }
  0xbf   : > { %1506 = vrcp.f32 %v843_v62  ;;  %v1061_v4 = vadd.f32 %v2242_v57, %v1060_v49  ;;  %v1026_v62 = vmul.f32 1.442695, %v970_v26  ;;  %v2653_v49 = vld [vmem:[#allocation23_spill] sm:$0xff]  ;;  %v1034_v42 = vmul.f32 1.442695, %v974_v23 }
  0xc0   : > { %v973_v57 = vsub.f32 %v2653_v49, %v2051_v34  ;;  %v1030_v40 = vmul.f32 1.442695, %v972_v30 }
  0xc1   : > { %v1062_v3 = vadd.f32 %v2245_v55, %v1061_v4  ;;  %v975_v4 = vsub.f32 %v1926_v51, %v2051_v34  ;;  %1508 = vpow2.f32 %v1026_v62 }
  0xc2   : > { %1510 = vpow2.f32 %v1028_v56  ;;  %v1032_v26 = vmul.f32 1.442695, %v973_v57 }
  0xc3   : > { %v1063_v9 = vadd.f32 %v2248_v15, %v1062_v3  ;;  %v976_v3 = vsub.f32 %v1934_v0, %v2051_v34  ;;  %1512 = vpow2.f32 %v1030_v40  ;;  %v1036_v23 = vmul.f32 1.442695, %v975_v4 }
  0xc4   : > { %1514 = vpow2.f32 %v1032_v26 }
  0xc5   : > { %v1064_v53 = vadd.f32 %v2255_v45, %v1063_v9  ;;  %1516 = vpow2.f32 %v1034_v42 }
  0xc6   : > { %1518 = vpow2.f32 %v1036_v23 }
  0xc9   : > { %v2267_v55 = vpop.eup %1506 }
  0xca   : > { %v2273_v49 = vmul.f32 %v2267_v55, %v2059_v63  ;;  %v2277_v22 = vmul.f32 %v2267_v55, %v2070_v11  ;;  %v2281_v51 = vmul.f32 %v2267_v55, %v2079_v38  ;;  %v2285_v54 = vmul.f32 %v2267_v55, %v2084_v10 }
  0xcb   : > { %v2289_v0 = vmul.f32 %v2267_v55, %v2091_v59  ;;  %v2293_v63 = vmul.f32 %v2267_v55, %v2098_v32  ;;  %v2297_v11 = vmul.f32 %v2267_v55, %v2105_v58  ;;  %v2301_v38 = vmul.f32 %v2267_v55, %v2109_v41  ;;  %v2349_v57 = vpop.eup %1508 }
  0xcc   : > { %v2305_v10 = vmul.f32 %v2267_v55, %v2114_v21  ;;  %v2309_v59 = vmul.f32 %v2267_v55, %v2118_v36  ;;  %v2313_v32 = vmul.f32 %v2267_v55, %v2143_v35  ;;  %v2317_v58 = vmul.f32 %v2267_v55, %v2151_v48  ;;  %v2351_v30 = vpop.eup %1510 }
  0xcd   : > { %v2321_v41 = vmul.f32 %v2267_v55, %v2159_v27  ;;  %v2325_v21 = vmul.f32 %v2267_v55, %v2167_v7  ;;  %v2329_v36 = vmul.f32 %v2267_v55, %v2175_v16  ;;  %v2333_v35 = vmul.f32 %v2267_v55, %v2183_v6 }
  0xce   : > { %v2337_v48 = vmul.f32 %v2267_v55, %v2191_v13  ;;  %v2341_v27 = vmul.f32 %v2267_v55, %v2199_v17  ;;  %v2345_v7 = vmul.f32 %v2267_v55, %v2207_v12  ;;  %v977_v16 = vsub.f32 %v1952_v61, %v2051_v34  ;;  %v2353_v13 = vpop.eup %1512 }
  0xcf   : > { %v1038_v6 = vmul.f32 1.442695, %v976_v3  ;;  %v1065_v9 = vadd.f32 %v2349_v57, %v1064_v53  ;;  %v2357_v62 = vpop.eup %1514 }
  0xd0   : > { %v1040_v17 = vmul.f32 1.442695, %v977_v16  ;;  %2654 = vst [vmem:[#allocation14_spill] sm:$0xff] %v2357_v62  ;;  %v2360_v34 = vpop.eup %1516 }
  0xd1   : > { %1520 = vpow2.f32 %v1038_v6  ;;  %v1066_v12 = vadd.f32 %v2351_v30, %v1065_v9  ;;  %v2363_v40 = vpop.eup %1518 }
  0xd2   : > { %1522 = vpow2.f32 %v1040_v17 }
  0xd3   : > { %v1067_v61 = vadd.f32 %v2353_v13, %v1066_v12 }
  0xd5   : > { %v1068_v56 = vadd.f32 %v2357_v62, %v1067_v61  ;;  %v845_v61 = vmul.f32 %v2267_v55, %v1995_v25  ;;  %v852_v25 = vmul.f32 %v2267_v55, %v2025_v18 }
  0xd7   : > { %v1069_v4 = vadd.f32 %v2360_v34, %v1068_v56  ;;  %v846_v56 = vmul.f32 %v2267_v55, %v1997_v33  ;;  %v853_v33 = vmul.f32 %v2267_v55, %v2030_v5 }
  0xd9   : > { %v1070_v26 = vadd.f32 %v2363_v40, %v1069_v4  ;;  %v847_v4 = vmul.f32 %v2267_v55, %v2001_v37  ;;  %v854_v37 = vmul.f32 %v2267_v55, %v2035_v20 }
  0xdb   : > { %v2366_v3 = vpop.eup %1520  ;;  %v2403_v18 = vmul.f32 256.0, %v847_v4  ;;  %v2432_v4 = vmul.f32 256.0, %v2281_v51  ;;  %v2453_v51 = vmul.f32 256.0, %v2309_v59  ;;  %v2474_v59 = vmul.f32 256.0, %v2337_v48  ;;  %v2677_v48 = vld [vmem:[#allocation5_spill] sm:$0xff] }
  0xdc   : > { %v2369_v53 = vpop.eup %1522  ;;  %v1071_v42 = vadd.f32 %v2366_v3, %v1070_v26  ;;  %v848_v26 = vmul.f32 %v2267_v55, %v2005_v1  ;;  %v855_v1 = vmul.f32 %v2267_v55, %v2040_v50  ;;  %v2413_v50 = vmul.f32 256.0, %v852_v25 }
  0xdd   : > { %2659 = vst [vmem:[#allocation19_spill] sm:$0xff] %v2432_v4  ;;  %2666 = vst [vmem:[#allocation26_spill] sm:$0xff] %v2453_v51  ;;  %v2471_v25 = vmul.f32 256.0, %v2333_v35  ;;  %v2687_v51 = vld [vmem:[#allocation13_spill] sm:$0xff] }
  0xde   : > { %v1072_v16 = vadd.f32 %v2369_v53, %v1071_v42  ;;  %v849_v42 = vmul.f32 %v2267_v55, %v2010_v8  ;;  %v856_v8 = vmul.f32 %v2267_v55, %v2049_v52  ;;  %v2415_v52 = vmul.f32 256.0, %v853_v33  ;;  %2673 = vst [vmem:[#allocation33_spill] sm:$0xff] %v2474_v59 }
  0xdf   : > { %2672 = vst [vmem:[#allocation32_spill] sm:$0xff] %v2471_v25  ;;  %v2681_v25 = vld [vmem:[#allocation11_spill] sm:$0xff] }
  0xe0   : > { %v1073_v23 = vrot.slane %v1072_v16, 4  ;;  %v2407_v5 = vmul.f32 256.0, %v849_v42  ;;  %v2438_v42 = vmul.f32 256.0, %v2289_v0  ;;  %v2459_v0 = vmul.f32 256.0, %v2317_v58 }
  0xe1   : > { %v2480_v58 = vmul.f32 256.0, %v2345_v7  ;;  %v2680_v7 = vld [vmem:[#allocation4_spill] sm:$0xff] }
  0xe2   : > { %v1074_v6 = vadd.f32 %v1073_v23, %v1072_v16  ;;  %v850_v16 = vmul.f32 %v2267_v55, %v2015_v2  ;;  %v851_v23 = vmul.f32 %v2267_v55, %v2020_v47  ;;  %v857_v2 = vmul.f32 %v2267_v55, %v2056_v39  ;;  %2661 = vst [vmem:[#allocation21_spill] sm:$0xff] %v2438_v42 }
  0xe3   : > { %v2399_v47 = vmul.f32 256.0, %v845_v61  ;;  %v2419_v39 = vmul.f32 256.0, %v855_v1  ;;  %v2421_v55 = vmul.f32 256.0, %v856_v8  ;;  %v2426_v61 = vmul.f32 256.0, %v2273_v49  ;;  %2668 = vst [vmem:[#allocation28_spill] sm:$0xff] %v2459_v0  ;;  %2675 = vst [vmem:[#allocation35_spill] sm:$0xff] %v2480_v58 }
  0xe4   : > { %v1075_v17 = vrot.slane %v1074_v6, 2  ;;  %v2409_v20 = vmul.f32 256.0, %v850_v16  ;;  %v2441_v16 = vmul.f32 256.0, %v2293_v63  ;;  %v2447_v49 = vmul.f32 256.0, %v2301_v38  ;;  %v2685_v0 = vld [vmem:[#allocation10_spill] sm:$0xff] }
  0xe5   : > { %2655 = vst [vmem:[#allocation15_spill] sm:$0xff] %v2421_v55  ;;  %2657 = vst [vmem:[#allocation17_spill] sm:$0xff] %v2426_v61  ;;  %v2462_v63 = vmul.f32 256.0, %v2321_v41  ;;  %v2468_v38 = vmul.f32 256.0, %v2329_v36 }
  0xe6   : > { %v1076_v9 = vadd.f32 %v1075_v17, %v1074_v6  ;;  %v2401_v6 = vmul.f32 256.0, %v846_v56  ;;  %v2411_v17 = vmul.f32 256.0, %v851_v23  ;;  %v2429_v56 = vmul.f32 256.0, %v2277_v22  ;;  %2662 = vst [vmem:[#allocation22_spill] sm:$0xff] %v2441_v16  ;;  %2664 = vst [vmem:[#allocation24_spill] sm:$0xff] %v2447_v49 }
  0xe7   : > { %v2444_v23 = vmul.f32 256.0, %v2297_v11  ;;  %v2450_v22 = vmul.f32 256.0, %v2305_v10  ;;  %2669 = vst [vmem:[#allocation29_spill] sm:$0xff] %v2462_v63  ;;  %v2465_v11 = vmul.f32 256.0, %v2325_v21  ;;  %2671 = vst [vmem:[#allocation31_spill] sm:$0xff] %v2468_v38  ;;  %v2682_v38 = vld [vmem:[#allocation6_spill] sm:$0xff] }
  0xe8   : > { %v1077_v12 = vrot.slane %v1076_v9, 1  ;;  %2658 = vst [vmem:[#allocation18_spill] sm:$0xff] %v2429_v56  ;;  %v2684_v63 = vld [vmem:[#allocation9_spill] sm:$0xff] }
  0xe9   : > { %2663 = vst [vmem:[#allocation23_spill] sm:$0xff] %v2444_v23  ;;  %2665 = vst [vmem:[#allocation25_spill] sm:$0xff] %v2450_v22  ;;  %v2688_v22 = vld [vmem:[#allocation14_spill] sm:$0xff] }
  0xea   : > { %v1078_v62 = vadd.f32 %v1077_v12, %v1076_v9  ;;  %v2417_v9 = vmul.f32 256.0, %v854_v37  ;;  %v2423_v12 = vmul.f32 256.0, %v857_v2  ;;  %2670 = vst [vmem:[#allocation30_spill] sm:$0xff] %v2465_v11  ;;  %v2676_v37 = vld [vmem:[#allocation2_spill] sm:$0xff]  ;;  %v2678_v2 = vld [vmem:[#allocation3_spill] sm:$0xff] }
  0xeb   : > { %v2683_v11 = vld [vmem:[#allocation7_spill] sm:$0xff] }
  0xec   : > { %1524 = vrcp.f32 %v1078_v62  ;;  %v2405_v62 = vmul.f32 256.0, %v848_v26  ;;  %2656 = vst [vmem:[#allocation16_spill] sm:$0xff] %v2423_v12  ;;  %v2435_v26 = vmul.f32 256.0, %v2285_v54  ;;  %v2456_v54 = vmul.f32 256.0, %v2313_v32 }
  0xed   : > { %v2477_v32 = vmul.f32 256.0, %v2341_v27 }
  0xee   : > { %2660 = vst [vmem:[#allocation20_spill] sm:$0xff] %v2435_v26  ;;  %2667 = vst [vmem:[#allocation27_spill] sm:$0xff] %v2456_v54  ;;  %v2686_v54 = vld [vmem:[#allocation12_spill] sm:$0xff] }
  0xef   : > { %2674 = vst [vmem:[#allocation34_spill] sm:$0xff] %v2477_v32  ;;  %v2679_v32 = vld [vmem:[#allocation8_spill] sm:$0xff] }
  0xf6   : > { %v1525_v10 = vpop.eup %1524 }
  0xf7   : > { %v1080_v41 = vmul.f32 %v1525_v10, %v2123_v14  ;;  %v1081_v21 = vmul.f32 %v1525_v10, %v2127_v60  ;;  %v1082_v36 = vmul.f32 %v1525_v10, %v2132_v31  ;;  %v1083_v33 = vmul.f32 %v1525_v10, %v2138_v29 }
  0xf8   : > { %v1084_v35 = vmul.f32 %v1525_v10, %v2146_v44  ;;  %v1085_v1 = vmul.f32 %v1525_v10, %v2676_v37  ;;  %v1086_v8 = vmul.f32 %v1525_v10, %v2677_v48  ;;  %v1087_v27 = vmul.f32 %v1525_v10, %v2678_v2 }
  0xf9   : > { %v1088_v59 = vmul.f32 %v1525_v10, %v2679_v32  ;;  %v1089_v58 = vmul.f32 %v1525_v10, %v2680_v7  ;;  %v1090_v14 = vmul.f32 %v1525_v10, %v2681_v25  ;;  %v1091_v60 = vmul.f32 %v1525_v10, %v2682_v38 }
  0xfa   : > { %v1092_v31 = vmul.f32 %v1525_v10, %v2683_v11  ;;  %v1093_v29 = vmul.f32 %v1525_v10, %v2216_v24  ;;  %v1094_v44 = vmul.f32 %v1525_v10, %v2222_v28  ;;  %v1095_v37 = vmul.f32 %v1525_v10, %v2227_v19 }
  0xfb   : > { %v1096_v48 = vmul.f32 %v1525_v10, %v2230_v43  ;;  %v1097_v2 = vmul.f32 %v1525_v10, %v2233_v46  ;;  %v1098_v32 = vmul.f32 %v1525_v10, %v2684_v63  ;;  %v1099_v7 = vmul.f32 %v1525_v10, %v2685_v0 }
  0xfc   : > { %v1100_v25 = vmul.f32 %v1525_v10, %v2686_v54  ;;  %v1101_v38 = vmul.f32 %v1525_v10, %v2687_v51  ;;  %v1102_v11 = vmul.f32 %v1525_v10, %v2248_v15  ;;  %v1103_v24 = vmul.f32 %v1525_v10, %v2255_v45 }
  0xfd   : > { %v1104_v28 = vmul.f32 %v1525_v10, %v2349_v57  ;;  %v1105_v19 = vmul.f32 %v1525_v10, %v2351_v30  ;;  %v1106_v43 = vmul.f32 %v1525_v10, %v2353_v13  ;;  %v1107_v46 = vmul.f32 %v1525_v10, %v2688_v22 }
  0xfe   : > { %v1108_v63 = vmul.f32 %v1525_v10, %v2360_v34  ;;  %v1109_v0 = vmul.f32 %v1525_v10, %v2363_v40  ;;  %v1110_v54 = vmul.f32 %v1525_v10, %v2366_v3  ;;  %v1111_v51 = vmul.f32 %v1525_v10, %v2369_v53 }
  0xff   : > { %v1112_v49 = vmul.f32 256.0, %v1080_v41  ;;  %v1113_v15 = vmul.f32 256.0, %v1081_v21  ;;  %v1114_v23 = vmul.f32 256.0, %v1082_v36  ;;  %v1115_v45 = vmul.f32 256.0, %v1083_v33 }
 0x100   : > { %v1116_v16 = vmul.f32 256.0, %v1084_v35  ;;  %v1117_v57 = vmul.f32 256.0, %v1085_v1  ;;  %v1118_v42 = vmul.f32 256.0, %v1086_v8  ;;  %v1119_v30 = vmul.f32 256.0, %v1087_v27 }
 0x101   : > { %v1120_v26 = vmul.f32 256.0, %v1088_v59  ;;  %v1121_v13 = vmul.f32 256.0, %v1089_v58  ;;  %v1122_v4 = vmul.f32 256.0, %v1090_v14  ;;  %v1123_v22 = vmul.f32 256.0, %v1091_v60 }
 0x102   : > { %v1124_v56 = vmul.f32 256.0, %v1092_v31  ;;  %v1125_v34 = vmul.f32 256.0, %v1093_v29  ;;  %v1126_v61 = vmul.f32 256.0, %v1094_v44  ;;  %v1127_v40 = vmul.f32 256.0, %v1095_v37 }
 0x103   : > { %v1128_v12 = vmul.f32 256.0, %v1096_v48  ;;  %v1129_v3 = vmul.f32 256.0, %v1097_v2  ;;  %v1130_v55 = vmul.f32 256.0, %v1098_v32  ;;  %v1131_v53 = vmul.f32 256.0, %v1099_v7 }
 0x104   : > { %v1132_v10 = vmul.f32 256.0, %v1100_v25  ;;  %v1133_v41 = vmul.f32 256.0, %v1101_v38  ;;  %v1134_v21 = vmul.f32 256.0, %v1102_v11  ;;  %v1135_v36 = vmul.f32 256.0, %v1103_v24  ;;  %v2690_v38 = vld [vmem:[#allocation16_spill] sm:$0xff]  ;;  %v2692_v11 = vld [vmem:[#allocation18_spill] sm:$0xff] }
 0x105   : > { %v1136_v33 = vmul.f32 256.0, %v1104_v28  ;;  %v1137_v35 = vmul.f32 256.0, %v1105_v19  ;;  %v1138_v1 = vmul.f32 256.0, %v1106_v43  ;;  %v1139_v8 = vmul.f32 256.0, %v1107_v46  ;;  %v2694_v24 = vld [vmem:[#allocation20_spill] sm:$0xff]  ;;  %v2696_v28 = vld [vmem:[#allocation22_spill] sm:$0xff] }
 0x106   : > { %v1140_v59 = vmul.f32 256.0, %v1108_v63  ;;  %v1141_v58 = vmul.f32 256.0, %v1109_v0  ;;  %v1142_v27 = vmul.f32 256.0, %v1110_v54  ;;  %v1143_v14 = vmul.f32 256.0, %v1111_v51  ;;  %v2698_v19 = vld [vmem:[#allocation24_spill] sm:$0xff]  ;;  %v2700_v46 = vld [vmem:[#allocation26_spill] sm:$0xff] }
 0x107   : > { %v1144_v60 = vsub.f32 %v2399_v47, %v1112_v49  ;;  %v1145_v31 = vsub.f32 %v2401_v6, %v1113_v15  ;;  %v1146_v29 = vsub.f32 %v2403_v18, %v1114_v23  ;;  %v1147_v44 = vsub.f32 %v2405_v62, %v1115_v45  ;;  %v2689_v49 = vld [vmem:[#allocation15_spill] sm:$0xff]  ;;  %v2691_v23 = vld [vmem:[#allocation17_spill] sm:$0xff]  ;;  %v2702_v54 = vld [vmem:[#allocation28_spill] sm:$0xff] }
 0x108   : > { %v1148_v37 = vsub.f32 %v2407_v5, %v1116_v16  ;;  %v1149_v48 = vsub.f32 %v2409_v20, %v1117_v57  ;;  %v1150_v2 = vsub.f32 %v2411_v17, %v1118_v42  ;;  %v1151_v32 = vsub.f32 %v2413_v50, %v1119_v30  ;;  %v2693_v16 = vld [vmem:[#allocation19_spill] sm:$0xff]  ;;  %v2695_v42 = vld [vmem:[#allocation21_spill] sm:$0xff]  ;;  %v2704_v45 = vld [vmem:[#allocation30_spill] sm:$0xff] }
 0x109   : > { %v1152_v7 = vsub.f32 %v2415_v52, %v1120_v26  ;;  %v1153_v25 = vsub.f32 %v2417_v9, %v1121_v13  ;;  %v1154_v47 = vsub.f32 %v2419_v39, %v1122_v4  ;;  %v1155_v6 = vsub.f32 %v2689_v49, %v1123_v22  ;;  %v2697_v26 = vld [vmem:[#allocation23_spill] sm:$0xff]  ;;  %v2699_v4 = vld [vmem:[#allocation25_spill] sm:$0xff]  ;;  %v2706_v13 = vld [vmem:[#allocation32_spill] sm:$0xff] }
 0x10a   : > { %v1156_v18 = vsub.f32 %v2690_v38, %v1124_v56  ;;  %v1157_v62 = vsub.f32 %v2691_v23, %v1125_v34  ;;  %v1158_v5 = vsub.f32 %v2692_v11, %v1126_v61  ;;  %v1159_v20 = vsub.f32 %v2693_v16, %v1127_v40  ;;  %v2701_v63 = vld [vmem:[#allocation27_spill] sm:$0xff]  ;;  %v2703_v51 = vld [vmem:[#allocation29_spill] sm:$0xff]  ;;  %v2708_v40 = vld [vmem:[#allocation34_spill] sm:$0xff] }
 0x10b   : > { %v1160_v17 = vsub.f32 %v2694_v24, %v1128_v12  ;;  %v1161_v50 = vsub.f32 %v2695_v42, %v1129_v3  ;;  %v1162_v52 = vsub.f32 %v2696_v28, %v1130_v55  ;;  %v1163_v9 = vsub.f32 %v2697_v26, %v1131_v53  ;;  %v2705_v57 = vld [vmem:[#allocation31_spill] sm:$0xff]  ;;  %v2707_v22 = vld [vmem:[#allocation33_spill] sm:$0xff] }
 0x10c   : > { %v1164_v39 = vsub.f32 %v2698_v19, %v1132_v10  ;;  %v1165_v43 = vsub.f32 %v2699_v4, %v1133_v41  ;;  %v1166_v56 = vsub.f32 %v2700_v46, %v1134_v21  ;;  %v1167_v0 = vsub.f32 %v2701_v63, %v1135_v36  ;;  %v2709_v53 = vld [vmem:[#allocation35_spill] sm:$0xff] }
 0x10d   : > { %v1168_v61 = vsub.f32 %v2702_v54, %v1136_v33  ;;  %v1169_v15 = vsub.f32 %v2703_v51, %v1137_v35  ;;  %v1170_v12 = vsub.f32 %v2704_v45, %v1138_v1  ;;  %v1171_v30 = vsub.f32 %v2705_v57, %v1139_v8 }
 0x10e   : > { %v1172_v55 = vsub.f32 %v2706_v13, %v1140_v59  ;;  %v1173_v34 = vsub.f32 %v2707_v22, %v1141_v58  ;;  %v1174_v3 = vsub.f32 %v2708_v40, %v1142_v27  ;;  %v1175_v10 = vsub.f32 %v2709_v53, %v1143_v14 }
 0x10f   : > { %v1177_v41 = vmul.f32 %v1144_v60, %v1144_v60  ;;  %v1178_v21 = vmul.f32 %v1145_v31, %v1145_v31  ;;  %v1179_v49 = vmul.f32 %v1146_v29, %v1146_v29  ;;  %v1180_v36 = vmul.f32 %v1147_v44, %v1147_v44 }
 0x110   : > { %v1181_v33 = vmul.f32 %v1148_v37, %v1148_v37  ;;  %v1182_v35 = vmul.f32 %v1149_v48, %v1149_v48  ;;  %v1183_v1 = vmul.f32 %v1150_v2, %v1150_v2  ;;  %v1184_v8 = vmul.f32 %v1151_v32, %v1151_v32 }
 0x111   : > { %v1209_v38 = vadd.f32 %v1178_v21, %v1177_v41  ;;  %v1185_v59 = vmul.f32 %v1152_v7, %v1152_v7  ;;  %v1186_v58 = vmul.f32 %v1153_v25, %v1153_v25  ;;  %v1187_v27 = vmul.f32 %v1154_v47, %v1154_v47 }
 0x112   : > { %v1188_v14 = vmul.f32 %v1155_v6, %v1155_v6  ;;  %v1189_v31 = vmul.f32 %v1156_v18, %v1156_v18  ;;  %v1190_v44 = vmul.f32 %v1157_v62, %v1157_v62  ;;  %v1191_v37 = vmul.f32 %v1158_v5, %v1158_v5 }
 0x113   : > { %v1210_v23 = vadd.f32 %v1209_v38, %v1179_v49  ;;  %v1192_v48 = vmul.f32 %v1159_v20, %v1159_v20  ;;  %v1193_v2 = vmul.f32 %v1160_v17, %v1160_v17  ;;  %v1194_v32 = vmul.f32 %v1161_v50, %v1161_v50 }
 0x114   : > { %v1195_v7 = vmul.f32 %v1162_v52, %v1162_v52  ;;  %v1196_v25 = vmul.f32 %v1163_v9, %v1163_v9  ;;  %v1197_v47 = vmul.f32 %v1164_v39, %v1164_v39  ;;  %v1198_v6 = vmul.f32 %v1165_v43, %v1165_v43 }
 0x115   : > { %v1211_v11 = vadd.f32 %v1210_v23, %v1180_v36  ;;  %v1199_v18 = vmul.f32 %v1166_v56, %v1166_v56  ;;  %v1200_v62 = vmul.f32 %v1167_v0, %v1167_v0  ;;  %v1201_v5 = vmul.f32 %v1168_v61, %v1168_v61 }
 0x116   : > { %v1202_v20 = vmul.f32 %v1169_v15, %v1169_v15  ;;  %v1203_v17 = vmul.f32 %v1170_v12, %v1170_v12  ;;  %v1204_v50 = vmul.f32 %v1171_v30, %v1171_v30  ;;  %v1205_v52 = vmul.f32 %v1172_v55, %v1172_v55  ;;  %v1176_v30 = vld [vmem:[%s2557_s2] sm:$0x1] }
 0x117   : > { %v1212_v16 = vadd.f32 %v1211_v11, %v1181_v33  ;;  %v1206_v9 = vmul.f32 %v1173_v34, %v1173_v34  ;;  %v1207_v39 = vmul.f32 %v1174_v3, %v1174_v3  ;;  %v1208_v43 = vmul.f32 %v1175_v10, %v1175_v10 }
 0x119   : > { %v1213_v24 = vadd.f32 %v1212_v16, %v1182_v35 }
 0x11b   : > { %v1214_v42 = vadd.f32 %v1213_v24, %v1183_v1 }
 0x11d   : > { %v1215_v28 = vadd.f32 %v1214_v42, %v1184_v8 }
 0x11f   : > { %v1216_v26 = vadd.f32 %v1215_v28, %v1185_v59 }
 0x121   : > { %v1217_v60 = vadd.f32 %v1216_v26, %v1186_v58 }
 0x123   : > { %v1218_v29 = vadd.f32 %v1217_v60, %v1187_v27 }
 0x125   : > { %v1219_v19 = vadd.f32 %v1218_v29, %v1188_v14 }
 0x127   : > { %v1220_v4 = vadd.f32 %v1219_v19, %v1189_v31 }
 0x129   : > { %v1221_v46 = vadd.f32 %v1220_v4, %v1190_v44 }
 0x12b   : > { %v1222_v63 = vadd.f32 %v1221_v46, %v1191_v37 }
 0x12d   : > { %v1223_v54 = vadd.f32 %v1222_v63, %v1192_v48 }
 0x12f   : > { %v1224_v51 = vadd.f32 %v1223_v54, %v1193_v2 }
 0x131   : > { %v1225_v45 = vadd.f32 %v1224_v51, %v1194_v32 }
 0x133   : > { %v1226_v57 = vadd.f32 %v1225_v45, %v1195_v7 }
 0x135   : > { %v1227_v13 = vadd.f32 %v1226_v57, %v1196_v25 }
 0x137   : > { %v1228_v22 = vadd.f32 %v1227_v13, %v1197_v47 }
 0x139   : > { %v1229_v40 = vadd.f32 %v1228_v22, %v1198_v6 }
 0x13b   : > { %v1230_v53 = vadd.f32 %v1229_v40, %v1199_v18 }
 0x13d   : > { %v1231_v41 = vadd.f32 %v1230_v53, %v1200_v62 }
 0x13f   : > { %v1232_v21 = vadd.f32 %v1231_v41, %v1201_v5 }
 0x141   : > { %v1233_v49 = vadd.f32 %v1232_v21, %v1202_v20 }
 0x143   : > { %v1234_v36 = vadd.f32 %v1233_v49, %v1203_v17 }
 0x145   : > { %v1235_v38 = vadd.f32 %v1234_v36, %v1204_v50 }
 0x147   : > { %v1236_v33 = vadd.f32 %v1235_v38, %v1205_v52 }
 0x149   : > { %v1237_v23 = vadd.f32 %v1236_v33, %v1206_v9 }
 0x14b   : > { %v1238_v56 = vadd.f32 %v1237_v23, %v1207_v39 }
 0x14d   : > { %v1239_v35 = vadd.f32 %v1238_v56, %v1208_v43 }
 0x14f   : > { %1240 = vadd.xlane.f32.xlu0 %v1239_v35 }
 0x1dc   : > { %v1241_v0 = vpop.xlane.xlu0 %1240 }
 0x1dd   : > { %v1242_v61 = vrot.slane %v1241_v0, 4 }
 0x1df   : > { %v1243_v11 = vadd.f32 %v1242_v61, %v1241_v0 }
 0x1e1   : > { %v1244_v15 = vrot.slane %v1243_v11, 2 }
 0x1e3   : > { %v1245_v1 = vadd.f32 %v1244_v15, %v1243_v11 }
 0x1e5   : > { %v1246_v12 = vrot.slane %v1245_v1, 1 }
 0x1e7   : > { %v1247_v16 = vadd.f32 %v1246_v12, %v1245_v1 }
 0x1e9   : > { %1383 = vpush %v1247_v16 }
 0x21a   : > { %s1384_s25 = spop %1383 }
 0x21b   : > { %v1249_v55 = vstv %s1384_s25 }
 0x21c   : > { %v1250_v34 = vadd.f32 %v1249_v55, %v1176_v30 }
 0x21e   : > { %1251 = vst [vmem:[%s2557_s2] sm:$0x1] %v1250_v34 }
 0x21f PF: > { %s12_s9 = sadd.s32 1, %s1532_s9  }
 0x220   : > { %p9_p6 = scmp.ge.s32.totalorder %s12_s9, 4  }
 0x222   :  { %11 = sbr.rel (!%p9_p6) target bundleno = 1 (0x1), region = 61 }

// kernel: swag_content_loss.7
= control target key start
LH: loop header
LB: loop body
LE: loop exit
PB: predicated region body
PF: predicated region fallthrough
CT: control target
= control target key end

     0   :  { %s5101_s15 = smov 0   ;;  %s6425_s0 = inlined_call_operand.vmem [shape: f32[4,18,18,3], index: 0, kind: input, shape index: {}]   ;;  %s6426_s1 = inlined_call_operand.vmem [shape: bf16[27,128], index: 1, kind: input, shape index: {}]   ;;  %s6427_s2 = inlined_call_operand.vmem [shape: f32[1,128], index: 2, kind: input, shape index: {}]   ;;  %s6428_s3 = inlined_call_operand.vmem [shape: f32[1,128], index: 3, kind: input, shape index: {}]   ;;  %s6429_s4 = inlined_call_operand.vmem [shape: bf16[4,18,18,128], index: 4, kind: output, shape index: {}]  }
   0x1 LB: > { %s3593_s16 = sadd.s32 4294967295, %s5073_s15   ;;  %p3597_p0 = scmp.ge.s32.totalorder %s5073_s15, 1  ;;  %s5073_s15 = sphi %s5101_s15, %s14_s15  }
   0x2   : > { %p162_p1 = scmp.lt.s32.totalorder %s5073_s15, 5 }
   0x4   : > { %p163_p2 = pnand %p3597_p0, %p162_p1 }
   0x6   : > { %166 = sbr.rel (%p163_p2) target bundleno = 539 (0x21b), region = 36 }
   0xd   : > { %v4000_v0 = vld [vmem:[%s6426_s1] sm:$0xff]   ;;  %p188_p3 = scmp.lt.s32.totalorder %s3593_s16, 3  ;;  %v490_v3 = vld [vmem:[%s6426_s1 + $0x8] sm:$0xf]  ;;  %vm563_vm0 = vcmask 1042432   ;;  %vm1939_vm1 = vcmask 1040384  }
   0xe   : > { %v5112_v1 = vunpack.c.l.bf16 %v4000_v0  ;;  %v5114_v2 = vunpack.c.h.bf16 %v4000_v0  ;;  %v5121_v4 = vunpack.c.l.bf16 %v490_v3  ;;  %vm300_vm2 = vcmask 1046528  }
   0xf   : > { %s6613_s16 = smov (!%p188_p3, %s3593_s16), 3  ;;  %vm498_vm3 = vcmask 23552   ;;  %vm1083_vm4 = vcmask 1041408   ;;  %vm381_vm5 = vcmask 1045504  }
  0x10   : > { %v497_v5 = vrot.slane %v5112_v1, 3  ;;  %v5125_v6 = vrot.slane %v5114_v2, 4  ;;  %v1940_v7 = vrot.slane %v5114_v2, 7  ;;  %s5056_s21 = smul.u32 432, %s6613_s16  ;;  %v1941_v8 = vrot.slane %v5121_v4, 7 }
  0x11   : > { %v1084_v13 = vrot.slane %v5112_v1, 6  ;;  %v1085_v23 = vrot.slane %v5114_v2, 6  ;;  %v6430_v29 = vrot.slane %v5121_v4, 2  ;;  %s5057_s27 = smul.u32 216, %s6613_s16 }
  0x12   : > { %4348 = vmatprep.subr.msk.mxu1 %vm563_vm0, %v497_v5  ;;  %4548 = vmatprep.subr.msk.mxu0 %vm563_vm0, %v5125_v6  ;;  %s5139_s24 = scalar_lea.vmem %s6425_s0, %s5056_s21  ;;  %v1942_v9 = vsel %vm1939_vm1, %v1940_v7, %v1941_v8 }
  0x13   : > { %4349 = vmatpush3.msk.msra.mxu1 %vm563_vm0, %v497_v5  ;;  %4549 = vmatpush3.msk.msra.mxu0 %vm563_vm0, %v5125_v6  ;;  %v5143_v10 = vld [vmem:[%s5139_s24] sm:$0xff]  ;;  %v5146_v11 = vld [vmem:[%s5139_s24 + $0x8] sm:$0xff]  ;;  %v5151_v12 = vld [vmem:[%s5139_s24 + $0x18] sm:$0xff]  ;;  %v5215_v43 = vsel %vm1083_vm4, %v1084_v13, %v1085_v23  ;;  %s6228_s30 = scalar_lea.vmem %s6429_s4, %s5057_s27 }
  0x14   : > { %4398 = vmatprep.subr.msk.mxu1 %vm563_vm0, %v5112_v1  ;;  %6506 = vst [vmem:[#allocation2_spill] sm:$0xff] %v5151_v12  ;;  %4598 = vmatprep.subr.msk.mxu0 %vm563_vm0, %v1942_v9  ;;  %v301_v14 = vrot.slane %v5143_v10, 1  ;;  %v302_v15 = vrot.slane %v5146_v11, 1  ;;  %v5158_v16 = vld [vmem:[%s5139_s24 + $0x20] sm:$0xff]  ;;  %v306_v17 = vrot.slane %v5151_v12, 1  ;;  %v5170_v22 = vld [vmem:[%s5139_s24 + $0x30] sm:$0xff] }
  0x15   : > { %6507 = vst [vmem:[#allocation3_spill] sm:$0xff] %v5158_v16  ;;  %v5162_v18 = vld [vmem:[%s5139_s24 + $0x10] sm:$0x3]  ;;  %v307_v19 = vrot.slane %v5158_v16, 1  ;;  %v5167_v21 = vld [vmem:[%s5139_s24 + $0x28] sm:$0x3] }
  0x16   : > { %v304_v20 = vrot.slane %v5162_v18, 1  ;;  %v303_v24 = vsel %vm300_vm2, %v301_v14, %v302_v15  ;;  %v309_v25 = vrot.slane %v5167_v21, 1  ;;  %v5176_v26 = vld [vmem:[%s5139_s24 + $0x38] sm:$0xff]  ;;  %v311_v27 = vrot.slane %v5170_v22, 1  ;;  %v5180_v28 = vld [vmem:[%s5139_s24 + $0x40] sm:$0x3] }
  0x17   : > { %4350 = vmatprep.mubr.msk.f32.mxu1 %vm498_vm3, %v303_v24  ;;  %v308_v30 = vsel %vm300_vm2, %v306_v17, %v307_v19  ;;  %v312_v32 = vrot.slane %v5176_v26, 1  ;;  %v314_v33 = vrot.slane %v5180_v28, 1  ;;  %v5189_v34 = vld [vmem:[%s5139_s24 + $0x48] sm:$0xff]  ;;  %v5192_v35 = vld [vmem:[%s5139_s24 + $0x50] sm:$0xff]  ;;  %v5195_v36 = vld [vmem:[%s5139_s24 + $0x58] sm:$0x3] }
  0x18   : > { %v305_v31 = vsel %vm300_vm2, %v302_v15, %v304_v20  ;;  %4550 = vmatprep.mubr.msk.f32.mxu0 %vm498_vm3, %v308_v30  ;;  %v310_v37 = vsel %vm300_vm2, %v307_v19, %v309_v25  ;;  %v316_v38 = vrot.slane %v5189_v34, 1  ;;  %v317_v39 = vrot.slane %v5192_v35, 1  ;;  %v5203_v40 = vld [vmem:[%s5139_s24 + $0x60] sm:$0xff]  ;;  %v5206_v41 = vld [vmem:[%s5139_s24 + $0x68] sm:$0xff]  ;;  %v5231_v49 = vld [vmem:[%s5139_s24 + $0x70] sm:$0x3] }
  0x19   : > { %4351 = vmatmul.mubr.msk.f32.vlgmr.msra.gmra.mrb[0].mxu1 %vm498_vm3, %v305_v31  ;;  %4551 = vmatmul.mubr.msk.f32.vlgmr.msra.gmra.mrb[0].mxu0 %vm498_vm3, %v310_v37  ;;  %v5212_v42 = vsel %vm300_vm2, %v311_v27, %v312_v32  ;;  %v5220_v44 = vsel %vm300_vm2, %v312_v32, %v314_v33  ;;  %v319_v45 = vrot.slane %v5195_v36, 1  ;;  %v321_v47 = vrot.slane %v5203_v40, 1  ;;  %v5238_v50 = vld [vmem:[%s5139_s24 + $0x78] sm:$0xff]  ;;  %v5241_v51 = vld [vmem:[%s5139_s24 + $0x80] sm:$0xff]  ;;  %v5261_v57 = vld [vmem:[%s5139_s24 + $0x88] sm:$0x3] }
  0x1a   : > { %4399 = vmatpush3.msk.msra.mxu1 %vm563_vm0, %v5112_v1  ;;  %6508 = vst [vmem:[#allocation4_spill] sm:$0xff] %v5212_v42  ;;  %4599 = vmatpush3.msk.msra.mxu0 %vm563_vm0, %v1942_v9  ;;  %6509 = vst [vmem:[#allocation5_spill] sm:$0xff] %v5220_v44  ;;  %v5226_v46 = vsel %vm300_vm2, %v316_v38, %v317_v39  ;;  %v322_v48 = vrot.slane %v5206_v41, 1  ;;  %v324_v53 = vrot.slane %v5231_v49, 1  ;;  %v326_v55 = vrot.slane %v5238_v50, 1  ;;  %v5266_v58 = vld [vmem:[%s5139_s24 + $0x90] sm:$0xff] }
  0x1b   : > { %4353 = vmatprep.mubr.msk.f32.mxu1 %vm498_vm3, %v308_v30  ;;  %4553 = vmatprep.mubr.msk.f32.mxu0 %vm498_vm3, %v5212_v42  ;;  %6510 = vst [vmem:[#allocation6_spill] sm:$0xff] %v5226_v46  ;;  %v5252_v52 = vsel %vm300_vm2, %v317_v39, %v319_v45  ;;  %v327_v56 = vrot.slane %v5241_v51, 1  ;;  %v5269_v59 = vld [vmem:[%s5139_s24 + $0x98] sm:$0xff]  ;;  %v329_v61 = vrot.slane %v5261_v57, 1  ;;  %v331_v63 = vrot.slane %v5266_v58, 1  ;;  %v5292_v3 = vld [vmem:[%s5139_s24 + $0xa8] sm:$0xff] }
  0x1c   : > { %4648 = vmatprep.subr.msk.mxu0 %vm563_vm0, %v6430_v29  ;;  %4448 = vmatprep.subr.msk.mxu1 %vm563_vm0, %v5215_v43  ;;  %6511 = vst [vmem:[#allocation7_spill] sm:$0xff] %v5252_v52  ;;  %v5256_v54 = vsel %vm300_vm2, %v321_v47, %v322_v48  ;;  %v5278_v60 = vsel %vm300_vm2, %v322_v48, %v324_v53  ;;  %v332_v0 = vrot.slane %v5269_v59, 1  ;;  %v5287_v1 = vld [vmem:[%s5139_s24 + $0xa0] sm:$0x3]  ;;  %v5295_v5 = vld [vmem:[%s5139_s24 + $0xb0] sm:$0xff]  ;;  %v336_v13 = vrot.slane %v5292_v3, 1 }
  0x1d   : > { %4354 = vmatmul.mubr.msk.f32.gmra.mrb[2].mxu1 %vm498_vm3, %v310_v37  ;;  %4554 = vmatmul.mubr.msk.f32.gmra.mrb[2].mxu0 %vm498_vm3, %v5220_v44  ;;  %6512 = vst [vmem:[#allocation8_spill] sm:$0xff] %v5256_v54  ;;  %6513 = vst [vmem:[#allocation9_spill] sm:$0xff] %v5278_v60  ;;  %v5282_v62 = vsel %vm300_vm2, %v326_v55, %v327_v56  ;;  %v5304_v7 = vsel %vm300_vm2, %v327_v56, %v329_v61  ;;  %v334_v8 = vrot.slane %v5287_v1, 1  ;;  %v5313_v15 = vld [vmem:[%s5139_s24 + $0xb8] sm:$0x3]  ;;  %v5318_v17 = vld [vmem:[%s5139_s24 + $0xc0] sm:$0xff] }
  0x1e   : > { %4356 = vmatprep.mubr.msk.f32.mxu1 %vm498_vm3, %v5212_v42  ;;  %4556 = vmatprep.mubr.msk.f32.mxu0 %vm498_vm3, %v5226_v46  ;;  %6514 = vst [vmem:[#allocation10_spill] sm:$0xff] %v5282_v62  ;;  %6515 = vst [vmem:[#allocation11_spill] sm:$0xff] %v5304_v7  ;;  %v5308_v9 = vsel %vm300_vm2, %v331_v63, %v332_v0  ;;  %v337_v14 = vrot.slane %v5295_v5, 1  ;;  %v5321_v19 = vld [vmem:[%s5139_s24 + $0xc8] sm:$0xff]  ;;  %v339_v23 = vrot.slane %v5313_v15, 1  ;;  %v341_v25 = vrot.slane %v5318_v17, 1 }
  0x1f   : > { %6516 = vst [vmem:[#allocation12_spill] sm:$0xff] %v5308_v9  ;;  %v5330_v20 = vsel %vm300_vm2, %v332_v0, %v334_v8  ;;  %v342_v27 = vrot.slane %v5321_v19, 1  ;;  %v5339_v30 = vld [vmem:[%s5139_s24 + $0xd0] sm:$0x3]  ;;  %v387_v37 = vrot.slane %v5151_v12, 2  ;;  %v388_v38 = vrot.slane %v5158_v16, 2 }
  0x20   : > { %6517 = vst [vmem:[#allocation13_spill] sm:$0xff] %v5330_v20  ;;  %v5334_v24 = vsel %vm300_vm2, %v336_v13, %v337_v14  ;;  %v5350_v31 = vsel %vm300_vm2, %v337_v14, %v339_v23  ;;  %v344_v32 = vrot.slane %v5339_v30, 1  ;;  %v5359_v39 = vld [vmem:[%s5139_s24 + $0xd8] sm:$0xff]  ;;  %v5362_v45 = vld [vmem:[%s5139_s24 + $0xe0] sm:$0xff]  ;;  %v390_v47 = vrot.slane %v5167_v21, 2  ;;  %v5387_v0 = vld [vmem:[%s5139_s24 + $0xf0] sm:$0xff] }
  0x21   : > { %4357 = vmatmul.mubr.msk.f32.gmra.mrb[4].mxu1 %vm498_vm3, %v5220_v44  ;;  %4557 = vmatmul.mubr.msk.f32.gmra.mrb[4].mxu0 %vm498_vm3, %v5252_v52  ;;  %6518 = vst [vmem:[#allocation14_spill] sm:$0xff] %v5334_v24  ;;  %6519 = vst [vmem:[#allocation15_spill] sm:$0xff] %v5350_v31  ;;  %v5354_v33 = vsel %vm300_vm2, %v341_v25, %v342_v27  ;;  %v346_v53 = vrot.slane %v5359_v39, 1  ;;  %v347_v55 = vrot.slane %v5362_v45, 1  ;;  %v5379_v56 = vld [vmem:[%s5139_s24 + $0xe8] sm:$0x3] }
  0x22   : > { %4359 = vmatprep.mubr.msk.f32.mxu1 %vm498_vm3, %v5226_v46  ;;  %4559 = vmatprep.mubr.msk.f32.mxu0 %vm498_vm3, %v5256_v54  ;;  %6520 = vst [vmem:[#allocation16_spill] sm:$0xff] %v5354_v33  ;;  %v5374_v48 = vsel %vm300_vm2, %v342_v27, %v344_v32  ;;  %v5382_v61 = vsel %vm381_vm5, %v387_v37, %v388_v38  ;;  %v392_v63 = vrot.slane %v5170_v22, 2  ;;  %v393_v21 = vrot.slane %v5176_v26, 2  ;;  %v5390_v8 = vld [vmem:[%s5139_s24 + $0xf8] sm:$0xff]  ;;  %v5411_v37 = vld [vmem:[%s5139_s24 + $0x100] sm:$0x3] }
  0x23   : > { %6521 = vst [vmem:[#allocation17_spill] sm:$0xff] %v5374_v48  ;;  %v349_v13 = vrot.slane %v5379_v56, 1  ;;  %v395_v14 = vrot.slane %v5180_v28, 2  ;;  %v5403_v23 = vsel %vm381_vm5, %v388_v38, %v390_v47  ;;  %v5406_v25 = vsel %vm300_vm2, %v346_v53, %v347_v55  ;;  %v5422_v38 = vld [vmem:[%s5139_s24 + $0x110] sm:$0xff]  ;;  %v5523_v42 = vld [vmem:[%s5139_s24 + $0x148] sm:$0x3] }
  0x24   : > { %6522 = vst [vmem:[#allocation18_spill] sm:$0xff] %v5406_v25  ;;  %v351_v27 = vrot.slane %v5387_v0, 1  ;;  %v352_v32 = vrot.slane %v5390_v8, 1  ;;  %v5414_v29 = vsel %vm381_vm5, %v392_v63, %v393_v21  ;;  %v397_v28 = vrot.slane %v5189_v34, 2 }
  0x25   : > { %4360 = vmatmul.mubr.msk.f32.gmra.mrb[6].mxu1 %vm498_vm3, %v5252_v52  ;;  %4560 = vmatmul.mubr.msk.f32.gmra.mrb[6].mxu0 %vm498_vm3, %v5278_v60  ;;  %6523 = vst [vmem:[#allocation19_spill] sm:$0xff] %v5414_v29  ;;  %v5432_v53 = vsel %vm300_vm2, %v347_v55, %v349_v13  ;;  %v5435_v63 = vsel %vm381_vm5, %v393_v21, %v395_v14  ;;  %v6526_v47 = vrot.slane %v5121_v4, 2  ;;  %v357_v13 = vrot.slane %v5422_v38, 1  ;;  %v5450_v21 = vld [vmem:[%s5139_s24 + $0x118] sm:$0x3] }
  0x26   : > { %4362 = vmatprep.mubr.msk.f32.mxu1 %vm498_vm3, %v5256_v54  ;;  %4562 = vmatprep.mubr.msk.f32.mxu0 %vm498_vm3, %v5282_v62  ;;  %6524 = vst [vmem:[#allocation20_spill] sm:$0xff] %v5432_v53  ;;  %6525 = vst [vmem:[#allocation21_spill] sm:$0xff] %v5435_v63  ;;  %v5488_v54 = vld [vmem:[%s5139_s24 + $0x130] sm:$0x3]  ;;  %v5496_v52 = vld [vmem:[%s5139_s24 + $0x138] sm:$0xff]  ;;  %v410_v46 = vrot.slane %v5261_v57, 2 }
  0x27   : > { %v366_v44 = vrot.slane %v5496_v52, 1 }
  0x29   : > { %4363 = vmatmul.mubr.msk.f32.gmra.mrb[8].mxu1 %vm498_vm3, %v5278_v60  ;;  %4563 = vmatmul.mubr.msk.f32.gmra.mrb[8].mxu0 %vm498_vm3, %v5304_v7 }
  0x2a   : > { %4365 = vmatprep.mubr.msk.f32.mxu1 %vm498_vm3, %v5282_v62  ;;  %4565 = vmatprep.mubr.msk.f32.mxu0 %vm498_vm3, %v5308_v9  ;;  %v405_v62 = vrot.slane %v5231_v49, 2  ;;  %v407_v49 = vrot.slane %v5238_v50, 2 }
  0x2d   : > { %4366 = vmatmul.mubr.msk.f32.gmra.mrb[10].mxu1 %vm498_vm3, %v5304_v7  ;;  %4566 = vmatmul.mubr.msk.f32.gmra.mrb[10].mxu0 %vm498_vm3, %v5330_v20  ;;  %v359_v7 = vrot.slane %v5450_v21, 1 }
  0x2e   : > { %4368 = vmatprep.mubr.msk.f32.mxu1 %vm498_vm3, %v5308_v9  ;;  %4568 = vmatprep.mubr.msk.f32.mxu0 %vm498_vm3, %v5334_v24  ;;  %v5458_v9 = vld [vmem:[%s5139_s24 + $0x120] sm:$0xff] }
  0x2f   : > { %v361_v60 = vrot.slane %v5458_v9, 1 }
  0x31   : > { %4369 = vmatmul.mubr.msk.f32.gmra.mrb[12].mxu1 %vm498_vm3, %v5330_v20  ;;  %4569 = vmatmul.mubr.msk.f32.gmra.mrb[12].mxu0 %vm498_vm3, %v5350_v31  ;;  %v402_v20 = vrot.slane %v5203_v40, 2 }
  0x32   : > { %4371 = vmatprep.mubr.msk.f32.mxu1 %vm498_vm3, %v5334_v24  ;;  %4571 = vmatprep.mubr.msk.f32.mxu0 %vm498_vm3, %v5354_v33  ;;  %v354_v24 = vrot.slane %v5411_v37, 1 }
  0x35   : > { %4372 = vmatmul.mubr.msk.f32.gmra.mrb[14].mxu1 %vm498_vm3, %v5350_v31  ;;  %4572 = vmatmul.mubr.msk.f32.gmra.mrb[14].mxu0 %vm498_vm3, %v5374_v48  ;;  %v5419_v31 = vld [vmem:[%s5139_s24 + $0x108] sm:$0xff] }
  0x36   : > { %4374 = vmatprep.mubr.msk.f32.mxu1 %vm498_vm3, %v5354_v33  ;;  %4600 = vmatprep.mubr.msk.f32.mxu0 %vm498_vm3, %v5382_v61  ;;  %v398_v33 = vrot.slane %v5192_v35, 2  ;;  %v356_v55 = vrot.slane %v5419_v31, 1 }
  0x38   : > { %v5453_v14 = vsel %vm381_vm5, %v397_v28, %v398_v33  ;;  %v5473_v28 = vsel %vm300_vm2, %v352_v32, %v354_v24 }
  0x39   : > { %4375 = vmatmul.mubr.msk.f32.gmra.mrb[16].mxu1 %vm498_vm3, %v5374_v48  ;;  %4601 = vmatmul.mubr.msk.f32.vlgmr.msra.gmra.mrb[0].mxu0 %vm498_vm3, %v5403_v23  ;;  %v5444_v48 = vsel %vm300_vm2, %v351_v27, %v352_v32  ;;  %6528 = vst [vmem:[#allocation23_spill] sm:$0xff] %v5453_v14  ;;  %v5461_v27 = vld [vmem:[%s5139_s24 + $0x128] sm:$0xff]  ;;  %6530 = vst [vmem:[#allocation24_spill] sm:$0xff] %v5473_v28  ;;  %v408_v32 = vrot.slane %v5241_v51, 2 }
  0x3a   : > { %4377 = vmatprep.mubr.msk.f32.mxu1 %vm498_vm3, %v5406_v25  ;;  %4649 = vmatpush3.msk.msra.mxu0 %vm563_vm0, %v6526_v47  ;;  %6527 = vst [vmem:[#allocation22_spill] sm:$0xff] %v5444_v48  ;;  %v400_v25 = vrot.slane %v5195_v36, 2  ;;  %v403_v47 = vrot.slane %v5206_v41, 2  ;;  %v6529_v36 = vrot.slane %v5121_v4, 5 }
  0x3b   : > { %4603 = vmatprep.mubr.msk.f32.mxu0 %vm498_vm3, %v5414_v29  ;;  %v5593_v29 = vld [vmem:[%s5139_s24 + $0x178] sm:$0x3] }
  0x3c   : > { %4698 = vmatprep.subr.msk.mxu0 %vm563_vm0, %v6529_v36  ;;  %v5480_v36 = vsel %vm381_vm5, %v398_v33, %v400_v25  ;;  %v5491_v24 = vsel %vm381_vm5, %v402_v20, %v403_v47  ;;  %v5499_v33 = vld [vmem:[%s5139_s24 + $0x140] sm:$0xff]  ;;  %v5508_v20 = vsel %vm300_vm2, %v357_v13, %v359_v7  ;;  %v5511_v25 = vsel %vm381_vm5, %v403_v47, %v405_v62  ;;  %v5531_v47 = vld [vmem:[%s5139_s24 + $0x150] sm:$0xff] }
  0x3d   : > { %4378 = vmatmul.mubr.msk.f32.gmra.mrb[18].mxu1 %vm498_vm3, %v5432_v53  ;;  %4604 = vmatmul.mubr.msk.f32.gmra.mrb[2].mxu0 %vm498_vm3, %v5435_v63  ;;  %6531 = vst [vmem:[#allocation25_spill] sm:$0xff] %v5480_v36  ;;  %v5483_v53 = vsel %vm300_vm2, %v356_v55, %v357_v13  ;;  %6533 = vst [vmem:[#allocation27_spill] sm:$0xff] %v5491_v24  ;;  %v364_v55 = vrot.slane %v5488_v54, 1  ;;  %v5526_v7 = vsel %vm381_vm5, %v407_v49, %v408_v32 }
  0x3e   : > { %4380 = vmatprep.mubr.msk.f32.mxu1 %vm498_vm3, %v5444_v48  ;;  %4606 = vmatprep.mubr.msk.f32.mxu0 %vm498_vm3, %v5453_v14  ;;  %6532 = vst [vmem:[#allocation26_spill] sm:$0xff] %v5483_v53  ;;  %v362_v48 = vrot.slane %v5461_v27, 1  ;;  %6534 = vst [vmem:[#allocation28_spill] sm:$0xff] %v5508_v20  ;;  %v412_v62 = vrot.slane %v5266_v58, 2  ;;  %v413_v13 = vrot.slane %v5269_v59, 2  ;;  %v369_v49 = vrot.slane %v5523_v42, 1 }
  0x3f   : > { %6535 = vst [vmem:[#allocation29_spill] sm:$0xff] %v5511_v25  ;;  %6537 = vst [vmem:[#allocation31_spill] sm:$0xff] %v5526_v7  ;;  %v5558_v14 = vld [vmem:[%s5139_s24 + $0x160] sm:$0x3] }
  0x40   : > { %v5543_v57 = vsel %vm300_vm2, %v362_v48, %v364_v55  ;;  %v418_v55 = vrot.slane %v5295_v5, 2 }
  0x41   : > { %4381 = vmatmul.mubr.msk.f32.gmra.mrb[20].mxu1 %vm498_vm3, %v5473_v28  ;;  %4607 = vmatmul.mubr.msk.f32.gmra.mrb[4].mxu0 %vm498_vm3, %v5480_v36  ;;  %v5517_v28 = vsel %vm300_vm2, %v361_v60, %v362_v48  ;;  %v5534_v60 = vld [vmem:[%s5139_s24 + $0x158] sm:$0xff]  ;;  %6538 = vst [vmem:[#allocation32_spill] sm:$0xff] %v5543_v57  ;;  %v5550_v36 = vsel %vm381_vm5, %v408_v32, %v410_v46  ;;  %v5569_v46 = vld [vmem:[%s5139_s24 + $0x170] sm:$0xff] }
  0x42   : > { %4383 = vmatprep.mubr.msk.f32.mxu1 %vm498_vm3, %v5483_v53  ;;  %4609 = vmatprep.mubr.msk.f32.mxu0 %vm498_vm3, %v5491_v24  ;;  %6536 = vst [vmem:[#allocation30_spill] sm:$0xff] %v5517_v28  ;;  %v367_v53 = vrot.slane %v5499_v33, 1  ;;  %v415_v24 = vrot.slane %v5287_v1, 2  ;;  %6539 = vst [vmem:[#allocation33_spill] sm:$0xff] %v5550_v36  ;;  %v5561_v48 = vsel %vm381_vm5, %v412_v62, %v413_v13  ;;  %v417_v1 = vrot.slane %v5292_v3, 2 }
  0x43   : > { %6542 = vst [vmem:[#allocation36_spill] sm:$0xff] %v5569_v46  ;;  %v374_v62 = vrot.slane %v5558_v14, 1 }
  0x44   : > { %v5581_v32 = vsel %vm381_vm5, %v413_v13, %v415_v24  ;;  %v422_v24 = vrot.slane %v5318_v17, 2  ;;  %v423_v13 = vrot.slane %v5321_v19, 2 }
  0x45   : > { %4384 = vmatmul.mubr.msk.f32.gmra.mrb[22].mxu1 %vm498_vm3, %v5508_v20  ;;  %4610 = vmatmul.mubr.msk.f32.gmra.mrb[6].mxu0 %vm498_vm3, %v5511_v25  ;;  %v5553_v20 = vsel %vm300_vm2, %v366_v44, %v367_v53  ;;  %v371_v25 = vrot.slane %v5531_v47, 1  ;;  %v5578_v44 = vsel %vm300_vm2, %v367_v53, %v369_v49  ;;  %6544 = vst [vmem:[#allocation38_spill] sm:$0xff] %v5581_v32 }
  0x46   : > { %4386 = vmatprep.mubr.msk.f32.mxu1 %vm498_vm3, %v5517_v28  ;;  %4612 = vmatprep.mubr.msk.f32.mxu0 %vm498_vm3, %v5526_v7  ;;  %6540 = vst [vmem:[#allocation34_spill] sm:$0xff] %v5553_v20  ;;  %v372_v28 = vrot.slane %v5534_v60, 1  ;;  %v5566_v7 = vld [vmem:[%s5139_s24 + $0x168] sm:$0xff]  ;;  %6543 = vst [vmem:[#allocation37_spill] sm:$0xff] %v5578_v44  ;;  %v5596_v53 = vsel %vm381_vm5, %v417_v1, %v418_v55 }
  0x47   : > { %6541 = vst [vmem:[#allocation35_spill] sm:$0xff] %v5566_v7 }
  0x48   : > { %v5587_v63 = vsel %vm300_vm2, %v371_v25, %v372_v28  ;;  %v379_v25 = vrot.slane %v5593_v29, 1 }
  0x49   : > { %4387 = vmatmul.mubr.msk.f32.gmra.mrb[24].mxu1 %vm498_vm3, %v5543_v57  ;;  %4613 = vmatmul.mubr.msk.f32.gmra.mrb[8].mxu0 %vm498_vm3, %v5550_v36  ;;  %6545 = vst [vmem:[#allocation39_spill] sm:$0xff] %v5587_v63  ;;  %v420_v57 = vrot.slane %v5313_v15, 2  ;;  %v376_v36 = vrot.slane %v5566_v7, 1  ;;  %v5607_v15 = vsel %vm300_vm2, %v372_v28, %v374_v62  ;;  %v428_v28 = vrot.slane %v5362_v45, 2 }
  0x4a   : > { %4389 = vmatprep.mubr.msk.f32.mxu1 %vm498_vm3, %v5553_v20  ;;  %4615 = vmatprep.mubr.msk.f32.mxu0 %vm498_vm3, %v5561_v48  ;;  %v377_v20 = vrot.slane %v5569_v46, 1  ;;  %6546 = vst [vmem:[#allocation40_spill] sm:$0xff] %v5607_v15  ;;  %v432_v62 = vrot.slane %v5387_v0, 2 }
  0x4b   : > { %v5613_v49 = vsel %vm381_vm5, %v418_v55, %v420_v57  ;;  %v430_v57 = vrot.slane %v5379_v56, 2 }
  0x4c   : > { %v5616_v1 = vsel %vm300_vm2, %v376_v36, %v377_v20  ;;  %v5631_v36 = vsel %vm300_vm2, %v377_v20, %v379_v25  ;;  %v6485_v25 = vrot.slane %v5114_v2, 1 }
  0x4d   : > { %4390 = vmatmul.mubr.msk.f32.gmra.mrb[26].mxu1 %vm498_vm3, %v5578_v44  ;;  %4616 = vmatmul.mubr.msk.f32.gmra.mrb[10].mxu0 %vm498_vm3, %v5581_v32  ;;  %6547 = vst [vmem:[#allocation41_spill] sm:$0xff] %v5616_v1  ;;  %v425_v44 = vrot.slane %v5339_v30, 2  ;;  %v5620_v32 = vsel %vm381_vm5, %v422_v24, %v423_v13  ;;  %6548 = vst [vmem:[#allocation42_spill] sm:$0xff] %v5631_v36  ;;  %v433_v24 = vrot.slane %v5390_v8, 2 }
  0x4e   : > { %4392 = vmatprep.mubr.msk.f32.mxu1 %vm498_vm3, %v5587_v63  ;;  %4618 = vmatprep.mubr.msk.f32.mxu0 %vm498_vm3, %v5596_v53  ;;  %v427_v63 = vrot.slane %v5359_v39, 2  ;;  %v5653_v56 = vsel %vm381_vm5, %v428_v28, %v430_v57 }
  0x4f   : > { %v5636_v30 = vsel %vm381_vm5, %v423_v13, %v425_v44  ;;  %v5657_v20 = vsel %vm381_vm5, %v432_v62, %v433_v24  ;;  %v437_v44 = vrot.slane %v5419_v31, 2  ;;  %v438_v13 = vrot.slane %v5422_v38, 2 }
  0x50   : > { %v5640_v55 = vsel %vm381_vm5, %v427_v63, %v428_v28  ;;  %v435_v63 = vrot.slane %v5411_v37, 2  ;;  %v440_v28 = vrot.slane %v5450_v21, 2  ;;  %v442_v62 = vrot.slane %v5458_v9, 2 }
  0x51   : > { %4393 = vmatmul.mubr.msk.f32.gmra.mrb[28].mxu1 %vm498_vm3, %v5607_v15  ;;  %4619 = vmatmul.mubr.msk.f32.gmra.mrb[12].mxu0 %vm498_vm3, %v5613_v49  ;;  %v5677_v57 = vsel %vm381_vm5, %v437_v44, %v438_v13  ;;  %v447_v44 = vrot.slane %v5496_v52, 2  ;;  %v5738_v15 = vld [vmem:[%s5139_s24 + $0x180] sm:$0xff] }
  0x52   : > { %4395 = vmatprep.mubr.msk.f32.mxu1 %vm498_vm3, %v5616_v1  ;;  %4621 = vmatprep.mubr.msk.f32.mxu0 %vm498_vm3, %v5620_v32  ;;  %v5673_v37 = vsel %vm381_vm5, %v433_v24, %v435_v63  ;;  %v5693_v21 = vsel %vm381_vm5, %v438_v13, %v440_v28  ;;  %v445_v24 = vrot.slane %v5488_v54, 2  ;;  %v450_v13 = vrot.slane %v5523_v42, 2 }
  0x53   : > { %v458_v1 = vrot.slane %v5569_v46, 2 }
  0x55   : > { %4396 = vmatmul.mubr.msk.f32.gmra.mrb[30].mxu1 %vm498_vm3, %v5631_v36  ;;  %4622 = vmatmul.mubr.msk.f32.gmra.mrb[14].mxu0 %vm498_vm3, %v5636_v30  ;;  %v453_v36 = vrot.slane %v5534_v60, 2 }
  0x56   : > { %4400 = vmatprep.mubr.msk.f32.mxu1 %vm498_vm3, %v5143_v10  ;;  %4624 = vmatprep.mubr.msk.f32.mxu0 %vm498_vm3, %v5640_v55 }
  0x59   : > { %4401 = vmatmul.mubr.msk.f32.vlgmr.msra.gmra.mrb[0].mxu1 %vm498_vm3, %v5146_v11  ;;  %4625 = vmatmul.mubr.msk.f32.gmra.mrb[16].mxu0 %vm498_vm3, %v5653_v56 }
  0x5a   : > { %4449 = vmatpush3.msk.msra.mxu1 %vm563_vm0, %v5215_v43  ;;  %4403 = vmatprep.mubr.msk.f32.mxu1 %vm498_vm3, %v5151_v12  ;;  %v443_v43 = vrot.slane %v5461_v27, 2 }
  0x5b   : > { %4627 = vmatprep.mubr.msk.f32.mxu0 %vm498_vm3, %v5657_v20  ;;  %4498 = vmatprep.subr.msk.mxu1 %vm563_vm0, %v6485_v25  ;;  %v448_v25 = vrot.slane %v5499_v33, 2 }
  0x5c   : > { %v5697_v63 = vsel %vm381_vm5, %v442_v62, %v443_v43  ;;  %v5710_v54 = vsel %vm381_vm5, %v443_v43, %v445_v24  ;;  %v452_v62 = vrot.slane %v5531_v47, 2  ;;  %v455_v43 = vrot.slane %v5558_v14, 2 }
  0x5d   : > { %4404 = vmatmul.mubr.msk.f32.gmra.mrb[2].mxu1 %vm498_vm3, %v5158_v16  ;;  %4628 = vmatmul.mubr.msk.f32.gmra.mrb[18].mxu0 %vm498_vm3, %v5673_v37  ;;  %v5714_v28 = vsel %vm381_vm5, %v447_v44, %v448_v25  ;;  %v5727_v42 = vsel %vm381_vm5, %v448_v25, %v450_v13  ;;  %v457_v44 = vrot.slane %v5566_v7, 2  ;;  %v5741_v16 = vld [vmem:[%s5139_s24 + $0x188] sm:$0xff]  ;;  %v460_v25 = vrot.slane %v5593_v29, 2 }
  0x5e   : > { %4406 = vmatprep.mubr.msk.f32.mxu1 %vm498_vm3, %v5170_v22  ;;  %4630 = vmatprep.mubr.msk.f32.mxu0 %vm498_vm3, %v5677_v57  ;;  %6549 = vst [vmem:[#allocation43_spill] sm:$0xff] %v5714_v28  ;;  %6550 = vst [vmem:[#allocation44_spill] sm:$0xff] %v5727_v42  ;;  %v5731_v24 = vsel %vm381_vm5, %v452_v62, %v453_v36  ;;  %v5750_v14 = vsel %vm381_vm5, %v453_v36, %v455_v43  ;;  %v470_v62 = vrot.slane %v5738_v15, 2 }
  0x5f   : > { %6551 = vst [vmem:[#allocation45_spill] sm:$0xff] %v5731_v24  ;;  %6552 = vst [vmem:[#allocation46_spill] sm:$0xff] %v5750_v14  ;;  %v5754_v13 = vsel %vm381_vm5, %v457_v44, %v458_v1  ;;  %v471_v12 = vrot.slane %v5741_v16, 2  ;;  %v5770_v29 = vsel %vm381_vm5, %v458_v1, %v460_v25  ;;  %v5792_v44 = vld [vmem:[%s6426_s1 + $0xc] sm:$0x3]  ;;  %v6557_v25 = vrot.slane %v5121_v4, 5 }
  0x60   : > { %6553 = vst [vmem:[#allocation47_spill] sm:$0xff] %v5754_v13  ;;  %6554 = vst [vmem:[#allocation48_spill] sm:$0xff] %v5770_v29  ;;  %v382_v4 = vrot.slane %v5143_v10, 2 }
  0x61   : > { %4407 = vmatmul.mubr.msk.f32.gmra.mrb[4].mxu1 %vm498_vm3, %v5176_v26  ;;  %4631 = vmatmul.mubr.msk.f32.gmra.mrb[20].mxu0 %vm498_vm3, %v5693_v21  ;;  %v5774_v43 = vsel %vm381_vm5, %v470_v62, %v471_v12  ;;  %v383_v62 = vrot.slane %v5146_v11, 2  ;;  %v6558_v11 = vrot.slane %v5114_v2, 1  ;;  %v6559_v2 = vld [vmem:[#allocation19_spill] sm:$0xff] }
  0x62   : > { %4409 = vmatprep.mubr.msk.f32.mxu1 %vm498_vm3, %v5189_v34  ;;  %4633 = vmatprep.mubr.msk.f32.mxu0 %vm498_vm3, %v5697_v63  ;;  %6555 = vst [vmem:[#allocation49_spill] sm:$0xff] %v5774_v43 }
  0x65   : > { %4410 = vmatmul.mubr.msk.f32.gmra.mrb[6].mxu1 %vm498_vm3, %v5192_v35  ;;  %4634 = vmatmul.mubr.msk.f32.gmra.mrb[22].mxu0 %vm498_vm3, %v5710_v54 }
  0x66   : > { %4412 = vmatprep.mubr.msk.f32.mxu1 %vm498_vm3, %v5203_v40  ;;  %4636 = vmatprep.mubr.msk.f32.mxu0 %vm498_vm3, %v5714_v28  ;;  %v5759_v28 = vld [vmem:[%s5139_s24 + $0x190] sm:$0x3] }
  0x67   : > { %v473_v36 = vrot.slane %v5759_v28, 2 }
  0x69   : > { %4413 = vmatmul.mubr.msk.f32.gmra.mrb[8].mxu1 %vm498_vm3, %v5206_v41  ;;  %4637 = vmatmul.mubr.msk.f32.gmra.mrb[24].mxu0 %vm498_vm3, %v5727_v42  ;;  %v5785_v1 = vsel %vm381_vm5, %v471_v12, %v473_v36  ;;  %v6496_v12 = vunpack.c.l.bf16 %v5792_v44  ;;  %v385_v36 = vrot.slane %v5162_v18, 2  ;;  %v6560_v18 = vld [vmem:[#allocation21_spill] sm:$0xff] }
  0x6a   : > { %4415 = vmatprep.mubr.msk.f32.mxu1 %vm498_vm3, %v5238_v50  ;;  %4639 = vmatprep.mubr.msk.f32.mxu0 %vm498_vm3, %v5731_v24  ;;  %6556 = vst [vmem:[#allocation50_spill] sm:$0xff] %v5785_v1 }
  0x6b   : > { %v386_v10 = vsel %vm381_vm5, %v383_v62, %v385_v36  ;;  %v6565_v36 = vld [vmem:[#allocation31_spill] sm:$0xff] }
  0x6d   : > { %4416 = vmatmul.mubr.msk.f32.gmra.mrb[10].mxu1 %vm498_vm3, %v5241_v51  ;;  %4640 = vmatmul.mubr.msk.f32.gmra.mrb[26].mxu0 %vm498_vm3, %v5750_v14 }
  0x6e   : > { %4418 = vmatprep.mubr.msk.f32.mxu1 %vm498_vm3, %v5266_v58  ;;  %4642 = vmatprep.mubr.msk.f32.mxu0 %vm498_vm3, %v5754_v13 }
  0x71   : > { %4419 = vmatmul.mubr.msk.f32.gmra.mrb[12].mxu1 %vm498_vm3, %v5269_v59  ;;  %4643 = vmatmul.mubr.msk.f32.gmra.mrb[28].mxu0 %vm498_vm3, %v5770_v29 }
  0x72   : > { %4421 = vmatprep.mubr.msk.f32.mxu1 %vm498_vm3, %v5292_v3  ;;  %4645 = vmatprep.mubr.msk.f32.mxu0 %vm498_vm3, %v5774_v43  ;;  %v6569_v43 = vld [vmem:[#allocation5_spill] sm:$0xff] }
  0x75   : > { %4422 = vmatmul.mubr.msk.f32.gmra.mrb[14].mxu1 %vm498_vm3, %v5295_v5  ;;  %4646 = vmatmul.mubr.msk.f32.gmra.mrb[30].mxu0 %vm498_vm3, %v5785_v1  ;;  %v6568_v1 = vld [vmem:[#allocation4_spill] sm:$0xff] }
  0x76   : > { %4424 = vmatprep.mubr.msk.f32.mxu1 %vm498_vm3, %v5318_v17  ;;  %4650 = vmatprep.mubr.msk.f32.mxu0 %vm498_vm3, %v5170_v22 }
  0x79   : > { %4425 = vmatmul.mubr.msk.f32.gmra.mrb[16].mxu1 %vm498_vm3, %v5321_v19  ;;  %4651 = vmatmul.mubr.msk.f32.vlgmr.msra.gmra.mrb[0].mxu0 %vm498_vm3, %v5176_v26 }
  0x7a   : > { %4427 = vmatprep.mubr.msk.f32.mxu1 %vm498_vm3, %v5359_v39  ;;  %4699 = vmatpush3.msk.msra.mxu0 %vm563_vm0, %v6557_v25  ;;  %v384_v25 = vsel %vm381_vm5, %v382_v4, %v383_v62  ;;  %v6563_v4 = vld [vmem:[#allocation27_spill] sm:$0xff]  ;;  %v6564_v62 = vld [vmem:[#allocation29_spill] sm:$0xff] }
  0x7b   : > { %4653 = vmatprep.mubr.msk.f32.mxu0 %vm498_vm3, %v5189_v34  ;;  %4748 = vmatprep.subr.msk.mxu0 %vm563_vm0, %v6496_v12  ;;  %v5939_v12 = vld [vmem:[%s5139_s24 + $0x1a0] sm:$0xff] }
  0x7d   : > { %4428 = vmatmul.mubr.msk.f32.gmra.mrb[18].mxu1 %vm498_vm3, %v5362_v45  ;;  %4654 = vmatmul.mubr.msk.f32.gmra.mrb[2].mxu0 %vm498_vm3, %v5192_v35 }
  0x7e   : > { %4430 = vmatprep.mubr.msk.f32.mxu1 %vm498_vm3, %v5387_v0  ;;  %4656 = vmatprep.mubr.msk.f32.mxu0 %vm498_vm3, %v5203_v40 }
  0x81   : > { %4431 = vmatmul.mubr.msk.f32.gmra.mrb[20].mxu1 %vm498_vm3, %v5390_v8  ;;  %4657 = vmatmul.mubr.msk.f32.gmra.mrb[4].mxu0 %vm498_vm3, %v5206_v41 }
  0x82   : > { %4433 = vmatprep.mubr.msk.f32.mxu1 %vm498_vm3, %v5419_v31  ;;  %4659 = vmatprep.mubr.msk.f32.mxu0 %vm498_vm3, %v5238_v50 }
  0x85   : > { %4434 = vmatmul.mubr.msk.f32.gmra.mrb[22].mxu1 %vm498_vm3, %v5422_v38  ;;  %4660 = vmatmul.mubr.msk.f32.gmra.mrb[6].mxu0 %vm498_vm3, %v5241_v51 }
  0x86   : > { %4436 = vmatprep.mubr.msk.f32.mxu1 %vm498_vm3, %v5458_v9  ;;  %4662 = vmatprep.mubr.msk.f32.mxu0 %vm498_vm3, %v5266_v58 }
  0x89   : > { %4437 = vmatmul.mubr.msk.f32.gmra.mrb[24].mxu1 %vm498_vm3, %v5461_v27  ;;  %4663 = vmatmul.mubr.msk.f32.gmra.mrb[8].mxu0 %vm498_vm3, %v5269_v59 }
  0x8a   : > { %4439 = vmatprep.mubr.msk.f32.mxu1 %vm498_vm3, %v5496_v52  ;;  %4665 = vmatprep.mubr.msk.f32.mxu0 %vm498_vm3, %v5292_v3 }
  0x8d   : > { %4440 = vmatmul.mubr.msk.f32.gmra.mrb[26].mxu1 %vm498_vm3, %v5499_v33  ;;  %4666 = vmatmul.mubr.msk.f32.gmra.mrb[10].mxu0 %vm498_vm3, %v5295_v5 }
  0x8e   : > { %4442 = vmatprep.mubr.msk.f32.mxu1 %vm498_vm3, %v5531_v47  ;;  %4668 = vmatprep.mubr.msk.f32.mxu0 %vm498_vm3, %v5318_v17 }
  0x91   : > { %4443 = vmatmul.mubr.msk.f32.gmra.mrb[28].mxu1 %vm498_vm3, %v5534_v60  ;;  %4669 = vmatmul.mubr.msk.f32.gmra.mrb[12].mxu0 %vm498_vm3, %v5321_v19 }
  0x92   : > { %4445 = vmatprep.mubr.msk.f32.mxu1 %vm498_vm3, %v5566_v7  ;;  %4671 = vmatprep.mubr.msk.f32.mxu0 %vm498_vm3, %v5359_v39 }
  0x95   : > { %4446 = vmatmul.mubr.msk.f32.gmra.mrb[30].mxu1 %vm498_vm3, %v5569_v46  ;;  %4672 = vmatmul.mubr.msk.f32.gmra.mrb[14].mxu0 %vm498_vm3, %v5362_v45 }
  0x96   : > { %4450 = vmatprep.mubr.msk.f32.mxu1 %vm498_vm3, %v384_v25  ;;  %4674 = vmatprep.mubr.msk.f32.mxu0 %vm498_vm3, %v5387_v0  ;;  %v6566_v25 = vld [vmem:[#allocation33_spill] sm:$0xff] }
  0x99   : > { %4451 = vmatmul.mubr.msk.f32.vlgmr.msra.gmra.mrb[0].mxu1 %vm498_vm3, %v386_v10  ;;  %4675 = vmatmul.mubr.msk.f32.gmra.mrb[16].mxu0 %vm498_vm3, %v5390_v8  ;;  %v5928_v10 = vld [vmem:[%s5139_s24 + $0x198] sm:$0xff] }
  0x9a   : > { %4499 = vmatpush3.msk.msra.mxu1 %vm563_vm0, %v6558_v11  ;;  %4453 = vmatprep.mubr.msk.f32.mxu1 %vm498_vm3, %v5382_v61  ;;  %v6561_v61 = vld [vmem:[#allocation23_spill] sm:$0xff]  ;;  %v6567_v11 = vld [vmem:[#allocation38_spill] sm:$0xff] }
  0x9b   : > { %4677 = vmatprep.mubr.msk.f32.mxu0 %vm498_vm3, %v5419_v31  ;;  %4798 = vmatprep.subr.msk.mxu1 %vm563_vm0, %v5125_v6 }
  0x9d   : > { %4454 = vmatmul.mubr.msk.f32.gmra.mrb[2].mxu1 %vm498_vm3, %v5403_v23  ;;  %4678 = vmatmul.mubr.msk.f32.gmra.mrb[18].mxu0 %vm498_vm3, %v5422_v38  ;;  %v6562_v23 = vld [vmem:[#allocation25_spill] sm:$0xff] }
  0x9e   : > { %4456 = vmatprep.mubr.msk.f32.mxu1 %vm498_vm3, %v6559_v2  ;;  %4680 = vmatprep.mubr.msk.f32.mxu0 %vm498_vm3, %v5458_v9 }
  0xa1   : > { %4457 = vmatmul.mubr.msk.f32.gmra.mrb[4].mxu1 %vm498_vm3, %v6560_v18  ;;  %4681 = vmatmul.mubr.msk.f32.gmra.mrb[20].mxu0 %vm498_vm3, %v5461_v27 }
  0xa2   : > { %4459 = vmatprep.mubr.msk.f32.mxu1 %vm498_vm3, %v6561_v61  ;;  %4683 = vmatprep.mubr.msk.f32.mxu0 %vm498_vm3, %v5496_v52 }
  0xa5   : > { %4460 = vmatmul.mubr.msk.f32.gmra.mrb[6].mxu1 %vm498_vm3, %v6562_v23  ;;  %4684 = vmatmul.mubr.msk.f32.gmra.mrb[22].mxu0 %vm498_vm3, %v5499_v33 }
  0xa6   : > { %4462 = vmatprep.mubr.msk.f32.mxu1 %vm498_vm3, %v6563_v4  ;;  %4686 = vmatprep.mubr.msk.f32.mxu0 %vm498_vm3, %v5531_v47 }
  0xa9   : > { %4463 = vmatmul.mubr.msk.f32.gmra.mrb[8].mxu1 %vm498_vm3, %v6564_v62  ;;  %4687 = vmatmul.mubr.msk.f32.gmra.mrb[24].mxu0 %vm498_vm3, %v5534_v60 }
  0xaa   : > { %4465 = vmatprep.mubr.msk.f32.mxu1 %vm498_vm3, %v6565_v36  ;;  %4689 = vmatprep.mubr.msk.f32.mxu0 %vm498_vm3, %v5566_v7  ;;  %v6571_v7 = vld [vmem:[#allocation6_spill] sm:$0xff] }
  0xad   : > { %4466 = vmatmul.mubr.msk.f32.gmra.mrb[10].mxu1 %vm498_vm3, %v6566_v25  ;;  %4690 = vmatmul.mubr.msk.f32.gmra.mrb[26].mxu0 %vm498_vm3, %v5569_v46  ;;  %v6570_v46 = vunpack.c.l.bf16 %v5792_v44  ;;  %v6574_v44 = vld [vmem:[#allocation9_spill] sm:$0xff] }
  0xae   : > { %4468 = vmatprep.mubr.msk.f32.mxu1 %vm498_vm3, %v5561_v48  ;;  %4692 = vmatprep.mubr.msk.f32.mxu0 %vm498_vm3, %v5738_v15 }
  0xb1   : > { %4469 = vmatmul.mubr.msk.f32.gmra.mrb[12].mxu1 %vm498_vm3, %v6567_v11  ;;  %4693 = vmatmul.mubr.msk.f32.gmra.mrb[28].mxu0 %vm498_vm3, %v5741_v16 }
  0xb2   : > { %4471 = vmatprep.mubr.msk.f32.mxu1 %vm498_vm3, %v5596_v53  ;;  %4695 = vmatprep.mubr.msk.f32.mxu0 %vm498_vm3, %v5928_v10 }
  0xb5   : > { %4472 = vmatmul.mubr.msk.f32.gmra.mrb[14].mxu1 %vm498_vm3, %v5613_v49  ;;  %4696 = vmatmul.mubr.msk.f32.gmra.mrb[30].mxu0 %vm498_vm3, %v5939_v12 }
  0xb6   : > { %4474 = vmatprep.mubr.msk.f32.mxu1 %vm498_vm3, %v5620_v32  ;;  %4700 = vmatprep.mubr.msk.f32.mxu0 %vm498_vm3, %v6568_v1  ;;  %v6572_v1 = vld [vmem:[#allocation7_spill] sm:$0xff] }
  0xb9   : > { %4475 = vmatmul.mubr.msk.f32.gmra.mrb[16].mxu1 %vm498_vm3, %v5636_v30  ;;  %4701 = vmatmul.mubr.msk.f32.vlgmr.msra.gmra.mrb[0].mxu0 %vm498_vm3, %v6569_v43  ;;  %v6573_v43 = vld [vmem:[#allocation8_spill] sm:$0xff] }
  0xba   : > { %4477 = vmatprep.mubr.msk.f32.mxu1 %vm498_vm3, %v5640_v55  ;;  %4749 = vmatpush3.msk.msra.mxu0 %vm563_vm0, %v6570_v46  ;;  %v6576_v46 = vld [vmem:[#allocation11_spill] sm:$0xff] }
  0xbb   : > { %4703 = vmatprep.mubr.msk.f32.mxu0 %vm498_vm3, %v6571_v7  ;;  %v6575_v7 = vld [vmem:[#allocation10_spill] sm:$0xff] }
  0xbd   : > { %4478 = vmatmul.mubr.msk.f32.gmra.mrb[18].mxu1 %vm498_vm3, %v5653_v56  ;;  %4704 = vmatmul.mubr.msk.f32.gmra.mrb[2].mxu0 %vm498_vm3, %v6572_v1  ;;  %v6577_v1 = vld [vmem:[#allocation12_spill] sm:$0xff] }
  0xbe   : > { %4480 = vmatprep.mubr.msk.f32.mxu1 %vm498_vm3, %v5657_v20  ;;  %4706 = vmatprep.mubr.msk.f32.mxu0 %vm498_vm3, %v6573_v43  ;;  %v6578_v43 = vld [vmem:[#allocation13_spill] sm:$0xff] }
  0xc1   : > { %4481 = vmatmul.mubr.msk.f32.gmra.mrb[20].mxu1 %vm498_vm3, %v5673_v37  ;;  %4707 = vmatmul.mubr.msk.f32.gmra.mrb[4].mxu0 %vm498_vm3, %v6574_v44  ;;  %v6579_v44 = vld [vmem:[#allocation43_spill] sm:$0xff] }
  0xc2   : > { %4483 = vmatprep.mubr.msk.f32.mxu1 %vm498_vm3, %v5677_v57  ;;  %4709 = vmatprep.mubr.msk.f32.mxu0 %vm498_vm3, %v6575_v7  ;;  %v6580_v7 = vld [vmem:[#allocation14_spill] sm:$0xff] }
  0xc5   : > { %4484 = vmatmul.mubr.msk.f32.gmra.mrb[22].mxu1 %vm498_vm3, %v5693_v21  ;;  %4710 = vmatmul.mubr.msk.f32.gmra.mrb[6].mxu0 %vm498_vm3, %v6576_v46  ;;  %v6581_v46 = vld [vmem:[#allocation15_spill] sm:$0xff] }
  0xc6   : > { %4486 = vmatprep.mubr.msk.f32.mxu1 %vm498_vm3, %v5697_v63  ;;  %4712 = vmatprep.mubr.msk.f32.mxu0 %vm498_vm3, %v6577_v1  ;;  %v6582_v1 = vld [vmem:[#allocation16_spill] sm:$0xff] }
  0xc9   : > { %4487 = vmatmul.mubr.msk.f32.gmra.mrb[24].mxu1 %vm498_vm3, %v5710_v54  ;;  %4713 = vmatmul.mubr.msk.f32.gmra.mrb[8].mxu0 %vm498_vm3, %v6578_v43  ;;  %v6583_v43 = vld [vmem:[#allocation17_spill] sm:$0xff] }
  0xca   : > { %4489 = vmatprep.mubr.msk.f32.mxu1 %vm498_vm3, %v6579_v44  ;;  %4715 = vmatprep.mubr.msk.f32.mxu0 %vm498_vm3, %v6580_v7  ;;  %v6584_v7 = vld [vmem:[#allocation18_spill] sm:$0xff] }
  0xcd   : > { %4490 = vmatmul.mubr.msk.f32.gmra.mrb[26].mxu1 %vm498_vm3, %v5727_v42  ;;  %4716 = vmatmul.mubr.msk.f32.gmra.mrb[10].mxu0 %vm498_vm3, %v6581_v46  ;;  %v6585_v46 = vld [vmem:[#allocation20_spill] sm:$0xff]  ;;  %v6067_v42 = vld [vmem:[%s5139_s24 + $0x1a8] sm:$0x3] }
  0xce   : > { %4492 = vmatprep.mubr.msk.f32.mxu1 %vm498_vm3, %v5731_v24  ;;  %4718 = vmatprep.mubr.msk.f32.mxu0 %vm498_vm3, %v6582_v1  ;;  %v6586_v24 = vld [vmem:[#allocation2_spill] sm:$0xff] }
  0xcf   : > { %v6587_v1 = vld [vmem:[#allocation22_spill] sm:$0xff] }
  0xd1   : > { %4493 = vmatmul.mubr.msk.f32.gmra.mrb[28].mxu1 %vm498_vm3, %v5750_v14  ;;  %4719 = vmatmul.mubr.msk.f32.gmra.mrb[12].mxu0 %vm498_vm3, %v6583_v43  ;;  %v6588_v14 = vld [vmem:[#allocation3_spill] sm:$0xff]  ;;  %v6589_v43 = vld [vmem:[#allocation24_spill] sm:$0xff] }
  0xd2   : > { %4495 = vmatprep.mubr.msk.f32.mxu1 %vm498_vm3, %v5754_v13  ;;  %4721 = vmatprep.mubr.msk.f32.mxu0 %vm498_vm3, %v6584_v7  ;;  %v6597_v13 = vld [vmem:[#allocation40_spill] sm:$0xff] }
  0xd5   : > { %4496 = vmatmul.mubr.msk.f32.gmra.mrb[30].mxu1 %vm498_vm3, %v5770_v29  ;;  %4722 = vmatmul.mubr.msk.f32.gmra.mrb[14].mxu0 %vm498_vm3, %v6585_v46  ;;  %v6590_v29 = vld [vmem:[#allocation26_spill] sm:$0xff] }
  0xd6   : > { %4500 = vmatprep.mubr.msk.f32.mxu1 %vm498_vm3, %v6586_v24  ;;  %4724 = vmatprep.mubr.msk.f32.mxu0 %vm498_vm3, %v6587_v1  ;;  %v6591_v24 = vld [vmem:[#allocation28_spill] sm:$0xff] }
  0xd9   : > { %4501 = vmatmul.mubr.msk.f32.vlgmr.msra.gmra.mrb[0].mxu1 %vm498_vm3, %v6588_v14  ;;  %4725 = vmatmul.mubr.msk.f32.gmra.mrb[16].mxu0 %vm498_vm3, %v6589_v43  ;;  %v6592_v14 = vld [vmem:[#allocation30_spill] sm:$0xff] }
  0xda   : > { %4799 = vmatpush3.msk.msra.mxu1 %vm563_vm0, %v5125_v6  ;;  %4503 = vmatprep.mubr.msk.f32.mxu1 %vm498_vm3, %v5170_v22  ;;  %v6593_v6 = vld [vmem:[#allocation32_spill] sm:$0xff]  ;;  %v6594_v22 = vld [vmem:[#allocation34_spill] sm:$0xff] }
  0xdb   : > { %4727 = vmatprep.mubr.msk.f32.mxu0 %vm498_vm3, %v6590_v29 }
  0xdd   : > { %4504 = vmatmul.mubr.msk.f32.gmra.mrb[2].mxu1 %vm498_vm3, %v5176_v26  ;;  %4728 = vmatmul.mubr.msk.f32.gmra.mrb[18].mxu0 %vm498_vm3, %v6591_v24  ;;  %v6595_v26 = vld [vmem:[#allocation37_spill] sm:$0xff] }
  0xde   : > { %4506 = vmatprep.mubr.msk.f32.mxu1 %vm498_vm3, %v5189_v34  ;;  %4730 = vmatprep.mubr.msk.f32.mxu0 %vm498_vm3, %v6592_v14  ;;  %v6596_v34 = vld [vmem:[#allocation39_spill] sm:$0xff] }
  0xe1   : > { %4507 = vmatmul.mubr.msk.f32.gmra.mrb[4].mxu1 %vm498_vm3, %v5192_v35  ;;  %4731 = vmatmul.mubr.msk.f32.gmra.mrb[20].mxu0 %vm498_vm3, %v6593_v6  ;;  %v465_v35 = vrot.slane %v5738_v15, 1 }
  0xe2   : > { %4509 = vmatprep.mubr.msk.f32.mxu1 %vm498_vm3, %v5203_v40  ;;  %4733 = vmatprep.mubr.msk.f32.mxu0 %vm498_vm3, %v6594_v22  ;;  %v466_v40 = vrot.slane %v5741_v16, 1 }
  0xe4   : > { %v6064_v22 = vsel %vm300_vm2, %v465_v35, %v466_v40 }
  0xe5   : > { %4510 = vmatmul.mubr.msk.f32.gmra.mrb[6].mxu1 %vm498_vm3, %v5206_v41  ;;  %4734 = vmatmul.mubr.msk.f32.gmra.mrb[22].mxu0 %vm498_vm3, %v6595_v26  ;;  %v6598_v41 = vld [vmem:[#allocation41_spill] sm:$0xff]  ;;  %v479_v26 = vrot.slane %v5939_v12, 1 }
  0xe6   : > { %4512 = vmatprep.mubr.msk.f32.mxu1 %vm498_vm3, %v5238_v50  ;;  %4736 = vmatprep.mubr.msk.f32.mxu0 %vm498_vm3, %v6596_v34  ;;  %v468_v50 = vrot.slane %v5759_v28, 1  ;;  %v478_v34 = vrot.slane %v5928_v10, 1  ;;  %v481_v28 = vrot.slane %v6067_v42, 1 }
  0xe8   : > { %v480_v35 = vsel %vm300_vm2, %v478_v34, %v479_v26 }
  0xe9   : > { %4513 = vmatmul.mubr.msk.f32.gmra.mrb[8].mxu1 %vm498_vm3, %v5241_v51  ;;  %4737 = vmatmul.mubr.msk.f32.gmra.mrb[24].mxu0 %vm498_vm3, %v6597_v13  ;;  %v6599_v51 = vld [vmem:[#allocation42_spill] sm:$0xff] }
  0xea   : > { %4515 = vmatprep.mubr.msk.f32.mxu1 %vm498_vm3, %v5266_v58  ;;  %4739 = vmatprep.mubr.msk.f32.mxu0 %vm498_vm3, %v6598_v41  ;;  %v6078_v58 = vsel %vm300_vm2, %v466_v40, %v468_v50 }
  0xed   : > { %4516 = vmatmul.mubr.msk.f32.gmra.mrb[10].mxu1 %vm498_vm3, %v5269_v59  ;;  %4740 = vmatmul.mubr.msk.f32.gmra.mrb[26].mxu0 %vm498_vm3, %v6599_v51  ;;  %v482_v59 = vsel %vm300_vm2, %v479_v26, %v481_v28 }
  0xee   : > { %4518 = vmatprep.mubr.msk.f32.mxu1 %vm498_vm3, %v5292_v3  ;;  %4742 = vmatprep.mubr.msk.f32.mxu0 %vm498_vm3, %v6064_v22  ;;  %v6601_v3 = vld [vmem:[#allocation36_spill] sm:$0xff] }
  0xf1   : > { %4519 = vmatmul.mubr.msk.f32.gmra.mrb[12].mxu1 %vm498_vm3, %v5295_v5  ;;  %4743 = vmatmul.mubr.msk.f32.gmra.mrb[28].mxu0 %vm498_vm3, %v6078_v58  ;;  %v6603_v5 = vld [vmem:[#allocation34_spill] sm:$0xff] }
  0xf2   : > { %4521 = vmatprep.mubr.msk.f32.mxu1 %vm498_vm3, %v5318_v17  ;;  %4745 = vmatprep.mubr.msk.f32.mxu0 %vm498_vm3, %v480_v35  ;;  %v6605_v17 = vld [vmem:[#allocation37_spill] sm:$0xff] }
  0xf5   : > { %4522 = vmatmul.mubr.msk.f32.gmra.mrb[14].mxu1 %vm498_vm3, %v5321_v19  ;;  %4746 = vmatmul.mubr.msk.f32.gmra.mrb[30].mxu0 %vm498_vm3, %v482_v59  ;;  %v6606_v19 = vld [vmem:[#allocation46_spill] sm:$0xff] }
  0xf6   : > { %4524 = vmatprep.mubr.msk.f32.mxu1 %vm498_vm3, %v5359_v39  ;;  %4750 = vmatprep.mubr.msk.f32.mxu0 %vm498_vm3, %v6559_v2  ;;  %v6608_v39 = vld [vmem:[#allocation47_spill] sm:$0xff] }
  0xf9   : > { %4525 = vmatmul.mubr.msk.f32.gmra.mrb[16].mxu1 %vm498_vm3, %v5362_v45  ;;  %4751 = vmatmul.mubr.msk.f32.vlgmr.msra.gmra.mrb[0].mxu0 %vm498_vm3, %v6560_v18  ;;  %v483_v45 = vrot.slane %v5928_v10, 2 }
  0xfa   : > { %4527 = vmatprep.mubr.msk.f32.mxu1 %vm498_vm3, %v5387_v0  ;;  %4753 = vmatprep.mubr.msk.f32.mxu0 %vm498_vm3, %v6561_v61  ;;  %v484_v0 = vrot.slane %v5939_v12, 2  ;;  %v6255_v61 = vld [vmem:[%s6427_s2] ss:$0 sm:$0xff] }
  0xfd   : > { %4528 = vmatmul.mubr.msk.f32.gmra.mrb[18].mxu1 %vm498_vm3, %v5390_v8  ;;  %4754 = vmatmul.mubr.msk.f32.gmra.mrb[2].mxu0 %vm498_vm3, %v6562_v23  ;;  %v6609_v8 = vld [vmem:[#allocation48_spill] sm:$0xff] }
  0xfe   : > { %4530 = vmatprep.mubr.msk.f32.mxu1 %vm498_vm3, %v5419_v31  ;;  %4756 = vmatprep.mubr.msk.f32.mxu0 %vm498_vm3, %v6563_v4  ;;  %v6607_v31 = vld [vmem:[#allocation39_spill] sm:$0xff] }
 0x101   : > { %4531 = vmatmul.mubr.msk.f32.gmra.mrb[20].mxu1 %vm498_vm3, %v5422_v38  ;;  %4757 = vmatmul.mubr.msk.f32.gmra.mrb[4].mxu0 %vm498_vm3, %v6564_v62  ;;  %v6610_v38 = vld [vmem:[#allocation49_spill] sm:$0xff]  ;;  %v6260_v62 = vld [vmem:[%s6428_s3] ss:$0 sm:$0xff] }
 0x102   : > { %4533 = vmatprep.mubr.msk.f32.mxu1 %vm498_vm3, %v5458_v9  ;;  %4759 = vmatprep.mubr.msk.f32.mxu0 %vm498_vm3, %v6565_v36  ;;  %v6604_v9 = vld [vmem:[#allocation45_spill] sm:$0xff] }
 0x105   : > { %4534 = vmatmul.mubr.msk.f32.gmra.mrb[22].mxu1 %vm498_vm3, %v5461_v27  ;;  %4760 = vmatmul.mubr.msk.f32.gmra.mrb[6].mxu0 %vm498_vm3, %v6566_v25  ;;  %v486_v27 = vrot.slane %v6067_v42, 2 }
 0x106   : > { %4536 = vmatprep.mubr.msk.f32.mxu1 %vm498_vm3, %v5496_v52  ;;  %4762 = vmatprep.mubr.msk.f32.mxu0 %vm498_vm3, %v5561_v48  ;;  %v6600_v52 = vld [vmem:[#allocation35_spill] sm:$0xff]  ;;  %v5075_v48 = vmov 0.0|0.0  }
 0x109   : > { %4537 = vmatmul.mubr.msk.f32.gmra.mrb[24].mxu1 %vm498_vm3, %v5499_v33  ;;  %4763 = vmatmul.mubr.msk.f32.gmra.mrb[8].mxu0 %vm498_vm3, %v6567_v11  ;;  %v485_v33 = vsel %vm381_vm5, %v483_v45, %v484_v0 }
 0x10a   : > { %4539 = vmatprep.mubr.msk.f32.mxu1 %vm498_vm3, %v5531_v47  ;;  %4765 = vmatprep.mubr.msk.f32.mxu0 %vm498_vm3, %v5596_v53  ;;  %v6611_v47 = vld [vmem:[#allocation50_spill] sm:$0xff]  ;;  %v3900_v53 = vcombine.high %v5075_v48, %v5075_v48 }
 0x10c   : > { %3485 = vst [vmem:[%s6228_s30 + $0x4] sm:$0xf] %v3900_v53  ;;  %3536 = vst [vmem:[%s6228_s30 + $0xd0] sm:$0xf] %v3900_v53 }
 0x10d   : > { %4540 = vmatmul.mubr.msk.f32.gmra.mrb[26].mxu1 %vm498_vm3, %v5534_v60  ;;  %4766 = vmatmul.mubr.msk.f32.gmra.mrb[10].mxu0 %vm498_vm3, %v5613_v49  ;;  %v487_v60 = vsel %vm381_vm5, %v484_v0, %v486_v27 }
 0x10e   : > { %4542 = vmatprep.mubr.msk.f32.mxu1 %vm498_vm3, %v6600_v52  ;;  %4768 = vmatprep.mubr.msk.f32.mxu0 %vm498_vm3, %v5620_v32  ;;  %v3899_v32 = vcombine.low %v5075_v48, %v5075_v48 }
 0x110   : > { %3484 = vst [vmem:[%s6228_s30] sm:$0xf] %v3899_v32  ;;  %3486 = vst [vmem:[%s6228_s30 + $0x8] sm:$0x1] %v3899_v32 }
 0x111   : > { %4543 = vmatmul.mubr.msk.f32.gmra.mrb[28].mxu1 %vm498_vm3, %v6601_v3  ;;  %4769 = vmatmul.mubr.msk.f32.gmra.mrb[12].mxu0 %vm498_vm3, %v5636_v30  ;;  %3535 = vst [vmem:[%s6228_s30 + $0xcc] sm:$0xf] %v3899_v32  ;;  %3537 = vst [vmem:[%s6228_s30 + $0xd4] sm:$0x1] %v3899_v32 }
 0x112   : > { %4545 = vmatprep.mubr.msk.f32.mxu1 %vm498_vm3, %v5738_v15  ;;  %4771 = vmatprep.mubr.msk.f32.mxu0 %vm498_vm3, %v5640_v55 }
 0x115   : > { %4546 = vmatmul.mubr.msk.f32.gmra.mrb[30].mxu1 %vm498_vm3, %v5741_v16  ;;  %4772 = vmatmul.mubr.msk.f32.gmra.mrb[14].mxu0 %vm498_vm3, %v5653_v56  ;;  %v6602_v16 = vld [vmem:[#allocation44_spill] sm:$0xff] }
 0x116   : > { %4574 = vmatprep.mubr.msk.f32.mxu1 %vm498_vm3, %v6584_v7  ;;  %4774 = vmatprep.mubr.msk.f32.mxu0 %vm498_vm3, %v5657_v20 }
 0x119   : > { %4575 = vmatmul.mubr.msk.f32.vlgmr.msra.gmra.mrb[16].mxu1 %vm498_vm3, %v6585_v46  ;;  %4775 = vmatmul.mubr.msk.f32.gmra.mrb[16].mxu0 %vm498_vm3, %v5673_v37 }
 0x11a   : > { %4577 = vmatprep.mubr.msk.f32.mxu1 %vm498_vm3, %v6587_v1  ;;  %4777 = vmatprep.mubr.msk.f32.mxu0 %vm498_vm3, %v5677_v57 }
 0x11d   : > { %4578 = vmatmul.mubr.msk.f32.gmra.mrb[18].mxu1 %vm498_vm3, %v6589_v43  ;;  %4778 = vmatmul.mubr.msk.f32.gmra.mrb[18].mxu0 %vm498_vm3, %v5693_v21 }
 0x11e   : > { %4580 = vmatprep.mubr.msk.f32.mxu1 %vm498_vm3, %v6590_v29  ;;  %4780 = vmatprep.mubr.msk.f32.mxu0 %vm498_vm3, %v5697_v63 }
 0x121   : > { %4581 = vmatmul.mubr.msk.f32.gmra.mrb[20].mxu1 %vm498_vm3, %v6591_v24  ;;  %4781 = vmatmul.mubr.msk.f32.gmra.mrb[20].mxu0 %vm498_vm3, %v5710_v54 }
 0x122   : > { %4583 = vmatprep.mubr.msk.f32.mxu1 %vm498_vm3, %v6592_v14  ;;  %4783 = vmatprep.mubr.msk.f32.mxu0 %vm498_vm3, %v6579_v44 }
 0x125   : > { %4584 = vmatmul.mubr.msk.f32.gmra.mrb[22].mxu1 %vm498_vm3, %v6593_v6  ;;  %4784 = vmatmul.mubr.msk.f32.gmra.mrb[22].mxu0 %vm498_vm3, %v6602_v16 }
 0x126   : > { %4586 = vmatprep.mubr.msk.f32.mxu1 %vm498_vm3, %v6603_v5  ;;  %4786 = vmatprep.mubr.msk.f32.mxu0 %vm498_vm3, %v6604_v9 }
 0x129   : > { %4587 = vmatmul.mubr.msk.f32.gmra.mrb[24].mxu1 %vm498_vm3, %v6605_v17  ;;  %4787 = vmatmul.mubr.msk.f32.gmra.mrb[24].mxu0 %vm498_vm3, %v6606_v19 }
 0x12a   : > { %4589 = vmatprep.mubr.msk.f32.mxu1 %vm498_vm3, %v6607_v31  ;;  %4789 = vmatprep.mubr.msk.f32.mxu0 %vm498_vm3, %v6608_v39 }
 0x12d   : > { %4590 = vmatmul.mubr.msk.f32.gmra.mrb[26].mxu1 %vm498_vm3, %v6597_v13  ;;  %4790 = vmatmul.mubr.msk.f32.gmra.mrb[26].mxu0 %vm498_vm3, %v6609_v8 }
 0x12e   : > { %4592 = vmatprep.mubr.msk.f32.mxu1 %vm498_vm3, %v6598_v41  ;;  %4792 = vmatprep.mubr.msk.f32.mxu0 %vm498_vm3, %v6610_v38 }
 0x131   : > { %4593 = vmatmul.mubr.msk.f32.gmra.mrb[28].mxu1 %vm498_vm3, %v6599_v51  ;;  %4793 = vmatmul.mubr.msk.f32.gmra.mrb[28].mxu0 %vm498_vm3, %v6611_v47 }
 0x132   : > { %4595 = vmatprep.mubr.msk.f32.mxu1 %vm498_vm3, %v6064_v22  ;;  %4795 = vmatprep.mubr.msk.f32.mxu0 %vm498_vm3, %v485_v33 }
 0x135   : > { %4596 = vmatmul.mubr.msk.f32.gmra.mrb[30].mxu1 %vm498_vm3, %v6078_v58  ;;  %4796 = vmatmul.mubr.msk.f32.gmra.mrb[30].mxu0 %vm498_vm3, %v487_v60 }
 0x1ac   : > { %v4502_v15 = vpop.f32.mrb[0].mxu1 }
 0x1ad   : > { %v1483_v49 = vpop.f32.mrb[1].mxu1 }
 0x1b0   : > { %v4505_v30 = vpop.f32.mrb[2].mxu1 }
 0x1b1   : > { %v1493_v55 = vpop.f32.mrb[3].mxu1 }
 0x1b4   : > { %v4508_v56 = vpop.f32.mrb[4].mxu1 }
 0x1b5   : > { %v1503_v20 = vpop.f32.mrb[5].mxu1 }
 0x1b8   : > { %v4511_v37 = vpop.f32.mrb[6].mxu1 }
 0x1b9   : > { %v1513_v57 = vpop.f32.mrb[7].mxu1 }
 0x1bc   : > { %v6236_v21 = vpop.f32.mrb[8].mxu1 }
 0x1bd   : > { %v6238_v63 = vpop.f32.mrb[9].mxu1 }
 0x1c0   : > { %v6240_v54 = vpop.f32.mrb[10].mxu1 }
 0x1c1   : > { %v6242_v42 = vpop.f32.mrb[11].mxu1 }
 0x1c4   : > { %v6244_v13 = vpop.f32.mrb[12].mxu1 }
 0x1c5   : > { %v6246_v29 = vpop.f32.mrb[13].mxu1 }
 0x1c8   : > { %v6248_v12 = vpop.f32.mrb[14].mxu1 }
 0x1c9   : > { %v6250_v2 = vpop.f32.mrb[15].mxu1 }
 0x1cc   : > { %v4752_v18 = vpop.f32.mrb[0].mxu0 }
 0x1cd   : > { %v4800_v23 = vadd.f32 %v4752_v18, %v4502_v15  ;;  %v2807_v4 = vpop.f32.mrb[1].mxu0 }
 0x1ce   : > { %v4801_v36 = vadd.f32 %v2807_v4, %v1483_v49 }
 0x1cf   : > { %v3006_v25 = vmul.f32 %v4800_v23, %v6255_v61 }
 0x1d0   : > { %v3005_v10 = vmul.f32 %v4801_v36, %v6255_v61  ;;  %v4755_v11 = vpop.f32.mrb[2].mxu0 }
 0x1d1   : > { %v3045_v44 = vadd.f32 %v6260_v62, %v3006_v25  ;;  %v4802_v7 = vadd.f32 %v4755_v11, %v4505_v30  ;;  %v2817_v46 = vpop.f32.mrb[3].mxu0 }
 0x1d2   : > { %v3044_v1 = vadd.f32 %v6260_v62, %v3005_v10  ;;  %v4803_v43 = vadd.f32 %v2817_v46, %v1493_v55 }
 0x1d3   : > { %v3077_v24 = vmax.f32 %v3045_v44, 0.0  ;;  %v3008_v14 = vmul.f32 %v4802_v7, %v6255_v61 }
 0x1d4   : > { %v3076_v6 = vmax.f32 %v3044_v1, 0.0  ;;  %v3007_v22 = vmul.f32 %v4803_v43, %v6255_v61  ;;  %v4758_v26 = vpop.f32.mrb[4].mxu0 }
 0x1d5   : > { %v3141_v34 = vrot.slane %v3077_v24, 7  ;;  %v3047_v40 = vadd.f32 %v6260_v62, %v3008_v14  ;;  %v4804_v41 = vadd.f32 %v4758_v26, %v4508_v56  ;;  %v2827_v50 = vpop.f32.mrb[5].mxu0 }
 0x1d6   : > { %v3140_v51 = vrot.slane %v3076_v6, 7  ;;  %v3046_v58 = vadd.f32 %v6260_v62, %v3007_v22  ;;  %v4805_v28 = vadd.f32 %v2827_v50, %v1503_v20 }
 0x1d7   : > { %v3252_v35 = vsel %vm1939_vm1, %v3141_v34, 0.0  ;;  %v3079_v59 = vmax.f32 %v3047_v40, 0.0  ;;  %v3010_v52 = vmul.f32 %v4804_v41, %v6255_v61 }
 0x1d8   : > { %v3953_v3 = vpack.c.bf16 %v3252_v35, %v3252_v35  ;;  %v3142_v16 = vsel %vm1939_vm1, %v3140_v51, %v3141_v34  ;;  %v3236_v5 = vsel %vm1939_vm1, 0.0, %v3140_v51  ;;  %v3078_v9 = vmax.f32 %v3046_v58, 0.0  ;;  %v4761_v17 = vpop.f32.mrb[6].mxu0 }
 0x1d9   : > { %v3951_v19 = vpack.c.bf16 %v3236_v5, %v3236_v5  ;;  %v3952_v31 = vpack.c.bf16 %v3142_v16, %v3142_v16  ;;  %v3144_v39 = vrot.slane %v3079_v59, 7  ;;  %v3049_v45 = vadd.f32 %v6260_v62, %v3010_v52  ;;  %v2837_v0 = vpop.f32.mrb[7].mxu0 }
 0x1da   : > { %3489 = vst [vmem:[%s6228_s30 + $0x14] sm:$0x1] %v3953_v3  ;;  %v3143_v8 = vrot.slane %v3078_v9, 7  ;;  %v3009_v38 = vmul.f32 %v4805_v28, %v6255_v61  ;;  %v4806_v27 = vadd.f32 %v4761_v17, %v4511_v37  ;;  %v4807_v33 = vadd.f32 %v2837_v0, %v1513_v57 }
 0x1db   : > { %3487 = vst [vmem:[%s6228_s30 + $0xc] sm:$0xf] %v3951_v19  ;;  %3488 = vst [vmem:[%s6228_s30 + $0x10] sm:$0xf] %v3952_v31  ;;  %v3253_v47 = vsel %vm1939_vm1, %v3144_v39, 0.0  ;;  %v3081_v60 = vmax.f32 %v3049_v45, 0.0 }
 0x1dc   : > { %v3956_v48 = vpack.c.bf16 %v3253_v47, %v3253_v47  ;;  %v3145_v32 = vsel %vm1939_vm1, %v3143_v8, %v3144_v39  ;;  %v3237_v53 = vsel %vm1939_vm1, 0.0, %v3143_v8  ;;  %v3048_v15 = vadd.f32 %v6260_v62, %v3009_v38  ;;  %v4764_v49 = vpop.f32.mrb[8].mxu0 }
 0x1dd   : > { %v4006_v30 = vpack.c.bf16 %v3145_v32, %v3237_v53  ;;  %v3147_v55 = vrot.slane %v3081_v60, 7  ;;  %v3012_v56 = vmul.f32 %v4806_v27, %v6255_v61  ;;  %v3011_v20 = vmul.f32 %v4807_v33, %v6255_v61  ;;  %v2847_v37 = vpop.f32.mrb[9].mxu0 }
 0x1de   : > { %3492 = vst [vmem:[%s6228_s30 + $0x20] sm:$0x1] %v3956_v48  ;;  %v3080_v57 = vmax.f32 %v3048_v15, 0.0  ;;  %v4808_v18 = vadd.f32 %v4764_v49, %v6236_v21  ;;  %v4809_v23 = vadd.f32 %v2847_v37, %v6238_v63 }
 0x1df   : > { %4043 = vst [vmem:[%s6228_s30 + $0x18] sm:$0xff] %v4006_v30   ;;  %v3254_v4 = vsel %vm1939_vm1, %v3147_v55, 0.0  ;;  %v3051_v36 = vadd.f32 %v6260_v62, %v3012_v56  ;;  %v3050_v25 = vadd.f32 %v6260_v62, %v3011_v20 }
 0x1e0   : > { %v3959_v10 = vpack.c.bf16 %v3254_v4, %v3254_v4  ;;  %v3146_v11 = vrot.slane %v3080_v57, 7  ;;  %v3014_v44 = vmul.f32 %v4808_v18, %v6255_v61  ;;  %v3013_v7 = vmul.f32 %v4809_v23, %v6255_v61  ;;  %v4767_v46 = vpop.f32.mrb[10].mxu0 }
 0x1e1   : > { %v3083_v1 = vmax.f32 %v3051_v36, 0.0  ;;  %v3082_v43 = vmax.f32 %v3050_v25, 0.0  ;;  %v4810_v21 = vadd.f32 %v4767_v46, %v6240_v54  ;;  %v2857_v63 = vpop.f32.mrb[11].mxu0 }
 0x1e2   : > { %3495 = vst [vmem:[%s6228_s30 + $0x2c] sm:$0x1] %v3959_v10  ;;  %v3148_v24 = vsel %vm1939_vm1, %v3146_v11, %v3147_v55  ;;  %v3238_v14 = vsel %vm1939_vm1, 0.0, %v3146_v11  ;;  %v3053_v6 = vadd.f32 %v6260_v62, %v3014_v44  ;;  %v3052_v22 = vadd.f32 %v6260_v62, %v3013_v7 }
 0x1e3   : > { %v3957_v26 = vpack.c.bf16 %v3238_v14, %v3238_v14  ;;  %v3958_v34 = vpack.c.bf16 %v3148_v24, %v3148_v24  ;;  %v3150_v40 = vrot.slane %v3083_v1, 7  ;;  %v3149_v41 = vrot.slane %v3082_v43, 7 }
 0x1e4   : > { %v3085_v50 = vmax.f32 %v3053_v6, 0.0  ;;  %v3084_v51 = vmax.f32 %v3052_v22, 0.0  ;;  %v3016_v54 = vmul.f32 %v4810_v21, %v6255_v61  ;;  %v4811_v58 = vadd.f32 %v2857_v63, %v6242_v42  ;;  %v4770_v28 = vpop.f32.mrb[12].mxu0 }
 0x1e5   : > { %3493 = vst [vmem:[%s6228_s30 + $0x24] sm:$0xf] %v3957_v26  ;;  %3494 = vst [vmem:[%s6228_s30 + $0x28] sm:$0xf] %v3958_v34  ;;  %v3255_v35 = vsel %vm1939_vm1, %v3150_v40, 0.0  ;;  %v3151_v59 = vsel %vm1939_vm1, %v3149_v41, %v3150_v40  ;;  %v3239_v52 = vsel %vm1939_vm1, 0.0, %v3149_v41  ;;  %v4812_v3 = vadd.f32 %v4770_v28, %v6244_v13 }
 0x1e6   : > { %v2867_v16 = vpop.f32.mrb[13].mxu0  ;;  %v3962_v5 = vpack.c.bf16 %v3255_v35, %v3255_v35  ;;  %v4011_v9 = vpack.c.bf16 %v3151_v59, %v3239_v52  ;;  %v3153_v17 = vrot.slane %v3085_v50, 7  ;;  %v3152_v19 = vrot.slane %v3084_v51, 7 }
 0x1e7   : > { %v3055_v42 = vadd.f32 %v6260_v62, %v3016_v54  ;;  %v3015_v31 = vmul.f32 %v4811_v58, %v6255_v61  ;;  %v3018_v39 = vmul.f32 %v4812_v3, %v6255_v61  ;;  %v4813_v45 = vadd.f32 %v2867_v16, %v6246_v29 }
 0x1e8   : > { %3498 = vst [vmem:[%s6228_s30 + $0x38] sm:$0x1] %v3962_v5  ;;  %4044 = vst [vmem:[%s6228_s30 + $0x30] sm:$0xff] %v4011_v9   ;;  %v3256_v13 = vsel %vm1939_vm1, %v3153_v17, 0.0  ;;  %v3154_v0 = vsel %vm1939_vm1, %v3152_v19, %v3153_v17  ;;  %v3240_v8 = vsel %vm1939_vm1, 0.0, %v3152_v19  ;;  %v4773_v38 = vpop.f32.mrb[14].mxu0 }
 0x1e9   : > { %v3965_v27 = vpack.c.bf16 %v3256_v13, %v3256_v13  ;;  %v3963_v33 = vpack.c.bf16 %v3240_v8, %v3240_v8  ;;  %v3964_v47 = vpack.c.bf16 %v3154_v0, %v3154_v0  ;;  %v3087_v60 = vmax.f32 %v3055_v42, 0.0  ;;  %v2877_v48 = vpop.f32.mrb[15].mxu0 }
 0x1ea   : > { %v3054_v32 = vadd.f32 %v6260_v62, %v3015_v31  ;;  %v3057_v29 = vadd.f32 %v6260_v62, %v3018_v39  ;;  %v3017_v53 = vmul.f32 %v4813_v45, %v6255_v61  ;;  %v4814_v15 = vadd.f32 %v4773_v38, %v6248_v12 }
 0x1eb   : > { %3501 = vst [vmem:[%s6228_s30 + $0x44] sm:$0x1] %v3965_v27  ;;  %3499 = vst [vmem:[%s6228_s30 + $0x3c] sm:$0xf] %v3963_v33  ;;  %v3156_v49 = vrot.slane %v3087_v60, 7  ;;  %v4815_v30 = vadd.f32 %v2877_v48, %v6250_v2 }
 0x1ec   : > { %3500 = vst [vmem:[%s6228_s30 + $0x40] sm:$0xf] %v3964_v47  ;;  %v4576_v55 = vpop.f32.mrb[16].mxu1  ;;  %v3086_v56 = vmax.f32 %v3054_v32, 0.0  ;;  %v3089_v20 = vmax.f32 %v3057_v29, 0.0  ;;  %v3056_v37 = vadd.f32 %v6260_v62, %v3017_v53  ;;  %v3020_v57 = vmul.f32 %v4814_v15, %v6255_v61  ;;  %v4776_v18 = vpop.f32.mrb[16].mxu0 }
 0x1ed   : > { %v1827_v23 = vpop.f32.mrb[17].mxu1  ;;  %v3257_v4 = vsel %vm1939_vm1, %v3156_v49, 0.0  ;;  %v3019_v12 = vmul.f32 %v4815_v30, %v6255_v61  ;;  %v4816_v36 = vadd.f32 %v4776_v18, %v4576_v55  ;;  %v2887_v25 = vpop.f32.mrb[17].mxu0 }
 0x1ee   : > { %v3968_v10 = vpack.c.bf16 %v3257_v4, %v3257_v4  ;;  %v3155_v11 = vrot.slane %v3086_v56, 7  ;;  %v3159_v44 = vrot.slane %v3089_v20, 7  ;;  %v3088_v2 = vmax.f32 %v3056_v37, 0.0 }
 0x1ef   : > { %v3059_v7 = vadd.f32 %v6260_v62, %v3020_v57  ;;  %v3058_v46 = vadd.f32 %v6260_v62, %v3019_v12  ;;  %v3022_v1 = vmul.f32 %v4816_v36, %v6255_v61  ;;  %v4817_v43 = vadd.f32 %v2887_v25, %v1827_v23 }
 0x1f0   : > { %v4579_v21 = vpop.f32.mrb[18].mxu1  ;;  %3504 = vst [vmem:[%s6228_s30 + $0x50] sm:$0x1] %v3968_v10  ;;  %v3157_v63 = vsel %vm1939_vm1, %v3155_v11, %v3156_v49  ;;  %v3241_v24 = vsel %vm1939_vm1, 0.0, %v3155_v11  ;;  %v3258_v14 = vsel %vm1939_vm1, %v3159_v44, 0.0  ;;  %v3158_v6 = vrot.slane %v3088_v2, 7 }
 0x1f1   : > { %v4779_v22 = vpop.f32.mrb[18].mxu0  ;;  %v1837_v26 = vpop.f32.mrb[19].mxu1  ;;  %v4016_v34 = vpack.c.bf16 %v3157_v63, %v3241_v24  ;;  %v3971_v40 = vpack.c.bf16 %v3258_v14, %v3258_v14  ;;  %v3091_v41 = vmax.f32 %v3059_v7, 0.0  ;;  %v3090_v50 = vmax.f32 %v3058_v46, 0.0 }
 0x1f2   : > { %v2897_v51 = vpop.f32.mrb[19].mxu0  ;;  %v3160_v54 = vsel %vm1939_vm1, %v3158_v6, %v3159_v44  ;;  %v3242_v58 = vsel %vm1939_vm1, 0.0, %v3158_v6  ;;  %v3061_v28 = vadd.f32 %v6260_v62, %v3022_v1  ;;  %v3021_v35 = vmul.f32 %v4817_v43, %v6255_v61 }
 0x1f3   : > { %4045 = vst [vmem:[%s6228_s30 + $0x48] sm:$0xff] %v4016_v34   ;;  %3507 = vst [vmem:[%s6228_s30 + $0x5c] sm:$0x1] %v3971_v40  ;;  %v3969_v59 = vpack.c.bf16 %v3242_v58, %v3242_v58  ;;  %v3970_v52 = vpack.c.bf16 %v3160_v54, %v3160_v54  ;;  %v3162_v3 = vrot.slane %v3091_v41, 7  ;;  %v3161_v16 = vrot.slane %v3090_v50, 7 }
 0x1f4   : > { %v4582_v5 = vpop.f32.mrb[20].mxu1  ;;  %v3093_v9 = vmax.f32 %v3061_v28, 0.0  ;;  %v3060_v17 = vadd.f32 %v6260_v62, %v3021_v35  ;;  %v4818_v19 = vadd.f32 %v4779_v22, %v4579_v21  ;;  %v4819_v42 = vadd.f32 %v2897_v51, %v1837_v26  ;;  %v4782_v31 = vpop.f32.mrb[20].mxu0 }
 0x1f5   : > { %v1847_v39 = vpop.f32.mrb[21].mxu1  ;;  %3505 = vst [vmem:[%s6228_s30 + $0x54] sm:$0xf] %v3969_v59  ;;  %3506 = vst [vmem:[%s6228_s30 + $0x58] sm:$0xf] %v3970_v52  ;;  %v3259_v45 = vsel %vm1939_vm1, %v3162_v3, 0.0  ;;  %v3163_v13 = vsel %vm1939_vm1, %v3161_v16, %v3162_v3  ;;  %v4820_v8 = vadd.f32 %v4782_v31, %v4582_v5 }
 0x1f6   : > { %v3243_v0 = vsel %vm1939_vm1, 0.0, %v3161_v16  ;;  %v2907_v38 = vpop.f32.mrb[21].mxu0  ;;  %v3974_v27 = vpack.c.bf16 %v3259_v45, %v3259_v45  ;;  %v3165_v47 = vrot.slane %v3093_v9, 7  ;;  %v3092_v60 = vmax.f32 %v3060_v17, 0.0 }
 0x1f7   : > { %v4021_v33 = vpack.c.bf16 %v3163_v13, %v3243_v0  ;;  %v3024_v48 = vmul.f32 %v4818_v19, %v6255_v61  ;;  %v3023_v32 = vmul.f32 %v4819_v42, %v6255_v61  ;;  %v3026_v29 = vmul.f32 %v4820_v8, %v6255_v61 }
 0x1f8   : > { %v4821_v53 = vadd.f32 %v2907_v38, %v1847_v39  ;;  %v4585_v15 = vpop.f32.mrb[22].mxu1  ;;  %3510 = vst [vmem:[%s6228_s30 + $0x68] sm:$0x1] %v3974_v27  ;;  %v3260_v49 = vsel %vm1939_vm1, %v3165_v47, 0.0  ;;  %v3164_v30 = vrot.slane %v3092_v60, 7  ;;  %v4785_v55 = vpop.f32.mrb[22].mxu0 }
 0x1f9   : > { %4046 = vst [vmem:[%s6228_s30 + $0x60] sm:$0xff] %v4021_v33   ;;  %v1857_v56 = vpop.f32.mrb[23].mxu1  ;;  %v3977_v20 = vpack.c.bf16 %v3260_v49, %v3260_v49  ;;  %v3063_v37 = vadd.f32 %v6260_v62, %v3024_v48  ;;  %v3062_v57 = vadd.f32 %v6260_v62, %v3023_v32  ;;  %v3065_v18 = vadd.f32 %v6260_v62, %v3026_v29  ;;  %v2917_v23 = vpop.f32.mrb[23].mxu0 }
 0x1fa   : > { %v3166_v4 = vsel %vm1939_vm1, %v3164_v30, %v3165_v47  ;;  %v3244_v12 = vsel %vm1939_vm1, 0.0, %v3164_v30  ;;  %v3025_v36 = vmul.f32 %v4821_v53, %v6255_v61  ;;  %v4822_v25 = vadd.f32 %v4785_v55, %v4585_v15 }
 0x1fb   : > { %3513 = vst [vmem:[%s6228_s30 + $0x74] sm:$0x1] %v3977_v20  ;;  %v3975_v10 = vpack.c.bf16 %v3244_v12, %v3244_v12  ;;  %v3976_v11 = vpack.c.bf16 %v3166_v4, %v3166_v4  ;;  %v3095_v44 = vmax.f32 %v3063_v37, 0.0  ;;  %v3094_v2 = vmax.f32 %v3062_v57, 0.0 }
 0x1fc   : > { %v4588_v7 = vpop.f32.mrb[24].mxu1  ;;  %v3097_v46 = vmax.f32 %v3065_v18, 0.0  ;;  %v3064_v1 = vadd.f32 %v6260_v62, %v3025_v36  ;;  %v3028_v43 = vmul.f32 %v4822_v25, %v6255_v61  ;;  %v4823_v21 = vadd.f32 %v2917_v23, %v1857_v56  ;;  %v4788_v63 = vpop.f32.mrb[24].mxu0 }
 0x1fd   : > { %v1867_v24 = vpop.f32.mrb[25].mxu1  ;;  %3511 = vst [vmem:[%s6228_s30 + $0x6c] sm:$0xf] %v3975_v10  ;;  %3512 = vst [vmem:[%s6228_s30 + $0x70] sm:$0xf] %v3976_v11  ;;  %v3168_v14 = vrot.slane %v3095_v44, 7  ;;  %v4824_v22 = vadd.f32 %v4788_v63, %v4588_v7 }
 0x1fe   : > { %v3167_v6 = vrot.slane %v3094_v2, 7  ;;  %v2927_v26 = vpop.f32.mrb[25].mxu0  ;;  %v3171_v34 = vrot.slane %v3097_v46, 7  ;;  %v3096_v40 = vmax.f32 %v3064_v1, 0.0  ;;  %v3067_v41 = vadd.f32 %v6260_v62, %v3028_v43 }
 0x1ff   : > { %v3027_v50 = vmul.f32 %v4823_v21, %v6255_v61  ;;  %v3261_v51 = vsel %vm1939_vm1, %v3168_v14, 0.0  ;;  %v3030_v28 = vmul.f32 %v4824_v22, %v6255_v61  ;;  %v4825_v0 = vadd.f32 %v2927_v26, %v1867_v24 }
 0x200   : > { %v3169_v54 = vsel %vm1939_vm1, %v3167_v6, %v3168_v14  ;;  %v3245_v58 = vsel %vm1939_vm1, 0.0, %v3167_v6  ;;  %v4591_v35 = vpop.f32.mrb[26].mxu1  ;;  %v3980_v59 = vpack.c.bf16 %v3261_v51, %v3261_v51  ;;  %v3262_v3 = vsel %vm1939_vm1, %v3171_v34, 0.0  ;;  %v4791_v5 = vpop.f32.mrb[26].mxu0 }
 0x201   : > { %v4026_v52 = vpack.c.bf16 %v3169_v54, %v3245_v58  ;;  %v3170_v16 = vrot.slane %v3096_v40, 7  ;;  %v1877_v9 = vpop.f32.mrb[27].mxu1  ;;  %v3983_v17 = vpack.c.bf16 %v3262_v3, %v3262_v3  ;;  %v3099_v19 = vmax.f32 %v3067_v41, 0.0  ;;  %v2937_v39 = vpop.f32.mrb[27].mxu0 }
 0x202   : > { %v3066_v42 = vadd.f32 %v6260_v62, %v3027_v50  ;;  %v3069_v31 = vadd.f32 %v6260_v62, %v3030_v28  ;;  %3516 = vst [vmem:[%s6228_s30 + $0x80] sm:$0x1] %v3980_v59  ;;  %v4826_v8 = vadd.f32 %v4791_v5, %v4591_v35  ;;  %v3029_v32 = vmul.f32 %v4825_v0, %v6255_v61 }
 0x203   : > { %4047 = vst [vmem:[%s6228_s30 + $0x78] sm:$0xff] %v4026_v52   ;;  %v3172_v45 = vsel %vm1939_vm1, %v3170_v16, %v3171_v34  ;;  %v3246_v13 = vsel %vm1939_vm1, 0.0, %v3170_v16  ;;  %3519 = vst [vmem:[%s6228_s30 + $0x8c] sm:$0x1] %v3983_v17  ;;  %v3174_v33 = vrot.slane %v3099_v19, 7  ;;  %v4827_v53 = vadd.f32 %v2937_v39, %v1877_v9 }
 0x204   : > { %v3981_v38 = vpack.c.bf16 %v3246_v13, %v3246_v13  ;;  %v3982_v27 = vpack.c.bf16 %v3172_v45, %v3172_v45  ;;  %v3098_v47 = vmax.f32 %v3066_v42, 0.0  ;;  %v4594_v60 = vpop.f32.mrb[28].mxu1  ;;  %v3101_v48 = vmax.f32 %v3069_v31, 0.0  ;;  %v4794_v15 = vpop.f32.mrb[28].mxu0 }
 0x205   : > { %v3032_v29 = vmul.f32 %v4826_v8, %v6255_v61  ;;  %v1887_v49 = vpop.f32.mrb[29].mxu1  ;;  %v3263_v30 = vsel %vm1939_vm1, %v3174_v33, 0.0  ;;  %v4828_v56 = vadd.f32 %v4794_v15, %v4594_v60  ;;  %v2947_v20 = vpop.f32.mrb[29].mxu0  ;;  %v3068_v18 = vadd.f32 %v6260_v62, %v3029_v32 }
 0x206   : > { %3517 = vst [vmem:[%s6228_s30 + $0x84] sm:$0xf] %v3981_v38  ;;  %3518 = vst [vmem:[%s6228_s30 + $0x88] sm:$0xf] %v3982_v27  ;;  %v3173_v55 = vrot.slane %v3098_v47, 7  ;;  %v3986_v37 = vpack.c.bf16 %v3263_v30, %v3263_v30  ;;  %v3177_v57 = vrot.slane %v3101_v48, 7  ;;  %v3031_v36 = vmul.f32 %v4827_v53, %v6255_v61 }
 0x207   : > { %v3071_v23 = vadd.f32 %v6260_v62, %v3032_v29  ;;  %v3034_v25 = vmul.f32 %v4828_v56, %v6255_v61  ;;  %v3100_v2 = vmax.f32 %v3068_v18, 0.0  ;;  %v4829_v24 = vadd.f32 %v2947_v20, %v1887_v49 }
 0x208   : > { %v3175_v4 = vsel %vm1939_vm1, %v3173_v55, %v3174_v33  ;;  %v3247_v12 = vsel %vm1939_vm1, 0.0, %v3173_v55  ;;  %v4597_v10 = vpop.f32.mrb[30].mxu1  ;;  %3522 = vst [vmem:[%s6228_s30 + $0x98] sm:$0x1] %v3986_v37  ;;  %v3264_v44 = vsel %vm1939_vm1, %v3177_v57, 0.0  ;;  %v4797_v46 = vpop.f32.mrb[30].mxu0  ;;  %v3070_v21 = vadd.f32 %v6260_v62, %v3031_v36 }
 0x209   : > { %v4031_v11 = vpack.c.bf16 %v3175_v4, %v3247_v12  ;;  %v3103_v7 = vmax.f32 %v3071_v23, 0.0  ;;  %v1897_v1 = vpop.f32.mrb[31].mxu1  ;;  %v3989_v43 = vpack.c.bf16 %v3264_v44, %v3264_v44  ;;  %v3073_v63 = vadd.f32 %v6260_v62, %v3034_v25  ;;  %v2957_v14 = vpop.f32.mrb[31].mxu0 }
 0x20a   : > { %v3176_v6 = vrot.slane %v3100_v2, 7  ;;  %v4830_v26 = vadd.f32 %v4797_v46, %v4597_v10  ;;  %v4831_v34 = vadd.f32 %v2957_v14, %v1897_v1  ;;  %v3102_v40 = vmax.f32 %v3070_v21, 0.0 }
 0x20b   : > { %4048 = vst [vmem:[%s6228_s30 + $0x90] sm:$0xff] %v4031_v11   ;;  %v3180_v22 = vrot.slane %v3103_v7, 7  ;;  %3525 = vst [vmem:[%s6228_s30 + $0xa4] sm:$0x1] %v3989_v43  ;;  %v3105_v41 = vmax.f32 %v3073_v63, 0.0  ;;  %v3033_v50 = vmul.f32 %v4829_v24, %v6255_v61 }
 0x20c   : > { %v3178_v51 = vsel %vm1939_vm1, %v3176_v6, %v3177_v57  ;;  %v3248_v54 = vsel %vm1939_vm1, 0.0, %v3176_v6  ;;  %v3036_v28 = vmul.f32 %v4830_v26, %v6255_v61  ;;  %v3179_v3 = vrot.slane %v3102_v40, 7 }
 0x20d   : > { %v3265_v58 = vsel %vm1939_vm1, %v3180_v22, 0.0  ;;  %v3987_v35 = vpack.c.bf16 %v3248_v54, %v3248_v54  ;;  %v3988_v59 = vpack.c.bf16 %v3178_v51, %v3178_v51  ;;  %v3183_v16 = vrot.slane %v3105_v41, 7 }
 0x20e   : > { %v3992_v52 = vpack.c.bf16 %v3265_v58, %v3265_v58  ;;  %v3072_v5 = vadd.f32 %v6260_v62, %v3033_v50  ;;  %v3075_v9 = vadd.f32 %v6260_v62, %v3036_v28  ;;  %v3035_v17 = vmul.f32 %v4831_v34, %v6255_v61 }
 0x20f   : > { %3523 = vst [vmem:[%s6228_s30 + $0x9c] sm:$0xf] %v3987_v35  ;;  %3524 = vst [vmem:[%s6228_s30 + $0xa0] sm:$0xf] %v3988_v59  ;;  %v3181_v19 = vsel %vm1939_vm1, %v3179_v3, %v3180_v22  ;;  %v3249_v42 = vsel %vm1939_vm1, 0.0, %v3179_v3  ;;  %v3266_v39 = vsel %vm1939_vm1, %v3183_v16, 0.0 }
 0x210   : > { %3528 = vst [vmem:[%s6228_s30 + $0xb0] sm:$0x1] %v3992_v52  ;;  %v4036_v31 = vpack.c.bf16 %v3181_v19, %v3249_v42  ;;  %v3104_v45 = vmax.f32 %v3072_v5, 0.0  ;;  %v3107_v13 = vmax.f32 %v3075_v9, 0.0  ;;  %v3995_v0 = vpack.c.bf16 %v3266_v39, %v3266_v39 }
 0x211   : > { %v3074_v8 = vadd.f32 %v6260_v62, %v3035_v17 }
 0x212   : > { %4049 = vst [vmem:[%s6228_s30 + $0xa8] sm:$0xff] %v4036_v31   ;;  %v3182_v61 = vrot.slane %v3104_v45, 7  ;;  %v3186_v38 = vrot.slane %v3107_v13, 7  ;;  %3531 = vst [vmem:[%s6228_s30 + $0xbc] sm:$0x1] %v3995_v0 }
 0x213   : > { %v3106_v27 = vmax.f32 %v3074_v8, 0.0 }
 0x214   : > { %v3184_v33 = vsel %vm1939_vm1, %v3182_v61, %v3183_v16  ;;  %v3250_v47 = vsel %vm1939_vm1, 0.0, %v3182_v61  ;;  %v3267_v60 = vsel %vm1939_vm1, %v3186_v38, 0.0 }
 0x215   : > { %v3993_v48 = vpack.c.bf16 %v3250_v47, %v3250_v47  ;;  %v3994_v32 = vpack.c.bf16 %v3184_v33, %v3184_v33  ;;  %v3998_v29 = vpack.c.bf16 %v3267_v60, %v3267_v60  ;;  %v3185_v53 = vrot.slane %v3106_v27, 7 }
 0x217   : > { %3529 = vst [vmem:[%s6228_s30 + $0xb4] sm:$0xf] %v3993_v48  ;;  %3530 = vst [vmem:[%s6228_s30 + $0xb8] sm:$0xf] %v3994_v32  ;;  %v3187_v62 = vsel %vm1939_vm1, %v3185_v53, %v3186_v38  ;;  %v3251_v15 = vsel %vm1939_vm1, 0.0, %v3185_v53 }
 0x218   : > { %3534 = vst [vmem:[%s6228_s30 + $0xc8] sm:$0x1] %v3998_v29  ;;  %v4041_v49 = vpack.c.bf16 %v3187_v62, %v3251_v15 }
 0x21a   : > { %4050 = vst [vmem:[%s6228_s30 + $0xc0] sm:$0xff] %v4041_v49  }
 0x21b PF: > { %s14_s15 = sadd.s32 1, %s5073_s15  }
 0x21c   : > { %p11_p4 = scmp.ge.s32.totalorder %s14_s15, 6  }
 0x21e   :  { %13 = sbr.rel (!%p11_p4) target bundleno = 1 (0x1), region = 66 }

// kernel: swag_content_loss.8
= control target key start
LH: loop header
LB: loop body
LE: loop exit
PB: predicated region body
PF: predicated region fallthrough
CT: control target
= control target key end

     0   :  { %s3581_s15 = smov 0   ;;  %s4975_s0 = inlined_call_operand.vmem [shape: bf16[4,18,18,128], index: 0, kind: input, shape index: {}]   ;;  %s4976_s1 = inlined_call_operand.vmem [shape: bf16[1152,128], index: 1, kind: input, shape index: {}]   ;;  %s4977_s2 = inlined_call_operand.vmem [shape: f32[1,128], index: 2, kind: input, shape index: {}]   ;;  %s4978_s3 = inlined_call_operand.vmem [shape: f32[1,128], index: 3, kind: input, shape index: {}]   ;;  %s4979_s4 = inlined_call_operand.vmem [shape: bf16[4,18,18,128], index: 4, kind: output, shape index: {}]  }
   0x1 LB: > { %s2646_s16 = sadd.s32 4294967295, %s3553_s15   ;;  %p2650_p0 = scmp.ge.s32.totalorder %s3553_s15, 1  ;;  %s3553_s15 = sphi %s3581_s15, %s14_s15  }
   0x2   : > { %p162_p1 = scmp.lt.s32.totalorder %s3553_s15, 5 }
   0x4   : > { %p163_p2 = pnand %p2650_p0, %p162_p1 }
   0x5   : > { %v3439_v0 = vld [vmem:[%s4976_s1 + $0x40] sm:$0xff] (!%p163_p2)   ;;  %p188_p3 = scmp.lt.s32.totalorder (!%p163_p2), %s2646_s16, 3  ;;  %v3441_v2 = vld [vmem:[%s4976_s1 + $0x48] sm:$0xff] (!%p163_p2)   ;;  %v3443_v4 = vld [vmem:[%s4976_s1 + $0x50] sm:$0xff] (!%p163_p2)   ;;  %vm355_vm0 = vcmask (!%p163_p2), 1046528   ;;  %vm468_vm1 = vcmask (!%p163_p2), 1045504  }
   0x6   : > { %166 = sbr.rel (%p163_p2) target bundleno = 555 (0x22b), region = 36  ;;  %v3440_v1 = vld [vmem:[%s4976_s1] sm:$0xff] (!%p163_p2)   ;;  %2893 = vmatprep.subr.bf16.mxu0 (!%p163_p2), %v3439_v0  ;;  %3413 = vmatprep.subr.bf16.mxu1 (!%p163_p2), %v3439_v0  ;;  %v3442_v3 = vld [vmem:[%s4976_s1 + $0x8] sm:$0xff] (!%p163_p2)   ;;  %v3444_v5 = vld [vmem:[%s4976_s1 + $0x10] sm:$0xff] (!%p163_p2)   ;;  %vm2192_vm2 = vcmask (!%p163_p2), 1040384  }
   0x7   : > { %2894 = vmatpush3.bf16.msra.mxu0 (!%p163_p2), %v3440_v1  ;;  %3421 = vmatpush3.bf16.msra.mxu1 (!%p163_p2), %v3440_v1  ;;  %v3445_v6 = vld [vmem:[%s4976_s1 + $0x58] sm:$0xff] (!%p163_p2)   ;;  %v3447_v8 = vld [vmem:[%s4976_s1 + $0x60] sm:$0xff] (!%p163_p2)   ;;  %v3449_v10 = vld [vmem:[%s4976_s1 + $0x68] sm:$0xff] (!%p163_p2)  }
   0x8   : > { %2895 = vmatprep.subr.bf16.mxu0 (!%p163_p2), %v3441_v2  ;;  %3414 = vmatprep.subr.bf16.mxu1 (!%p163_p2), %v3441_v2  ;;  %v3446_v7 = vld [vmem:[%s4976_s1 + $0x18] sm:$0xff] (!%p163_p2)   ;;  %v3448_v9 = vld [vmem:[%s4976_s1 + $0x20] sm:$0xff] (!%p163_p2)   ;;  %v3450_v21 = vld [vmem:[%s4976_s1 + $0x28] sm:$0xff] (!%p163_p2)  }
   0x9   : > { %v3451_v25 = vld [vmem:[%s4976_s1 + $0x70] sm:$0xff] (!%p163_p2)   ;;  %v3453_v35 = vld [vmem:[%s4976_s1 + $0x78] sm:$0xff] (!%p163_p2)   ;;  %v3457_v48 = vld [vmem:[%s4976_s1 + $0xc0] sm:$0xff] (!%p163_p2)  }
   0xa   : > { %v3452_v33 = vld [vmem:[%s4976_s1 + $0x30] sm:$0xff] (!%p163_p2)   ;;  %v3454_v44 = vld [vmem:[%s4976_s1 + $0x38] sm:$0xff] (!%p163_p2)   ;;  %v3460_v52 = vld [vmem:[%s4976_s1 + $0x140] sm:$0xff] (!%p163_p2)  }
   0xb   : > { %2896 = vmatpush3.bf16.msra.mxu0 (!%p163_p2), %v3442_v3  ;;  %3422 = vmatpush3.bf16.msra.mxu1 (!%p163_p2), %v3442_v3  ;;  %v3458_v56 = vld [vmem:[%s4976_s1 + $0x80] sm:$0xff] (!%p163_p2)  }
   0xc   : > { %2897 = vmatprep.subr.bf16.mxu0 (!%p163_p2), %v3443_v4  ;;  %3415 = vmatprep.subr.bf16.mxu1 (!%p163_p2), %v3443_v4  ;;  %v3462_v59 = vld [vmem:[%s4976_s1 + $0x100] sm:$0xff] (!%p163_p2)  }
   0xd   : > { %s5027_s16 = smov (!%p188_p3, %s2646_s16), 3 }
   0xe   : > { %s3429_s5 = smul.u32 216, %s5027_s16 }
   0xf   : > { %2898 = vmatpush3.bf16.msra.mxu0 %v3444_v5  ;;  %3423 = vmatpush3.bf16.msra.mxu1 %v3444_v5  ;;  %v3459_v5 = vld [vmem:[%s4976_s1 + $0xc8] sm:$0xff]  }
  0x10   : > { %2899 = vmatprep.subr.bf16.mxu0 %v3445_v6  ;;  %3416 = vmatprep.subr.bf16.mxu1 %v3445_v6  ;;  %s3624_s12 = scalar_lea.vmem %s4975_s0, %s3429_s5  ;;  %s4668_s7 = scalar_lea.vmem %s4979_s4, %s3429_s5 }
  0x11   : > { %v3633_v11 = vld [vmem:[%s3624_s12] sm:$0xff]   ;;  %v3636_v12 = vld [vmem:[%s3624_s12 + $0x8] sm:$0x1]  ;;  %v3639_v13 = vld [vmem:[%s3624_s12 + $0x90] sm:$0xff]  }
  0x12   : > { %v253_v14 = vunpack.c.l.bf16 %v3633_v11  ;;  %v254_v15 = vunpack.c.h.bf16 %v3633_v11  ;;  %v255_v16 = vunpack.c.l.bf16 %v3636_v12  ;;  %v3645_v17 = vld [vmem:[%s3624_s12 + $0x98] sm:$0x1]  ;;  %v289_v18 = vunpack.c.l.bf16 %v3639_v13  ;;  %v3681_v37 = vld [vmem:[%s3624_s12 + $0xc] sm:$0xff]   ;;  %v3684_v38 = vld [vmem:[%s3624_s12 + $0x14] sm:$0x1] }
  0x13   : > { %2900 = vmatpush3.bf16.msra.mxu0 %v3446_v7  ;;  %3424 = vmatpush3.bf16.msra.mxu1 %v3446_v7  ;;  %v290_v19 = vunpack.c.h.bf16 %v3639_v13  ;;  %v291_v20 = vunpack.c.l.bf16 %v3645_v17  ;;  %v256_v39 = vunpack.c.l.bf16 %v3681_v37  ;;  %v257_v40 = vunpack.c.h.bf16 %v3681_v37  ;;  %v3690_v42 = vld [vmem:[%s3624_s12 + $0x9c] sm:$0xff]   ;;  %v3693_v43 = vld [vmem:[%s3624_s12 + $0xa4] sm:$0x1]  ;;  %v3740_v3 = vld [vmem:[%s3624_s12 + $0xa8] sm:$0xff]  }
  0x14   : > { %2901 = vmatprep.subr.bf16.mxu0 %v3447_v8  ;;  %3417 = vmatprep.subr.bf16.mxu1 %v3447_v8  ;;  %v356_v22 = vrot.slane %v253_v14, 1  ;;  %v357_v23 = vrot.slane %v254_v15, 1  ;;  %v359_v24 = vrot.slane %v255_v16, 1  ;;  %v416_v26 = vrot.slane %v289_v18, 1  ;;  %v3731_v62 = vld [vmem:[%s3624_s12 + $0x18] sm:$0xff]  }
  0x15   : > { %v417_v27 = vrot.slane %v290_v19, 1  ;;  %v419_v30 = vrot.slane %v291_v20, 1  ;;  %v258_v41 = vunpack.c.l.bf16 %v3684_v38  ;;  %v292_v45 = vunpack.c.l.bf16 %v3690_v42  ;;  %v3734_v63 = vld [vmem:[%s3624_s12 + $0x20] sm:$0x1]  ;;  %v3743_v4 = vld [vmem:[%s3624_s12 + $0xb0] sm:$0x1] }
  0x16   : > { %v358_v28 = vsel %vm355_vm0, %v356_v22, %v357_v23  ;;  %v360_v29 = vsel %vm355_vm0, %v357_v23, %v359_v24  ;;  %v293_v46 = vunpack.c.h.bf16 %v3690_v42  ;;  %v4989_v47 = vunpack.c.l.bf16 %v3693_v43 }
  0x17   : > { %2902 = vmatpush3.bf16.msra.mxu0 %v3448_v9  ;;  %3425 = vmatpush3.bf16.msra.mxu1 %v3448_v9  ;;  %v616_v31 = vpack.c.bf16 %v360_v29, %v358_v28  ;;  %v418_v32 = vsel %vm355_vm0, %v416_v26, %v417_v27  ;;  %v420_v34 = vsel %vm355_vm0, %v417_v27, %v419_v30  ;;  %v361_v49 = vrot.slane %v256_v39, 1  ;;  %v3465_v26 = vld [vmem:[%s4976_s1 + $0xd0] sm:$0xff]  }
  0x18   : > { %2903 = vmatprep.subr.bf16.mxu0 %v3449_v10  ;;  %3418 = vmatprep.subr.bf16.mxu1 %v3449_v10  ;;  %v3678_v36 = vpack.c.bf16 %v420_v34, %v418_v32  ;;  %v362_v50 = vrot.slane %v257_v40, 1  ;;  %v364_v51 = vrot.slane %v258_v41, 1  ;;  %v421_v53 = vrot.slane %v292_v45, 1  ;;  %v3461_v10 = vld [vmem:[%s4976_s1 + $0x88] sm:$0xff]  }
  0x19   : > { %1277 = vmatprep.mubr.bf16.mxu0 %v616_v31  ;;  %v422_v54 = vrot.slane %v293_v46, 1  ;;  %v424_v55 = vrot.slane %v4989_v47, 1  ;;  %v259_v0 = vunpack.c.l.bf16 %v3731_v62  ;;  %v260_v1 = vunpack.c.h.bf16 %v3731_v62  ;;  %v3474_v32 = vld [vmem:[%s4976_s1 + $0x108] sm:$0xff]  }
  0x1a   : > { %1373 = vmatprep.mubr.bf16.mxu1 %v3678_v36  ;;  %v363_v57 = vsel %vm355_vm0, %v361_v49, %v362_v50  ;;  %v365_v58 = vsel %vm355_vm0, %v362_v50, %v364_v51  ;;  %v261_v2 = vunpack.c.l.bf16 %v3734_v63  ;;  %v4988_v7 = vunpack.c.l.bf16 %v3740_v3  ;;  %v3509_v63 = vld [vmem:[%s4976_s1 + $0x178] sm:$0xff]  }
  0x1b   : > { %2904 = vmatpush3.bf16.msra.mxu0 %v3450_v21  ;;  %3426 = vmatpush3.bf16.msra.mxu1 %v3450_v21  ;;  %v423_v60 = vsel %vm355_vm0, %v421_v53, %v422_v54  ;;  %v425_v61 = vsel %vm355_vm0, %v422_v54, %v424_v55  ;;  %v3748_v6 = vpack.c.bf16 %v365_v58, %v363_v57  ;;  %v4984_v8 = vunpack.c.h.bf16 %v3740_v3  ;;  %v3802_v53 = vld [vmem:[%s3624_s12 + $0xb4] sm:$0xff]   ;;  %v3805_v54 = vld [vmem:[%s3624_s12 + $0xbc] sm:$0x1] }
  0x1c   : > { %2905 = vmatprep.subr.bf16.mxu0 %v3451_v25  ;;  %3419 = vmatprep.subr.bf16.mxu1 %v3451_v25  ;;  %v4983_v9 = vunpack.c.l.bf16 %v3743_v4  ;;  %v3756_v21 = vpack.c.bf16 %v425_v61, %v423_v60  ;;  %v366_v22 = vrot.slane %v259_v0, 1  ;;  %v367_v23 = vrot.slane %v260_v1, 1  ;;  %v3472_v25 = vld [vmem:[%s4976_s1 + $0x148] sm:$0xff]   ;;  %v3467_v55 = vld [vmem:[%s4976_s1 + $0xd8] sm:$0xff]  }
  0x1d   : > { %v369_v24 = vrot.slane %v261_v2, 1  ;;  %v426_v27 = vrot.slane %v4988_v7, 1  ;;  %v427_v28 = vrot.slane %v4984_v8, 1  ;;  %v4982_v57 = vunpack.c.l.bf16 %v3802_v53  ;;  %v3468_v60 = vld [vmem:[%s4976_s1 + $0x98] sm:$0xff]   ;;  %v3500_v7 = vld [vmem:[%s4976_s1 + $0x128] sm:$0xff]  }
  0x1e   : > { %v429_v29 = vrot.slane %v4983_v9, 1  ;;  %v368_v30 = vsel %vm355_vm0, %v366_v22, %v367_v23  ;;  %v4981_v58 = vunpack.c.h.bf16 %v3802_v53  ;;  %v3471_v22 = vld [vmem:[%s4976_s1 + $0xe0] sm:$0xff]   ;;  %v472_v9 = vrot.slane %v255_v16, 2 }
  0x1f   : > { %2906 = vmatpush3.bf16.msra.mxu0 %v3452_v33  ;;  %3427 = vmatpush3.bf16.msra.mxu1 %v3452_v33  ;;  %v370_v31 = vsel %vm355_vm0, %v367_v23, %v369_v24  ;;  %v428_v33 = vsel %vm355_vm0, %v426_v27, %v427_v28  ;;  %v431_v23 = vrot.slane %v4982_v57, 1  ;;  %v470_v57 = vrot.slane %v254_v15, 2  ;;  %v3481_v15 = vld [vmem:[%s4976_s1 + $0xf8] sm:$0xff]  }
  0x20   : > { %2907 = vmatprep.subr.bf16.mxu0 %v3453_v35  ;;  %3420 = vmatprep.subr.bf16.mxu1 %v3453_v35  ;;  %v430_v34 = vsel %vm355_vm0, %v427_v28, %v429_v29  ;;  %v3466_v35 = vld [vmem:[%s4976_s1 + $0x90] sm:$0xff]   ;;  %v3796_v49 = vpack.c.bf16 %v370_v31, %v368_v30  ;;  %v432_v24 = vrot.slane %v4981_v58, 1  ;;  %v3490_v58 = vld [vmem:[%s4976_s1 + $0x118] sm:$0xff]  }
  0x21   : > { %v3482_v28 = vld [vmem:[%s4976_s1 + $0x150] sm:$0xff]  }
  0x22   : > { %v433_v29 = vsel %vm355_vm0, %v431_v23, %v432_v24  ;;  %v3484_v31 = vld [vmem:[%s4976_s1 + $0x110] sm:$0xff]  }
  0x23   : > { %2908 = vmatpush3.bf16.msra.mxu0 %v3454_v44  ;;  %3428 = vmatpush3.bf16.msra.mxu1 %v3454_v44  ;;  %v3791_v44 = vld [vmem:[%s3624_s12 + $0x24] sm:$0xff]  }
  0x24   : > { %3005 = vmatprep.subr.bf16.mxu1 %v3457_v48  ;;  %3117 = vmatprep.subr.bf16.mxu0 %v3460_v52  ;;  %v3794_v48 = vld [vmem:[%s3624_s12 + $0x2c] sm:$0x1]  ;;  %v262_v50 = vunpack.c.l.bf16 %v3791_v44  ;;  %v263_v51 = vunpack.c.h.bf16 %v3791_v44 }
  0x25   : > { %v264_v52 = vunpack.c.l.bf16 %v3794_v48 }
  0x26   : > { %1278 = vmatmul.mubr.bf16.vlgmr.msra.gmra.mrb[0].mxu0 %v3633_v11  ;;  %1374 = vmatmul.mubr.bf16.vlgmr.msra.gmra.mrb[0].mxu1 %v3639_v13  ;;  %v371_v61 = vrot.slane %v262_v50, 1  ;;  %v3480_v11 = vld [vmem:[%s4976_s1 + $0xb0] sm:$0xff]  }
  0x27   : > { %3006 = vmatpush3.bf16.msra.mxu1 %v3458_v56  ;;  %3118 = vmatpush3.bf16.msra.mxu0 %v3462_v59  ;;  %v3810_v56 = vpack.c.bf16 %v430_v34, %v428_v33  ;;  %v4980_v59 = vunpack.c.l.bf16 %v3805_v54  ;;  %v3851_v33 = vld [vmem:[%s3624_s12 + $0x38] sm:$0x1]  ;;  %v3473_v34 = vld [vmem:[%s4976_s1 + $0xa0] sm:$0xff]  }
  0x28   : > { %3007 = vmatprep.subr.bf16.mxu1 %v3459_v5  ;;  %1285 = vmatprep.mubr.bf16.mxu0 %v3748_v6  ;;  %v372_v5 = vrot.slane %v263_v51, 1 }
  0x29   : > { %1381 = vmatprep.mubr.bf16.mxu1 %v3756_v21  ;;  %3119 = vmatprep.subr.bf16.mxu0 %v3472_v25  ;;  %v434_v25 = vrot.slane %v4980_v59, 1 }
  0x2b   : > { %3008 = vmatpush3.bf16.msra.mxu1 %v3461_v10  ;;  %3120 = vmatpush3.bf16.msra.mxu0 %v3474_v32  ;;  %v374_v10 = vrot.slane %v264_v52, 1  ;;  %v435_v30 = vsel %vm355_vm0, %v432_v24, %v434_v25  ;;  %v3848_v32 = vld [vmem:[%s3624_s12 + $0x30] sm:$0xff]  }
  0x2c   : > { %3009 = vmatprep.subr.bf16.mxu1 %v3465_v26  ;;  %v373_v26 = vsel %vm355_vm0, %v371_v61, %v372_v5  ;;  %3121 = vmatprep.subr.bf16.mxu0 %v3482_v28  ;;  %v266_v61 = vunpack.c.h.bf16 %v3848_v32  ;;  %v3864_v23 = vpack.c.bf16 %v435_v30, %v433_v29  ;;  %v3489_v30 = vld [vmem:[%s4976_s1 + $0x158] sm:$0xff]  }
  0x2d   : > { %v375_v27 = vsel %vm355_vm0, %v372_v5, %v374_v10  ;;  %v267_v5 = vunpack.c.l.bf16 %v3851_v33  ;;  %v3475_v10 = vld [vmem:[%s4976_s1 + $0xe8] sm:$0xff]  }
  0x2e   : > { %1286 = vmatmul.mubr.bf16.gmra.mrb[4].mxu0 %v3681_v37  ;;  %1382 = vmatmul.mubr.bf16.gmra.mrb[4].mxu1 %v3690_v42  ;;  %v377_v25 = vrot.slane %v266_v61, 1 }
  0x2f   : > { %3010 = vmatpush3.bf16.msra.mxu1 %v3466_v35  ;;  %1293 = vmatprep.mubr.bf16.mxu0 %v3796_v49  ;;  %v3856_v35 = vpack.c.bf16 %v375_v27, %v373_v26  ;;  %v3876_v26 = vld [vmem:[%s3624_s12 + $0x3c] sm:$0xff]   ;;  %v3879_v27 = vld [vmem:[%s3624_s12 + $0x44] sm:$0x1] }
  0x30   : > { %3011 = vmatprep.subr.bf16.mxu1 %v3467_v55  ;;  %1389 = vmatprep.mubr.bf16.mxu1 %v3810_v56  ;;  %v265_v55 = vunpack.c.l.bf16 %v3848_v32  ;;  %v4987_v28 = vunpack.c.l.bf16 %v3876_v26  ;;  %v4986_v29 = vunpack.c.h.bf16 %v3876_v26  ;;  %v4985_v59 = vunpack.c.l.bf16 %v3879_v27 }
  0x31   : > { %3122 = vmatpush3.bf16.msra.mxu0 %v3484_v31  ;;  %v469_v31 = vrot.slane %v253_v14, 2  ;;  %v3479_v14 = vld [vmem:[%s4976_s1 + $0xf0] sm:$0xff]  }
  0x32   : > { %v376_v24 = vrot.slane %v265_v55, 1  ;;  %v381_v12 = vrot.slane %v4987_v28, 1  ;;  %3123 = vmatprep.subr.bf16.mxu0 %v3489_v30  ;;  %v382_v16 = vrot.slane %v4986_v29, 1  ;;  %v3494_v30 = vld [vmem:[%s4976_s1 + $0x160] sm:$0xff]   ;;  %v3498_v29 = vld [vmem:[%s4976_s1 + $0x168] sm:$0xff]   ;;  %v475_v28 = vrot.slane %v257_v40, 2 }
  0x33   : > { %3012 = vmatpush3.bf16.msra.mxu1 %v3468_v60  ;;  %v3476_v60 = vld [vmem:[%s4976_s1 + $0xa8] sm:$0xff]  }
  0x34   : > { %3013 = vmatprep.subr.bf16.mxu1 %v3471_v22  ;;  %v379_v22 = vrot.slane %v267_v5, 1 }
  0x35   : > { %3124 = vmatpush3.bf16.msra.mxu0 %v3490_v58  ;;  %v3495_v58 = vld [vmem:[%s4976_s1 + $0x120] sm:$0xff]  }
  0x36   : > { %1294 = vmatmul.mubr.bf16.gmra.mrb[8].mxu0 %v3731_v62  ;;  %1390 = vmatmul.mubr.bf16.gmra.mrb[8].mxu1 %v3740_v3  ;;  %v380_v8 = vsel %vm355_vm0, %v377_v25, %v379_v22  ;;  %v3923_v22 = vld [vmem:[%s3624_s12 + $0x50] sm:$0x1] }
  0x37   : > { %3014 = vmatpush3.bf16.msra.mxu1 %v3473_v34  ;;  %1301 = vmatprep.mubr.bf16.mxu0 %v3856_v35  ;;  %v378_v34 = vsel %vm355_vm0, %v376_v24, %v377_v25  ;;  %v384_v25 = vrot.slane %v4985_v59, 1  ;;  %v4990_v59 = vunpack.c.l.bf16 %v3923_v22 }
  0x38   : > { %3015 = vmatprep.subr.bf16.mxu1 %v3475_v10  ;;  %1397 = vmatprep.mubr.bf16.mxu1 %v3864_v23  ;;  %v3916_v10 = vld [vmem:[%s3624_s12 + $0x48] sm:$0xff]   ;;  %v3918_v24 = vpack.c.bf16 %v380_v8, %v378_v34  ;;  %v3483_v8 = vld [vmem:[%s4976_s1 + $0xb8] sm:$0xff]  }
  0x39   : > { %3125 = vmatprep.subr.bf16.mxu0 %v3494_v30  ;;  %v271_v34 = vunpack.c.l.bf16 %v3916_v10  ;;  %v4991_v30 = vunpack.c.h.bf16 %v3916_v10  ;;  %v389_v40 = vrot.slane %v4990_v59, 1 }
  0x3a   : > { %3126 = vmatpush3.bf16.msra.mxu0 %v3495_v58  ;;  %v3493_v58 = vld [vmem:[%s4976_s1 + $0x188] sm:$0xff]  }
  0x3b   : > { %3016 = vmatpush3.bf16.msra.mxu1 %v3476_v60  ;;  %v471_v60 = vsel %vm468_vm1, %v469_v31, %v470_v57  ;;  %v3486_v31 = vld [vmem:[%s4976_s1 + $0x1c0] sm:$0xff]   ;;  %3127 = vmatprep.subr.bf16.mxu0 %v3498_v29  ;;  %v387_v38 = vrot.slane %v4991_v30, 1  ;;  %v3975_v29 = vld [vmem:[%s3624_s12 + $0x54] sm:$0xff]   ;;  %v4012_v30 = vld [vmem:[%s3624_s12 + $0x68] sm:$0x1] }
  0x3c   : > { %3017 = vmatprep.subr.bf16.mxu1 %v3479_v14  ;;  %v473_v14 = vsel %vm468_vm1, %v470_v57, %v472_v9  ;;  %v385_v9 = vsel %vm355_vm0, %v382_v16, %v384_v25  ;;  %v474_v57 = vrot.slane %v256_v39, 2  ;;  %v3503_v25 = vld [vmem:[%s4976_s1 + $0x170] sm:$0xff]  }
  0x3d   : > { %v617_v47 = vpack.c.bf16 %v473_v14, %v471_v60  ;;  %v4998_v60 = vunpack.c.h.bf16 %v3975_v29 }
  0x3e   : > { %1302 = vmatmul.mubr.bf16.gmra.mrb[12].mxu0 %v3791_v44  ;;  %1398 = vmatmul.mubr.bf16.gmra.mrb[12].mxu1 %v3802_v53  ;;  %v476_v14 = vsel %vm468_vm1, %v474_v57, %v475_v28  ;;  %v479_v57 = vrot.slane %v259_v0, 2  ;;  %v3501_v0 = vld [vmem:[%s4976_s1 + $0x190] sm:$0xff]  }
  0x3f   : > { %3018 = vmatpush3.bf16.msra.mxu1 %v3480_v11  ;;  %1309 = vmatprep.mubr.bf16.mxu0 %v3918_v24  ;;  %v383_v11 = vsel %vm355_vm0, %v381_v12, %v382_v16  ;;  %v3487_v12 = vld [vmem:[%s4976_s1 + $0x180] sm:$0xff]   ;;  %v3978_v16 = vld [vmem:[%s3624_s12 + $0x5c] sm:$0x1] }
  0x40   : > { %3019 = vmatprep.subr.bf16.mxu1 %v3481_v15  ;;  %1438 = vmatprep.mubr.bf16.mxu1 %v3681_v37  ;;  %v477_v15 = vrot.slane %v258_v41, 2  ;;  %v3963_v39 = vpack.c.bf16 %v385_v9, %v383_v11  ;;  %v386_v37 = vrot.slane %v271_v34, 1  ;;  %v3492_v41 = vld [vmem:[%s4976_s1 + $0x1c8] sm:$0xff]   ;;  %v390_v9 = vsel %vm355_vm0, %v387_v38, %v389_v40 }
  0x41   : > { %3128 = vmatpush3.bf16.msra.mxu0 %v3500_v7  ;;  %v3504_v7 = vld [vmem:[%s4976_s1 + $0x130] sm:$0xff]   ;;  %v4992_v59 = vunpack.c.l.bf16 %v3978_v16  ;;  %v392_v40 = vrot.slane %v4998_v60, 1 }
  0x42   : > { %v388_v11 = vsel %vm355_vm0, %v386_v37, %v387_v38  ;;  %3129 = vmatprep.subr.bf16.mxu0 %v3503_v25 }
  0x43   : > { %3020 = vmatpush3.bf16.msra.mxu1 %v3483_v8  ;;  %v274_v8 = vunpack.c.l.bf16 %v3975_v29 }
  0x44   : > { %3229 = vmatprep.subr.bf16.mxu1 %v3486_v31  ;;  %v3996_v31 = vld [vmem:[%s3624_s12 + $0x60] sm:$0xff]  }
  0x45   : > { %v391_v38 = vrot.slane %v274_v8, 1  ;;  %3130 = vmatpush3.bf16.msra.mxu0 %v3504_v7  ;;  %v4995_v25 = vunpack.c.h.bf16 %v3996_v31  ;;  %v3510_v7 = vld [vmem:[%s4976_s1 + $0x138] sm:$0xff]  }
  0x46   : > { %1310 = vmatmul.mubr.bf16.gmra.mrb[16].mxu0 %v3848_v32  ;;  %1439 = vmatmul.mubr.bf16.vlgmr.msra.gmra.mrb[16].mxu1 %v617_v47  ;;  %v478_v47 = vsel %vm468_vm1, %v475_v28, %v477_v15  ;;  %v480_v28 = vrot.slane %v260_v1, 2  ;;  %v482_v15 = vrot.slane %v261_v2, 2  ;;  %v4026_v1 = vpack.c.bf16 %v390_v9, %v388_v11 }
  0x47   : > { %3230 = vmatpush3.bf16.msra.mxu1 %v3487_v12  ;;  %1317 = vmatprep.mubr.bf16.mxu0 %v3963_v39  ;;  %v3499_v12 = vld [vmem:[%s4976_s1 + $0x1d0] sm:$0xff]   ;;  %v4014_v37 = vpack.c.bf16 %v478_v47, %v476_v14  ;;  %v4993_v2 = vunpack.c.l.bf16 %v3996_v31  ;;  %v4994_v47 = vunpack.c.l.bf16 %v4012_v30  ;;  %v484_v9 = vrot.slane %v262_v50, 2 }
  0x48   : > { %1446 = vmatprep.mubr.bf16.mxu1 %v3731_v62  ;;  %3231 = vmatprep.subr.bf16.mxu1 %v3492_v41  ;;  %v394_v41 = vrot.slane %v4992_v59, 1  ;;  %v481_v14 = vsel %vm468_vm1, %v479_v57, %v480_v28  ;;  %v483_v11 = vsel %vm468_vm1, %v480_v28, %v482_v15  ;;  %v487_v57 = vrot.slane %v264_v52, 2  ;;  %v3507_v28 = vld [vmem:[%s4976_s1 + $0x198] sm:$0xff]   ;;  %v4066_v52 = vld [vmem:[%s4976_s1 + $0x200] sm:$0xff]  }
  0x49   : > { %3131 = vmatprep.subr.bf16.mxu0 %v3509_v63  ;;  %v4050_v63 = vld [vmem:[%s3624_s12 + $0x6c] sm:$0xff]   ;;  %v396_v59 = vrot.slane %v4993_v2, 1  ;;  %v393_v50 = vsel %vm355_vm0, %v391_v38, %v392_v40  ;;  %v397_v48 = vrot.slane %v4995_v25, 1  ;;  %v4068_v15 = vpack.c.bf16 %v483_v11, %v481_v14  ;;  %v3511_v38 = vld [vmem:[%s4976_s1 + $0x1e0] sm:$0xff]   ;;  %v4090_v11 = vld [vmem:[%s3624_s12 + $0x74] sm:$0x1] }
  0x4a   : > { %3132 = vmatpush3.bf16.msra.mxu0 %v3510_v7  ;;  %v399_v2 = vrot.slane %v4994_v47, 1  ;;  %v490_v14 = vrot.slane %v266_v61, 2  ;;  %v3512_v25 = vld [vmem:[%s4976_s1 + $0x1a0] sm:$0xff]  }
  0x4b   : > { %3232 = vmatpush3.bf16.msra.mxu1 %v3493_v58  ;;  %v3506_v58 = vld [vmem:[%s4976_s1 + $0x1d8] sm:$0xff]   ;;  %3365 = vmatprep.subr.bf16.mxu0 %v4066_v52  ;;  %v398_v61 = vsel %vm355_vm0, %v396_v59, %v397_v48 }
  0x4c   : > { %3233 = vmatprep.subr.bf16.mxu1 %v3499_v12  ;;  %v485_v12 = vrot.slane %v263_v51, 2  ;;  %v395_v51 = vsel %vm355_vm0, %v392_v40, %v394_v41  ;;  %v4077_v40 = vrot.slane %v265_v55, 2  ;;  %v529_v41 = vrot.slane %v289_v18, 2 }
  0x4d   : > { %v4083_v7 = vpack.c.bf16 %v395_v51, %v393_v50  ;;  %v4996_v55 = vunpack.c.h.bf16 %v4050_v63  ;;  %v530_v18 = vrot.slane %v290_v19, 2  ;;  %v400_v33 = vsel %vm355_vm0, %v397_v48, %v399_v2 }
  0x4e   : > { %1318 = vmatmul.mubr.bf16.gmra.mrb[20].mxu0 %v3876_v26  ;;  %1447 = vmatmul.mubr.bf16.gmra.mrb[20].mxu1 %v4014_v37  ;;  %v486_v47 = vsel %vm468_vm1, %v484_v9, %v485_v12  ;;  %v488_v50 = vsel %vm468_vm1, %v485_v12, %v487_v57  ;;  %v532_v9 = vrot.slane %v291_v20, 2  ;;  %v282_v19 = vunpack.c.l.bf16 %v4090_v11  ;;  %v3515_v20 = vld [vmem:[%s4976_s1 + $0x1a8] sm:$0xff]   ;;  %v3519_v11 = vld [vmem:[%s4976_s1 + $0x210] sm:$0xff]  }
  0x4f   : > { %1325 = vmatprep.mubr.bf16.mxu0 %v4026_v1  ;;  %1454 = vmatprep.mubr.bf16.mxu1 %v3791_v44  ;;  %v531_v59 = vsel %vm468_vm1, %v529_v41, %v530_v18  ;;  %v534_v2 = vrot.slane %v292_v45, 2  ;;  %v402_v17 = vrot.slane %v4996_v55, 1  ;;  %v5003_v51 = vunpack.c.l.bf16 %v3693_v43 }
  0x50   : > { %3234 = vmatpush3.bf16.msra.mxu1 %v3501_v0  ;;  %v4997_v0 = vunpack.c.l.bf16 %v4050_v63  ;;  %v533_v57 = vsel %vm468_vm1, %v530_v18, %v532_v9  ;;  %v5004_v41 = vunpack.c.l.bf16 %v3740_v3  ;;  %v5006_v18 = vunpack.c.l.bf16 %v3743_v4 }
  0x51   : > { %3235 = vmatprep.subr.bf16.mxu1 %v3506_v58  ;;  %v492_v58 = vrot.slane %v267_v5, 2  ;;  %v3514_v5 = vld [vmem:[%s4976_s1 + $0x1e8] sm:$0xff]   ;;  %v537_v45 = vrot.slane %v5003_v51, 2  ;;  %v4127_v48 = vpack.c.bf16 %v533_v57, %v531_v59  ;;  %v4143_v59 = vld [vmem:[%s3624_s12 + $0x78] sm:$0xff]  }
  0x52   : > { %v401_v12 = vrot.slane %v4997_v0, 1  ;;  %v539_v55 = vrot.slane %v5004_v41, 2  ;;  %v5005_v0 = vunpack.c.h.bf16 %v3740_v3  ;;  %v542_v9 = vrot.slane %v5006_v18, 2 }
  0x53   : > { %v4151_v18 = vpack.c.bf16 %v400_v33, %v398_v61  ;;  %v3520_v61 = vld [vmem:[%s4976_s1 + $0x1f8] sm:$0xff]  }
  0x54   : > { %3236 = vmatpush3.bf16.msra.mxu1 %v3507_v28  ;;  %v535_v28 = vrot.slane %v293_v46, 2  ;;  %v540_v60 = vrot.slane %v5005_v0, 2  ;;  %v4138_v46 = vpack.c.bf16 %v488_v50, %v486_v47  ;;  %v5007_v0 = vunpack.c.l.bf16 %v3802_v53  ;;  %v3518_v50 = vld [vmem:[%s4976_s1 + $0x1b0] sm:$0xff]  }
  0x55   : > { %3237 = vmatprep.subr.bf16.mxu1 %v3511_v38  ;;  %v3517_v38 = vld [vmem:[%s4976_s1 + $0x1f0] sm:$0xff]   ;;  %v404_v47 = vrot.slane %v282_v19, 1 }
  0x56   : > { %1326 = vmatmul.mubr.bf16.gmra.mrb[24].mxu0 %v3916_v10  ;;  %1455 = vmatmul.mubr.bf16.gmra.mrb[24].mxu1 %v4068_v15  ;;  %v536_v43 = vsel %vm468_vm1, %v534_v2, %v535_v28  ;;  %v541_v51 = vsel %vm468_vm1, %v539_v55, %v540_v60  ;;  %v543_v41 = vsel %vm468_vm1, %v540_v60, %v542_v9  ;;  %v544_v4 = vrot.slane %v5007_v0, 2 }
  0x57   : > { %1333 = vmatprep.mubr.bf16.mxu0 %v4083_v7  ;;  %1462 = vmatprep.mubr.bf16.mxu1 %v3848_v32  ;;  %v5008_v2 = vunpack.c.h.bf16 %v3802_v53  ;;  %v5009_v60 = vunpack.c.l.bf16 %v3805_v54  ;;  %v491_v54 = vsel %vm468_vm1, %v4077_v40, %v490_v14  ;;  %v283_v9 = vunpack.c.l.bf16 %v4143_v59  ;;  %v3521_v40 = vld [vmem:[%s4976_s1 + $0x1b8] sm:$0xff]  }
  0x58   : > { %3238 = vmatpush3.bf16.msra.mxu1 %v3512_v25  ;;  %v538_v25 = vsel %vm468_vm1, %v535_v28, %v537_v45  ;;  %v4165_v45 = vld [vmem:[%s3624_s12 + $0x80] sm:$0x1] }
  0x59   : > { %3239 = vmatprep.subr.bf16.mxu1 %v3514_v5  ;;  %v4145_v57 = vpack.c.bf16 %v538_v25, %v536_v43  ;;  %v4158_v5 = vpack.c.bf16 %v543_v41, %v541_v51  ;;  %v545_v55 = vrot.slane %v5008_v2, 2  ;;  %v547_v28 = vrot.slane %v5009_v60, 2 }
  0x5a   : > { %v403_v25 = vsel %vm355_vm0, %v401_v12, %v402_v17  ;;  %v405_v51 = vsel %vm355_vm0, %v402_v17, %v404_v47  ;;  %v284_v41 = vunpack.c.h.bf16 %v4143_v59  ;;  %v4999_v0 = vunpack.c.l.bf16 %v4165_v45 }
  0x5b   : > { %v546_v33 = vsel %vm468_vm1, %v544_v4, %v545_v55  ;;  %v5010_v4 = vunpack.c.l.bf16 %v3876_v26  ;;  %v5011_v17 = vunpack.c.h.bf16 %v3876_v26  ;;  %v5012_v2 = vunpack.c.l.bf16 %v3879_v27 }
  0x5c   : > { %3240 = vmatpush3.bf16.msra.mxu1 %v3515_v20  ;;  %v548_v20 = vsel %vm468_vm1, %v545_v55, %v547_v28  ;;  %v407_v60 = vrot.slane %v284_v41, 1  ;;  %v409_v28 = vrot.slane %v4999_v0, 1 }
  0x5d   : > { %3241 = vmatprep.subr.bf16.mxu1 %v3517_v38  ;;  %v493_v38 = vsel %vm468_vm1, %v490_v14, %v492_v58  ;;  %v4180_v43 = vpack.c.bf16 %v548_v20, %v546_v33  ;;  %v4191_v58 = vpack.c.bf16 %v405_v51, %v403_v25  ;;  %v494_v12 = vrot.slane %v5010_v4, 2  ;;  %v4209_v33 = vld [vmem:[%s3624_s12 + $0x8c] sm:$0x1] }
  0x5e   : > { %1334 = vmatmul.mubr.bf16.gmra.mrb[28].mxu0 %v3975_v29  ;;  %1463 = vmatmul.mubr.bf16.gmra.mrb[28].mxu1 %v4138_v46  ;;  %v4189_v14 = vpack.c.bf16 %v493_v38, %v491_v54  ;;  %v495_v47 = vrot.slane %v5011_v17, 2  ;;  %v497_v55 = vrot.slane %v5012_v2, 2  ;;  %v410_v25 = vsel %vm355_vm0, %v407_v60, %v409_v28 }
  0x5f   : > { %1341 = vmatprep.mubr.bf16.mxu0 %v4151_v18  ;;  %1470 = vmatprep.mubr.bf16.mxu1 %v3876_v26  ;;  %v499_v2 = vrot.slane %v271_v34, 2 }
  0x60   : > { %3242 = vmatpush3.bf16.msra.mxu1 %v3518_v50  ;;  %v406_v50 = vrot.slane %v283_v9, 1  ;;  %v496_v27 = vsel %vm468_vm1, %v494_v12, %v495_v47  ;;  %v498_v20 = vsel %vm468_vm1, %v495_v47, %v497_v55  ;;  %v5013_v12 = vunpack.c.h.bf16 %v3916_v10 }
  0x61   : > { %3243 = vmatprep.subr.bf16.mxu1 %v3520_v61  ;;  %v4206_v61 = vld [vmem:[%s3624_s12 + $0x84] sm:$0xff]   ;;  %v4222_v4 = vpack.c.bf16 %v498_v20, %v496_v27  ;;  %v5014_v55 = vunpack.c.l.bf16 %v3923_v22 }
  0x62   : > { %v5002_v54 = vunpack.c.l.bf16 %v4206_v61  ;;  %v408_v38 = vsel %vm355_vm0, %v406_v50, %v407_v60  ;;  %v5001_v51 = vunpack.c.h.bf16 %v4206_v61  ;;  %v500_v47 = vrot.slane %v5013_v12, 2 }
  0x63   : > { %v4224_v17 = vpack.c.bf16 %v410_v25, %v408_v38  ;;  %v502_v0 = vrot.slane %v5014_v55, 2  ;;  %v504_v12 = vrot.slane %v274_v8, 2  ;;  %v5015_v55 = vunpack.c.h.bf16 %v3975_v29 }
  0x64   : > { %3244 = vmatpush3.bf16.msra.mxu1 %v3521_v40  ;;  %v5000_v40 = vunpack.c.l.bf16 %v4209_v33  ;;  %v411_v50 = vrot.slane %v5002_v54, 1  ;;  %v412_v60 = vrot.slane %v5001_v51, 1  ;;  %v501_v22 = vsel %vm468_vm1, %v499_v2, %v500_v47 }
  0x65   : > { %v503_v34 = vsel %vm468_vm1, %v500_v47, %v502_v0  ;;  %v5016_v51 = vunpack.c.l.bf16 %v3978_v16  ;;  %v5017_v8 = vunpack.c.l.bf16 %v3996_v31  ;;  %v5018_v16 = vunpack.c.h.bf16 %v3996_v31 }
  0x66   : > { %1342 = vmatmul.mubr.bf16.gmra.mrb[32].mxu0 %v3996_v31  ;;  %1471 = vmatmul.mubr.bf16.gmra.mrb[32].mxu1 %v4189_v14  ;;  %v414_v28 = vrot.slane %v5000_v40, 1  ;;  %v413_v27 = vsel %vm355_vm0, %v411_v50, %v412_v60  ;;  %v4246_v38 = vpack.c.bf16 %v503_v34, %v501_v22  ;;  %v505_v40 = vrot.slane %v5015_v55, 2  ;;  %v3516_v55 = vld [vmem:[%s4976_s1 + $0x208] sm:$0xff]  }
  0x67   : > { %1349 = vmatprep.mubr.bf16.mxu0 %v4191_v58  ;;  %1478 = vmatprep.mubr.bf16.mxu1 %v3916_v10  ;;  %v507_v54 = vrot.slane %v5016_v51, 2  ;;  %v509_v50 = vrot.slane %v5017_v8, 2  ;;  %v510_v51 = vrot.slane %v5018_v16, 2  ;;  %v5020_v34 = vunpack.c.l.bf16 %v4050_v63 }
  0x68   : > { %v415_v20 = vsel %vm355_vm0, %v412_v60, %v414_v28  ;;  %v506_v0 = vsel %vm468_vm1, %v504_v12, %v505_v40  ;;  %v5019_v60 = vunpack.c.l.bf16 %v4012_v30  ;;  %v5021_v30 = vunpack.c.h.bf16 %v4050_v63 }
  0x69   : > { %v4248_v25 = vpack.c.bf16 %v415_v20, %v413_v27  ;;  %v508_v2 = vsel %vm468_vm1, %v505_v40, %v507_v54  ;;  %v511_v54 = vsel %vm468_vm1, %v509_v50, %v510_v51  ;;  %v514_v27 = vrot.slane %v5020_v34, 2  ;;  %v3522_v50 = vld [vmem:[%s4976_s1 + $0x218] sm:$0xff]  }
  0x6a   : > { %v4262_v47 = vpack.c.bf16 %v508_v2, %v506_v0  ;;  %v512_v28 = vrot.slane %v5019_v60, 2  ;;  %v515_v20 = vrot.slane %v5021_v30, 2  ;;  %v517_v12 = vrot.slane %v282_v19, 2 }
  0x6b   : > { %v5022_v2 = vunpack.c.l.bf16 %v4165_v45  ;;  %v3524_v45 = vld [vmem:[%s4976_s1 + $0x220] sm:$0xff]  }
  0x6c   : > { %v513_v40 = vsel %vm468_vm1, %v510_v51, %v512_v28  ;;  %v518_v0 = vsel %vm468_vm1, %v515_v20, %v517_v12  ;;  %v5023_v51 = vunpack.c.l.bf16 %v4206_v61  ;;  %v5024_v28 = vunpack.c.h.bf16 %v4206_v61 }
  0x6d   : > { %v4276_v22 = vpack.c.bf16 %v513_v40, %v511_v54  ;;  %v522_v8 = vrot.slane %v5022_v2, 2  ;;  %v5025_v40 = vunpack.c.l.bf16 %v4209_v33  ;;  %v3526_v33 = vld [vmem:[%s4976_s1 + $0x230] sm:$0xff]  }
  0x6e   : > { %1350 = vmatmul.mubr.bf16.gmra.mrb[36].mxu0 %v4050_v63  ;;  %1479 = vmatmul.mubr.bf16.gmra.mrb[36].mxu1 %v4222_v4  ;;  %v524_v60 = vrot.slane %v5023_v51, 2  ;;  %v525_v54 = vrot.slane %v5024_v28, 2 }
  0x6f   : > { %1357 = vmatprep.mubr.bf16.mxu0 %v4224_v17  ;;  %1486 = vmatprep.mubr.bf16.mxu1 %v3975_v29  ;;  %v527_v34 = vrot.slane %v5025_v40, 2 }
  0x70   : > { %v526_v30 = vsel %vm468_vm1, %v524_v60, %v525_v54 }
  0x76   : > { %1358 = vmatmul.mubr.bf16.gmra.mrb[40].mxu0 %v4143_v59  ;;  %1487 = vmatmul.mubr.bf16.gmra.mrb[40].mxu1 %v4246_v38 }
  0x77   : > { %1365 = vmatprep.mubr.bf16.mxu0 %v4248_v25  ;;  %1494 = vmatprep.mubr.bf16.mxu1 %v3996_v31 }
  0x7e   : > { %1366 = vmatmul.mubr.bf16.gmra.mrb[44].mxu0 %v4206_v61  ;;  %1495 = vmatmul.mubr.bf16.gmra.mrb[44].mxu1 %v4262_v47 }
  0x7f   : > { %1502 = vmatprep.mubr.bf16.mxu1 %v4050_v63  ;;  %1599 = vmatprep.mubr.bf16.mxu0 %v4014_v37  ;;  %v516_v37 = vsel %vm468_vm1, %v514_v27, %v515_v20  ;;  %v3525_v27 = vld [vmem:[%s4976_s1 + $0x228] sm:$0xff]   ;;  %v528_v20 = vsel %vm468_vm1, %v525_v54, %v527_v34 }
  0x80   : > { %v4297_v19 = vpack.c.bf16 %v518_v0, %v516_v37  ;;  %v4337_v12 = vpack.c.bf16 %v528_v20, %v526_v30  ;;  %v4355_v37 = vld [vmem:[%s3624_s12 + $0xc0] sm:$0xff]  }
  0x86   : > { %1503 = vmatmul.mubr.bf16.gmra.mrb[48].mxu1 %v4276_v22  ;;  %1600 = vmatmul.mubr.bf16.vlgmr.msra.gmra.mrb[48].mxu0 %v3748_v6  ;;  %v519_v6 = vrot.slane %v283_v9, 2 }
  0x87   : > { %3366 = vmatpush3.bf16.msra.mxu0 %v4066_v52  ;;  %1510 = vmatprep.mubr.bf16.mxu1 %v4143_v59  ;;  %v520_v52 = vrot.slane %v284_v41, 2 }
  0x88   : > { %1607 = vmatprep.mubr.bf16.mxu0 %v4068_v15  ;;  %3367 = vmatprep.subr.bf16.mxu0 %v3516_v55 }
  0x89   : > { %v521_v9 = vsel %vm468_vm1, %v519_v6, %v520_v52  ;;  %v523_v41 = vsel %vm468_vm1, %v520_v52, %v522_v8 }
  0x8a   : > { %v4317_v16 = vpack.c.bf16 %v523_v41, %v521_v9 }
  0x8b   : > { %3368 = vmatpush3.bf16.msra.mxu0 %v3516_v55  ;;  %v3527_v55 = vld [vmem:[%s4976_s1 + $0x238] sm:$0xff]  }
  0x8c   : > { %3369 = vmatprep.subr.bf16.mxu0 %v3519_v11 }
  0x8e   : > { %1511 = vmatmul.mubr.bf16.gmra.mrb[52].mxu1 %v4297_v19  ;;  %1608 = vmatmul.mubr.bf16.gmra.mrb[52].mxu0 %v3796_v49 }
  0x8f   : > { %1518 = vmatprep.mubr.bf16.mxu1 %v4206_v61  ;;  %1615 = vmatprep.mubr.bf16.mxu0 %v4138_v46 }
  0x90   : > { %3370 = vmatpush3.bf16.msra.mxu0 %v3519_v11 }
  0x91   : > { %3371 = vmatprep.subr.bf16.mxu0 %v3522_v50 }
  0x94   : > { %3372 = vmatpush3.bf16.msra.mxu0 %v3522_v50 }
  0x95   : > { %3373 = vmatprep.subr.bf16.mxu0 %v3524_v45 }
  0x96   : > { %1519 = vmatmul.mubr.bf16.gmra.mrb[56].mxu1 %v4317_v16  ;;  %1616 = vmatmul.mubr.bf16.gmra.mrb[56].mxu0 %v3856_v35 }
  0x97   : > { %1526 = vmatprep.mubr.bf16.mxu1 %v3639_v13  ;;  %1623 = vmatprep.mubr.bf16.mxu0 %v4189_v14 }
  0x98   : > { %3374 = vmatpush3.bf16.msra.mxu0 %v3524_v45 }
  0x99   : > { %3375 = vmatprep.subr.bf16.mxu0 %v3525_v27 }
  0x9c   : > { %3376 = vmatpush3.bf16.msra.mxu0 %v3525_v27 }
  0x9d   : > { %3377 = vmatprep.subr.bf16.mxu0 %v3526_v33 }
  0x9e   : > { %1527 = vmatmul.mubr.bf16.gmra.mrb[60].mxu1 %v4337_v12  ;;  %1624 = vmatmul.mubr.bf16.gmra.mrb[60].mxu0 %v3918_v24 }
  0x9f   : > { %1534 = vmatprep.mubr.bf16.mxu1 %v3690_v42  ;;  %1631 = vmatprep.mubr.bf16.mxu0 %v4222_v4 }
  0xa0   : > { %3378 = vmatpush3.bf16.msra.mxu0 %v3526_v33 }
  0xa1   : > { %3379 = vmatprep.subr.bf16.mxu0 %v3527_v55 }
  0xa4   : > { %3380 = vmatpush3.bf16.msra.mxu0 %v3527_v55 }
  0xa6   : > { %1535 = vmatmul.mubr.bf16.gmra.mrb[64].mxu1 %v4127_v48  ;;  %1632 = vmatmul.mubr.bf16.gmra.mrb[64].mxu0 %v3963_v39 }
  0xa7   : > { %1542 = vmatprep.mubr.bf16.mxu1 %v3740_v3  ;;  %1639 = vmatprep.mubr.bf16.mxu0 %v4246_v38 }
  0xae   : > { %1543 = vmatmul.mubr.bf16.gmra.mrb[68].mxu1 %v4145_v57  ;;  %1640 = vmatmul.mubr.bf16.gmra.mrb[68].mxu0 %v4026_v1 }
  0xaf   : > { %1550 = vmatprep.mubr.bf16.mxu1 %v3802_v53  ;;  %1647 = vmatprep.mubr.bf16.mxu0 %v4262_v47 }
  0xb6   : > { %1551 = vmatmul.mubr.bf16.gmra.mrb[72].mxu1 %v4158_v5  ;;  %1648 = vmatmul.mubr.bf16.gmra.mrb[72].mxu0 %v4083_v7 }
  0xb7   : > { %1558 = vmatprep.mubr.bf16.mxu1 %v4355_v37  ;;  %1655 = vmatprep.mubr.bf16.mxu0 %v4276_v22 }
  0xbe   : > { %1559 = vmatmul.mubr.bf16.gmra.mrb[76].mxu1 %v4180_v43  ;;  %1656 = vmatmul.mubr.bf16.gmra.mrb[76].mxu0 %v4151_v18 }
  0xbf   : > { %1663 = vmatprep.mubr.bf16.mxu0 %v4297_v19  ;;  %1760 = vmatprep.mubr.bf16.mxu1 %v3796_v49  ;;  %v302_v49 = vunpack.c.h.bf16 %v4355_v37 }
  0xc6   : > { %1664 = vmatmul.mubr.bf16.gmra.mrb[80].mxu0 %v4191_v58  ;;  %1761 = vmatmul.mubr.bf16.vlgmr.msra.gmra.mrb[80].mxu1 %v3731_v62  ;;  %v249_v62 = vld [vmem:[%s3624_s12 + $0xc8] sm:$0x1] }
  0xc7   : > { %1671 = vmatprep.mubr.bf16.mxu0 %v4317_v16  ;;  %1768 = vmatprep.mubr.bf16.mxu1 %v3856_v35 }
  0xce   : > { %1672 = vmatmul.mubr.bf16.gmra.mrb[84].mxu0 %v4224_v17  ;;  %1769 = vmatmul.mubr.bf16.gmra.mrb[84].mxu1 %v3791_v44  ;;  %v301_v44 = vunpack.c.l.bf16 %v4355_v37 }
  0xcf   : > { %1679 = vmatprep.mubr.bf16.mxu0 %v4337_v12  ;;  %1776 = vmatprep.mubr.bf16.mxu1 %v3918_v24 }
  0xd0   : > { %v591_v35 = vrot.slane %v301_v44, 2 }
  0xd6   : > { %1680 = vmatmul.mubr.bf16.gmra.mrb[88].mxu0 %v4248_v25  ;;  %1777 = vmatmul.mubr.bf16.gmra.mrb[88].mxu1 %v3848_v32  ;;  %v303_v32 = vunpack.c.l.bf16 %v249_v62 }
  0xd7   : > { %1687 = vmatprep.mubr.bf16.mxu0 %v4127_v48  ;;  %1784 = vmatprep.mubr.bf16.mxu1 %v3963_v39 }
  0xd8   : > { %v594_v24 = vrot.slane %v303_v32, 2  ;;  %v587_v11 = vrot.slane %v303_v32, 1 }
  0xde   : > { %1688 = vmatmul.mubr.bf16.gmra.mrb[92].mxu0 %v3678_v36  ;;  %1785 = vmatmul.mubr.bf16.gmra.mrb[92].mxu1 %v3876_v26  ;;  %v592_v26 = vrot.slane %v302_v49, 2 }
  0xdf   : > { %1695 = vmatprep.mubr.bf16.mxu0 %v4145_v57  ;;  %1792 = vmatprep.mubr.bf16.mxu1 %v4026_v1  ;;  %v584_v1 = vrot.slane %v301_v44, 1 }
  0xe0   : > { %v595_v39 = vsel %vm468_vm1, %v592_v26, %v594_v24 }
  0xe6   : > { %1696 = vmatmul.mubr.bf16.gmra.mrb[96].mxu0 %v3756_v21  ;;  %1793 = vmatmul.mubr.bf16.gmra.mrb[96].mxu1 %v3916_v10  ;;  %v593_v10 = vsel %vm468_vm1, %v591_v35, %v592_v26 }
  0xe7   : > { %1703 = vmatprep.mubr.bf16.mxu0 %v4158_v5  ;;  %1800 = vmatprep.mubr.bf16.mxu1 %v4083_v7  ;;  %v585_v7 = vrot.slane %v302_v49, 1  ;;  %v4394_v0 = vpack.c.bf16 %v595_v39, %v593_v10 }
  0xee   : > { %1704 = vmatmul.mubr.bf16.gmra.mrb[100].mxu0 %v3810_v56  ;;  %1801 = vmatmul.mubr.bf16.gmra.mrb[100].mxu1 %v3975_v29  ;;  %v586_v29 = vsel %vm355_vm0, %v584_v1, %v585_v7 }
  0xef   : > { %1711 = vmatprep.mubr.bf16.mxu0 %v4180_v43  ;;  %1808 = vmatprep.mubr.bf16.mxu1 %v4151_v18  ;;  %v588_v18 = vsel %vm355_vm0, %v585_v7, %v587_v11 }
  0xf0   : > { %v4402_v50 = vpack.c.bf16 %v588_v18, %v586_v29 }
  0xf6   : > { %1712 = vmatmul.mubr.bf16.gmra.mrb[104].mxu0 %v3864_v23  ;;  %1809 = vmatmul.mubr.bf16.gmra.mrb[104].mxu1 %v3996_v31 }
  0xf7   : > { %1719 = vmatprep.mubr.bf16.mxu0 %v4394_v0  ;;  %1816 = vmatprep.mubr.bf16.mxu1 %v4191_v58 }
  0xf9   : > { %v2981_v6 = vpop.f32.mrb[0].mxu1  ;;  %v2909_v52 = vpop.f32.mrb[0].mxu0 }
  0xfa   : > { %v2982_v2 = vpop.f32.mrb[1].mxu1  ;;  %v2910_v8 = vpop.f32.mrb[1].mxu0 }
  0xfb   : > { %v4404_v9 = vadd.f32 %v2982_v2, %v2981_v6  ;;  %v2984_v41 = vpop.f32.mrb[2].mxu1  ;;  %v4406_v45 = vadd.f32 %v2910_v8, %v2909_v52  ;;  %v2912_v31 = vpop.f32.mrb[2].mxu0 }
  0xfc   : > { %v2985_v51 = vpop.f32.mrb[3].mxu1  ;;  %v2913_v60 = vpop.f32.mrb[3].mxu0 }
  0xfd   : > { %v4408_v28 = vadd.f32 %v2985_v51, %v2984_v41  ;;  %v4410_v58 = vadd.f32 %v2913_v60, %v2912_v31 }
  0xfe   : > { %1720 = vmatmul.mubr.bf16.gmra.mrb[108].mxu0 %v4402_v50  ;;  %1817 = vmatmul.mubr.bf16.gmra.mrb[108].mxu1 %v4050_v63 }
  0xff   : > { %1824 = vmatprep.mubr.bf16.mxu1 %v4224_v17  ;;  %3381 = vmatprep.mubr.bf16.mxu0 %v4068_v15 }
 0x101   : > { %v2987_v54 = vpop.f32.mrb[4].mxu1  ;;  %v2915_v40 = vpop.f32.mrb[4].mxu0 }
 0x102   : > { %v2988_v34 = vpop.f32.mrb[5].mxu1  ;;  %v2916_v27 = vpop.f32.mrb[5].mxu0 }
 0x103   : > { %v4416_v30 = vadd.f32 %v2988_v34, %v2987_v54  ;;  %v2990_v20 = vpop.f32.mrb[6].mxu1  ;;  %v4418_v33 = vadd.f32 %v2916_v27, %v2915_v40  ;;  %v2918_v55 = vpop.f32.mrb[6].mxu0 }
 0x104   : > { %v2991_v62 = vpop.f32.mrb[7].mxu1  ;;  %v2919_v44 = vpop.f32.mrb[7].mxu0 }
 0x105   : > { %v4420_v49 = vadd.f32 %v2991_v62, %v2990_v20  ;;  %v4422_v32 = vadd.f32 %v2919_v44, %v2918_v55 }
 0x106   : > { %1825 = vmatmul.mubr.bf16.gmra.mrb[112].mxu1 %v4143_v59  ;;  %3382 = vmatmul.mubr.bf16.vlgmr.msra.gmra.mrb[112].mxu0 %v4138_v46 }
 0x107   : > { %1832 = vmatprep.mubr.bf16.mxu1 %v4248_v25  ;;  %3385 = vmatprep.mubr.bf16.mxu0 %v4189_v14 }
 0x109   : > { %v2993_v63 = vpop.f32.mrb[8].mxu1  ;;  %v2921_v15 = vpop.f32.mrb[8].mxu0 }
 0x10a   : > { %v2994_v17 = vpop.f32.mrb[9].mxu1  ;;  %v2922_v35 = vpop.f32.mrb[9].mxu0 }
 0x10b   : > { %v4428_v26 = vadd.f32 %v2994_v17, %v2993_v63  ;;  %v2996_v24 = vpop.f32.mrb[10].mxu1  ;;  %v4430_v10 = vadd.f32 %v2922_v35, %v2921_v15  ;;  %v2924_v39 = vpop.f32.mrb[10].mxu0 }
 0x10c   : > { %v2997_v1 = vpop.f32.mrb[11].mxu1  ;;  %v2925_v7 = vpop.f32.mrb[11].mxu0 }
 0x10d   : > { %v4432_v11 = vadd.f32 %v2997_v1, %v2996_v24  ;;  %v4434_v59 = vadd.f32 %v2925_v7, %v2924_v39 }
 0x10e   : > { %1833 = vmatmul.mubr.bf16.gmra.mrb[116].mxu1 %v4206_v61  ;;  %3386 = vmatmul.mubr.bf16.gmra.mrb[116].mxu0 %v4222_v4 }
 0x10f   : > { %1840 = vmatprep.mubr.bf16.mxu1 %v3678_v36  ;;  %3389 = vmatprep.mubr.bf16.mxu0 %v4246_v38 }
 0x111   : > { %v2999_v46 = vpop.f32.mrb[12].mxu1  ;;  %v2927_v14 = vpop.f32.mrb[12].mxu0 }
 0x112   : > { %v3000_v25 = vpop.f32.mrb[13].mxu1  ;;  %v2928_v29 = vpop.f32.mrb[13].mxu0 }
 0x113   : > { %v4440_v18 = vadd.f32 %v3000_v25, %v2999_v46  ;;  %v3002_v6 = vpop.f32.mrb[14].mxu1  ;;  %v4442_v52 = vadd.f32 %v2928_v29, %v2927_v14  ;;  %v2930_v2 = vpop.f32.mrb[14].mxu0 }
 0x114   : > { %v3003_v8 = vpop.f32.mrb[15].mxu1  ;;  %v2931_v41 = vpop.f32.mrb[15].mxu0 }
 0x115   : > { %v4444_v31 = vadd.f32 %v3003_v8, %v3002_v6  ;;  %v4446_v61 = vadd.f32 %v2931_v41, %v2930_v2 }
 0x116   : > { %1841 = vmatmul.mubr.bf16.gmra.mrb[120].mxu1 %v3639_v13  ;;  %3390 = vmatmul.mubr.bf16.gmra.mrb[120].mxu0 %v4262_v47 }
 0x117   : > { %1848 = vmatprep.mubr.bf16.mxu1 %v3756_v21  ;;  %3393 = vmatprep.mubr.bf16.mxu0 %v4276_v22 }
 0x119   : > { %v3021_v36 = vpop.f32.mrb[16].mxu1  ;;  %v2933_v4 = vpop.f32.mrb[16].mxu0 }
 0x11a   : > { %v3022_v38 = vpop.f32.mrb[17].mxu1  ;;  %v2934_v51 = vpop.f32.mrb[17].mxu0 }
 0x11b   : > { %v3023_v60 = vadd.f32 %v3022_v38, %v3021_v36  ;;  %v3024_v54 = vpop.f32.mrb[18].mxu1  ;;  %v4452_v40 = vadd.f32 %v2934_v51, %v2933_v4  ;;  %v2936_v34 = vpop.f32.mrb[18].mxu0 }
 0x11c   : > { %v3025_v27 = vpop.f32.mrb[19].mxu1  ;;  %v2937_v20 = vpop.f32.mrb[19].mxu0 }
 0x11d   : > { %v4455_v55 = vadd.f32 %v3023_v60, %v4406_v45  ;;  %v3026_v13 = vadd.f32 %v3025_v27, %v3024_v54  ;;  %v4457_v47 = vadd.f32 %v2937_v20, %v2936_v34 }
 0x11e   : > { %1849 = vmatmul.mubr.bf16.gmra.mrb[124].mxu1 %v3690_v42  ;;  %3394 = vmatmul.mubr.bf16.gmra.mrb[124].mxu0 %v4297_v19 }
 0x11f   : > { %v4462_v21 = vadd.f32 %v3026_v13, %v4410_v58  ;;  %1856 = vmatprep.mubr.bf16.mxu1 %v3810_v56  ;;  %3397 = vmatprep.mubr.bf16.mxu0 %v4317_v16  ;;  %v4474_v56 = vld [vmem:[%s3624_s12 + $0xcc] sm:$0xff]   ;;  %v252_v16 = vld [vmem:[%s3624_s12 + $0xd4] sm:$0x1] }
 0x120   : > { %v305_v7 = vunpack.c.h.bf16 %v4474_v56  ;;  %v306_v46 = vunpack.c.l.bf16 %v252_v16 }
 0x121   : > { %v3027_v22 = vpop.f32.mrb[20].mxu1  ;;  %v2939_v62 = vpop.f32.mrb[20].mxu0 }
 0x122   : > { %v3028_v45 = vpop.f32.mrb[21].mxu1  ;;  %v2940_v44 = vpop.f32.mrb[21].mxu0  ;;  %v604_v4 = vrot.slane %v306_v46, 1 }
 0x123   : > { %v3029_v63 = vadd.f32 %v3028_v45, %v3027_v22  ;;  %v3030_v15 = vpop.f32.mrb[22].mxu1  ;;  %v4466_v17 = vadd.f32 %v2940_v44, %v2939_v62  ;;  %v2942_v42 = vpop.f32.mrb[22].mxu0  ;;  %v609_v62 = vrot.slane %v305_v7, 2 }
 0x124   : > { %v3031_v35 = vpop.f32.mrb[23].mxu1  ;;  %v2943_v19 = vpop.f32.mrb[23].mxu0 }
 0x125   : > { %v4469_v58 = vadd.f32 %v3029_v63, %v4418_v33  ;;  %v3032_v24 = vadd.f32 %v3031_v35, %v3030_v15  ;;  %v4471_v39 = vadd.f32 %v2943_v19, %v2942_v42  ;;  %v304_v33 = vunpack.c.l.bf16 %v4474_v56 }
 0x126   : > { %1857 = vmatmul.mubr.bf16.gmra.mrb[128].mxu1 %v3740_v3  ;;  %3398 = vmatmul.mubr.bf16.gmra.mrb[128].mxu0 %v4337_v12  ;;  %v611_v63 = vrot.slane %v306_v46, 2 }
 0x127   : > { %v4480_v1 = vadd.f32 %v3032_v24, %v4422_v32  ;;  %1864 = vmatprep.mubr.bf16.mxu1 %v3864_v23  ;;  %3401 = vmatprep.mubr.bf16.mxu0 %v4127_v48  ;;  %v601_v36 = vrot.slane %v304_v33, 1  ;;  %v602_v23 = vrot.slane %v305_v7, 1  ;;  %v608_v22 = vrot.slane %v304_v33, 2 }
 0x128   : > { %v612_v16 = vsel %vm468_vm1, %v609_v62, %v611_v63 }
 0x129   : > { %v3033_v14 = vpop.f32.mrb[24].mxu1  ;;  %v2945_v25 = vpop.f32.mrb[24].mxu0  ;;  %v603_v54 = vsel %vm355_vm0, %v601_v36, %v602_v23  ;;  %v605_v34 = vsel %vm355_vm0, %v602_v23, %v604_v4  ;;  %v610_v24 = vsel %vm468_vm1, %v608_v22, %v609_v62 }
 0x12a   : > { %v3034_v29 = vpop.f32.mrb[25].mxu1  ;;  %v2946_v6 = vpop.f32.mrb[25].mxu0  ;;  %v667_v44 = vpack.c.bf16 %v605_v34, %v603_v54 }
 0x12b   : > { %v3035_v2 = vadd.f32 %v3034_v29, %v3033_v14  ;;  %v3036_v3 = vpop.f32.mrb[26].mxu1  ;;  %v4486_v8 = vadd.f32 %v2946_v6, %v2945_v25  ;;  %v2948_v12 = vpop.f32.mrb[26].mxu0  ;;  %v668_v14 = vpack.c.bf16 %v612_v16, %v610_v24 }
 0x12c   : > { %v3037_v32 = vpop.f32.mrb[27].mxu1  ;;  %v2949_v41 = vpop.f32.mrb[27].mxu0 }
 0x12d   : > { %v4489_v48 = vadd.f32 %v3035_v2, %v4430_v10  ;;  %v3038_v38 = vadd.f32 %v3037_v32, %v3036_v3  ;;  %v4491_v51 = vadd.f32 %v2949_v41, %v2948_v12 }
 0x12e   : > { %1865 = vmatmul.mubr.bf16.gmra.mrb[132].mxu1 %v3802_v53  ;;  %3402 = vmatmul.mubr.bf16.gmra.mrb[132].mxu0 %v4145_v57 }
 0x12f   : > { %v4496_v60 = vadd.f32 %v3038_v38, %v4434_v59  ;;  %1872 = vmatprep.mubr.bf16.mxu1 %v4402_v50  ;;  %3405 = vmatprep.mubr.bf16.mxu0 %v4158_v5 }
 0x131   : > { %v3039_v10 = vpop.f32.mrb[28].mxu1  ;;  %v2951_v27 = vpop.f32.mrb[28].mxu0 }
 0x132   : > { %v3040_v20 = vpop.f32.mrb[29].mxu1  ;;  %v2952_v13 = vpop.f32.mrb[29].mxu0 }
 0x133   : > { %v3041_v53 = vadd.f32 %v3040_v20, %v3039_v10  ;;  %v3042_v45 = vpop.f32.mrb[30].mxu1  ;;  %v4502_v57 = vadd.f32 %v2952_v13, %v2951_v27  ;;  %v2954_v59 = vpop.f32.mrb[30].mxu0 }
 0x134   : > { %v3043_v50 = vpop.f32.mrb[31].mxu1  ;;  %v2955_v15 = vpop.f32.mrb[31].mxu0 }
 0x135   : > { %v4505_v5 = vadd.f32 %v3041_v53, %v4442_v52  ;;  %v3044_v42 = vadd.f32 %v3043_v50, %v3042_v45  ;;  %v4507_v35 = vadd.f32 %v2955_v15, %v2954_v59 }
 0x136   : > { %1873 = vmatmul.mubr.bf16.gmra.mrb[136].mxu1 %v4355_v37  ;;  %3406 = vmatmul.mubr.bf16.gmra.mrb[136].mxu0 %v4180_v43 }
 0x137   : > { %v4512_v19 = vadd.f32 %v3044_v42, %v4446_v61  ;;  %1880 = vmatprep.mubr.bf16.mxu1 %v667_v44  ;;  %3409 = vmatprep.mubr.bf16.mxu0 %v4394_v0 }
 0x139   : > { %v3045_v33 = vpop.f32.mrb[32].mxu1  ;;  %v2957_v52 = vpop.f32.mrb[32].mxu0 }
 0x13a   : > { %v3046_v7 = vpop.f32.mrb[33].mxu1  ;;  %v2958_v46 = vpop.f32.mrb[33].mxu0 }
 0x13b   : > { %v3047_v25 = vadd.f32 %v3046_v7, %v3045_v33  ;;  %v3048_v29 = vpop.f32.mrb[34].mxu1  ;;  %v2959_v37 = vadd.f32 %v2958_v46, %v2957_v52  ;;  %v2960_v6 = vpop.f32.mrb[34].mxu0 }
 0x13c   : > { %v3049_v43 = vpop.f32.mrb[35].mxu1  ;;  %v2961_v2 = vpop.f32.mrb[35].mxu0 }
 0x13d   : > { %v4518_v61 = vadd.f32 %v3047_v25, %v4452_v40  ;;  %v3050_v3 = vadd.f32 %v3049_v43, %v3048_v29  ;;  %v2962_v0 = vadd.f32 %v2961_v2, %v2960_v6 }
 0x13e   : > { %1881 = vmatmul.mubr.bf16.gmra.mrb[140].mxu1 %v4474_v56  ;;  %3410 = vmatmul.mubr.bf16.gmra.mrb[140].mxu0 %v668_v14 }
 0x13f   : > { %v4522_v12 = vadd.f32 %v3050_v3, %v4457_v47 }
 0x141   : > { %v3051_v32 = vpop.f32.mrb[36].mxu1  ;;  %v2963_v41 = vpop.f32.mrb[36].mxu0 }
 0x142   : > { %v3052_v36 = vpop.f32.mrb[37].mxu1  ;;  %v2964_v23 = vpop.f32.mrb[37].mxu0 }
 0x143   : > { %v3053_v4 = vadd.f32 %v3052_v36, %v3051_v32  ;;  %v3054_v38 = vpop.f32.mrb[38].mxu1  ;;  %v2965_v54 = vadd.f32 %v2964_v23, %v2963_v41  ;;  %v2966_v34 = vpop.f32.mrb[38].mxu0 }
 0x144   : > { %v3055_v10 = vpop.f32.mrb[39].mxu1  ;;  %v2967_v27 = vpop.f32.mrb[39].mxu0 }
 0x145   : > { %v4525_v40 = vadd.f32 %v3053_v4, %v4466_v17  ;;  %v3056_v20 = vadd.f32 %v3055_v10, %v3054_v38  ;;  %v2968_v13 = vadd.f32 %v2967_v27, %v2966_v34 }
 0x147   : > { %v4528_v56 = vadd.f32 %v3056_v20, %v4471_v39 }
 0x149   : > { %v3057_v47 = vpop.f32.mrb[40].mxu1  ;;  %v2969_v22 = vpop.f32.mrb[40].mxu0 }
 0x14a   : > { %v3058_v62 = vpop.f32.mrb[41].mxu1  ;;  %v2970_v53 = vpop.f32.mrb[41].mxu0 }
 0x14b   : > { %v3059_v45 = vadd.f32 %v3058_v62, %v3057_v47  ;;  %v3060_v59 = vpop.f32.mrb[42].mxu1  ;;  %v4530_v44 = vadd.f32 %v2970_v53, %v2969_v22  ;;  %v2972_v63 = vpop.f32.mrb[42].mxu0 }
 0x14c   : > { %v3061_v50 = vpop.f32.mrb[43].mxu1  ;;  %v2973_v15 = vpop.f32.mrb[43].mxu0 }
 0x14d   : > { %v4533_v42 = vadd.f32 %v3059_v45, %v4486_v8  ;;  %v3062_v17 = vadd.f32 %v3061_v50, %v3060_v59  ;;  %v2974_v24 = vadd.f32 %v2973_v15, %v2972_v63 }
 0x14f   : > { %v4536_v16 = vadd.f32 %v3062_v17, %v4491_v51 }
 0x151   : > { %v3063_v39 = vpop.f32.mrb[44].mxu1  ;;  %v2975_v33 = vpop.f32.mrb[44].mxu0 }
 0x152   : > { %v3064_v52 = vpop.f32.mrb[45].mxu1  ;;  %v2976_v7 = vpop.f32.mrb[45].mxu0 }
 0x153   : > { %v3065_v46 = vadd.f32 %v3064_v52, %v3063_v39  ;;  %v3066_v14 = vpop.f32.mrb[46].mxu1  ;;  %v4538_v25 = vadd.f32 %v2976_v7, %v2975_v33  ;;  %v2978_v29 = vpop.f32.mrb[46].mxu0 }
 0x154   : > { %v3067_v6 = vpop.f32.mrb[47].mxu1  ;;  %v2979_v43 = vpop.f32.mrb[47].mxu0 }
 0x155   : > { %v4541_v2 = vadd.f32 %v3065_v46, %v4502_v57  ;;  %v3068_v8 = vadd.f32 %v3067_v6, %v3066_v14  ;;  %v4543_v3 = vadd.f32 %v2979_v43, %v2978_v29 }
 0x157   : > { %v4546_v51 = vadd.f32 %v3068_v8, %v4507_v35 }
 0x159   : > { %v3069_v32 = vpop.f32.mrb[48].mxu1  ;;  %v3133_v41 = vpop.f32.mrb[48].mxu0 }
 0x15a   : > { %v3070_v36 = vpop.f32.mrb[49].mxu1  ;;  %v3134_v23 = vpop.f32.mrb[49].mxu0 }
 0x15b   : > { %v3071_v4 = vadd.f32 %v3070_v36, %v3069_v32  ;;  %v3135_v38 = vadd.f32 %v3134_v23, %v3133_v41  ;;  %v3072_v34 = vpop.f32.mrb[50].mxu1  ;;  %v3136_v10 = vpop.f32.mrb[50].mxu0 }
 0x15c   : > { %v3073_v27 = vpop.f32.mrb[51].mxu1  ;;  %v3137_v20 = vpop.f32.mrb[51].mxu0 }
 0x15d   : > { %v4548_v47 = vadd.f32 %v3071_v4, %v2959_v37  ;;  %v4551_v57 = vadd.f32 %v3135_v38, %v4455_v55  ;;  %v3074_v22 = vadd.f32 %v3073_v27, %v3072_v34  ;;  %v3138_v62 = vadd.f32 %v3137_v20, %v3136_v10 }
 0x15f   : > { %v4553_v53 = vadd.f32 %v3074_v22, %v2962_v0  ;;  %v4556_v35 = vadd.f32 %v3138_v62, %v4462_v21 }
 0x161   : > { %v3075_v45 = vpop.f32.mrb[52].mxu1  ;;  %v3139_v59 = vpop.f32.mrb[52].mxu0 }
 0x162   : > { %v3076_v63 = vpop.f32.mrb[53].mxu1  ;;  %v3140_v50 = vpop.f32.mrb[53].mxu0 }
 0x163   : > { %v3077_v15 = vadd.f32 %v3076_v63, %v3075_v45  ;;  %v3141_v17 = vadd.f32 %v3140_v50, %v3139_v59  ;;  %v3078_v39 = vpop.f32.mrb[54].mxu1  ;;  %v3142_v33 = vpop.f32.mrb[54].mxu0 }
 0x164   : > { %v3079_v37 = vpop.f32.mrb[55].mxu1  ;;  %v3143_v52 = vpop.f32.mrb[55].mxu0 }
 0x165   : > { %v4558_v7 = vadd.f32 %v3077_v15, %v2965_v54  ;;  %v4561_v55 = vadd.f32 %v3141_v17, %v4469_v58  ;;  %v3080_v0 = vadd.f32 %v3079_v37, %v3078_v39  ;;  %v3144_v46 = vadd.f32 %v3143_v52, %v3142_v33 }
 0x167   : > { %v4563_v14 = vadd.f32 %v3080_v0, %v2968_v13  ;;  %v4566_v21 = vadd.f32 %v3144_v46, %v4480_v1 }
 0x169   : > { %v3081_v29 = vpop.f32.mrb[56].mxu1  ;;  %v3145_v6 = vpop.f32.mrb[56].mxu0 }
 0x16a   : > { %v3082_v43 = vpop.f32.mrb[57].mxu1  ;;  %v3146_v8 = vpop.f32.mrb[57].mxu0 }
 0x16b   : > { %v3083_v32 = vadd.f32 %v3082_v43, %v3081_v29  ;;  %v3147_v41 = vadd.f32 %v3146_v8, %v3145_v6  ;;  %v3084_v36 = vpop.f32.mrb[58].mxu1  ;;  %v3148_v23 = vpop.f32.mrb[58].mxu0 }
 0x16c   : > { %v3085_v54 = vpop.f32.mrb[59].mxu1  ;;  %v3149_v4 = vpop.f32.mrb[59].mxu0 }
 0x16d   : > { %v4569_v58 = vadd.f32 %v3083_v32, %v4530_v44  ;;  %v4572_v38 = vadd.f32 %v3147_v41, %v4489_v48  ;;  %v3086_v13 = vadd.f32 %v3085_v54, %v3084_v36  ;;  %v3150_v34 = vadd.f32 %v3149_v4, %v3148_v23 }
 0x16f   : > { %v4574_v1 = vadd.f32 %v3086_v13, %v2974_v24  ;;  %v4577_v10 = vadd.f32 %v3150_v34, %v4496_v60 }
 0x171   : > { %v3087_v27 = vpop.f32.mrb[60].mxu1  ;;  %v3151_v20 = vpop.f32.mrb[60].mxu0 }
 0x172   : > { %v3088_v22 = vpop.f32.mrb[61].mxu1  ;;  %v3152_v62 = vpop.f32.mrb[61].mxu0 }
 0x173   : > { %v3089_v45 = vadd.f32 %v3088_v22, %v3087_v27  ;;  %v3153_v59 = vadd.f32 %v3152_v62, %v3151_v20  ;;  %v3090_v63 = vpop.f32.mrb[62].mxu1  ;;  %v3154_v50 = vpop.f32.mrb[62].mxu0 }
 0x174   : > { %v3091_v44 = vpop.f32.mrb[63].mxu1  ;;  %v3155_v15 = vpop.f32.mrb[63].mxu0 }
 0x175   : > { %v4580_v48 = vadd.f32 %v3089_v45, %v4538_v25  ;;  %v4583_v17 = vadd.f32 %v3153_v59, %v4505_v5  ;;  %v3092_v24 = vadd.f32 %v3091_v44, %v3090_v63  ;;  %v3156_v39 = vadd.f32 %v3155_v15, %v3154_v50 }
 0x177   : > { %v4586_v60 = vadd.f32 %v3092_v24, %v4543_v3  ;;  %v4589_v33 = vadd.f32 %v3156_v39, %v4512_v19 }
 0x179   : > { %v3093_v37 = vpop.f32.mrb[64].mxu1  ;;  %v3157_v52 = vpop.f32.mrb[64].mxu0 }
 0x17a   : > { %v3094_v0 = vpop.f32.mrb[65].mxu1  ;;  %v3158_v46 = vpop.f32.mrb[65].mxu0 }
 0x17b   : > { %v3095_v29 = vadd.f32 %v3094_v0, %v3093_v37  ;;  %v3159_v6 = vadd.f32 %v3158_v46, %v3157_v52  ;;  %v3096_v43 = vpop.f32.mrb[66].mxu1  ;;  %v3160_v25 = vpop.f32.mrb[66].mxu0 }
 0x17c   : > { %v3097_v8 = vpop.f32.mrb[67].mxu1  ;;  %v3161_v32 = vpop.f32.mrb[67].mxu0 }
 0x17d   : > { %v4592_v5 = vadd.f32 %v3095_v29, %v4404_v9  ;;  %v4595_v41 = vadd.f32 %v3159_v6, %v4518_v61  ;;  %v3098_v3 = vadd.f32 %v3097_v8, %v3096_v43  ;;  %v3162_v36 = vadd.f32 %v3161_v32, %v3160_v25 }
 0x17f   : > { %v4598_v19 = vadd.f32 %v3098_v3, %v4408_v28  ;;  %v4601_v23 = vadd.f32 %v3162_v36, %v4522_v12 }
 0x181   : > { %v3099_v54 = vpop.f32.mrb[68].mxu1  ;;  %v3163_v4 = vpop.f32.mrb[68].mxu0 }
 0x182   : > { %v3100_v13 = vpop.f32.mrb[69].mxu1  ;;  %v3164_v34 = vpop.f32.mrb[69].mxu0 }
 0x183   : > { %v3101_v27 = vadd.f32 %v3100_v13, %v3099_v54  ;;  %v3165_v20 = vadd.f32 %v3164_v34, %v3163_v4  ;;  %v3102_v22 = vpop.f32.mrb[70].mxu1  ;;  %v3166_v9 = vpop.f32.mrb[70].mxu0 }
 0x184   : > { %v3103_v62 = vpop.f32.mrb[71].mxu1  ;;  %v3167_v45 = vpop.f32.mrb[71].mxu0 }
 0x185   : > { %v4604_v61 = vadd.f32 %v3101_v27, %v4416_v30  ;;  %v4607_v59 = vadd.f32 %v3165_v20, %v4525_v40  ;;  %v3104_v28 = vadd.f32 %v3103_v62, %v3102_v22  ;;  %v3168_v63 = vadd.f32 %v3167_v45, %v3166_v9 }
 0x187   : > { %v4610_v12 = vadd.f32 %v3104_v28, %v4420_v49  ;;  %v4613_v50 = vadd.f32 %v3168_v63, %v4528_v56 }
 0x189   : > { %v3105_v44 = vpop.f32.mrb[72].mxu1  ;;  %v3169_v15 = vpop.f32.mrb[72].mxu0 }
 0x18a   : > { %v3106_v24 = vpop.f32.mrb[73].mxu1  ;;  %v3170_v39 = vpop.f32.mrb[73].mxu0 }
 0x18b   : > { %v3107_v37 = vadd.f32 %v3106_v24, %v3105_v44  ;;  %v3171_v52 = vadd.f32 %v3170_v39, %v3169_v15  ;;  %v3108_v0 = vpop.f32.mrb[74].mxu1  ;;  %v3172_v30 = vpop.f32.mrb[74].mxu0 }
 0x18c   : > { %v3109_v46 = vpop.f32.mrb[75].mxu1  ;;  %v3173_v29 = vpop.f32.mrb[75].mxu0 }
 0x18d   : > { %v4616_v40 = vadd.f32 %v3107_v37, %v4428_v26  ;;  %v4619_v6 = vadd.f32 %v3171_v52, %v4533_v42  ;;  %v3110_v49 = vadd.f32 %v3109_v46, %v3108_v0  ;;  %v3174_v43 = vadd.f32 %v3173_v29, %v3172_v30 }
 0x18f   : > { %v4622_v56 = vadd.f32 %v3110_v49, %v4432_v11  ;;  %v4625_v25 = vadd.f32 %v3174_v43, %v4536_v16 }
 0x191   : > { %v3111_v8 = vpop.f32.mrb[76].mxu1  ;;  %v3175_v32 = vpop.f32.mrb[76].mxu0 }
 0x192   : > { %v3112_v3 = vpop.f32.mrb[77].mxu1  ;;  %v3176_v36 = vpop.f32.mrb[77].mxu0 }
 0x193   : > { %v3113_v54 = vadd.f32 %v3112_v3, %v3111_v8  ;;  %v3177_v4 = vadd.f32 %v3176_v36, %v3175_v32  ;;  %v3114_v13 = vpop.f32.mrb[78].mxu1  ;;  %v3178_v26 = vpop.f32.mrb[78].mxu0 }
 0x194   : > { %v3115_v34 = vpop.f32.mrb[79].mxu1  ;;  %v3179_v27 = vpop.f32.mrb[79].mxu0 }
 0x195   : > { %v4628_v42 = vadd.f32 %v3113_v54, %v4440_v18  ;;  %v4631_v20 = vadd.f32 %v3177_v4, %v4541_v2  ;;  %v3116_v11 = vadd.f32 %v3115_v34, %v3114_v13  ;;  %v3180_v22 = vadd.f32 %v3179_v27, %v3178_v26 }
 0x197   : > { %v4634_v16 = vadd.f32 %v3116_v11, %v4444_v31  ;;  %v4637_v9 = vadd.f32 %v3180_v22, %v4546_v51 }
 0x199   : > { %v3181_v62 = vpop.f32.mrb[80].mxu0  ;;  %v3245_v45 = vpop.f32.mrb[80].mxu1 }
 0x19a   : > { %v3182_v28 = vpop.f32.mrb[81].mxu0  ;;  %v3246_v63 = vpop.f32.mrb[81].mxu1 }
 0x19b   : > { %v3183_v44 = vadd.f32 %v3182_v28, %v3181_v62  ;;  %v3247_v15 = vadd.f32 %v3246_v63, %v3245_v45  ;;  %v3184_v24 = vpop.f32.mrb[82].mxu0  ;;  %v3248_v18 = vpop.f32.mrb[82].mxu1  ;;  %v3555_v62 = vmov 0.0|0.0  }
 0x19c   : > { %v3185_v39 = vpop.f32.mrb[83].mxu0  ;;  %v3249_v37 = vpop.f32.mrb[83].mxu1  ;;  %v2745_v45 = vcombine.low %v3555_v62, %v3555_v62 }
 0x19d   : > { %v4640_v2 = vadd.f32 %v3183_v44, %v4548_v47  ;;  %v3186_v52 = vadd.f32 %v3185_v39, %v3184_v24  ;;  %v3250_v0 = vadd.f32 %v3249_v37, %v3248_v18  ;;  %v4643_v31 = vadd.f32 %v3247_v15, %v4551_v57 }
 0x19e   : > { %2537 = vst [vmem:[%s4668_s7] sm:$0xf] %v2745_v45  ;;  %2539 = vst [vmem:[%s4668_s7 + $0x8] sm:$0x1] %v2745_v45 }
 0x19f   : > { %v4646_v51 = vadd.f32 %v3186_v52, %v4553_v53  ;;  %v4649_v30 = vadd.f32 %v3250_v0, %v4556_v35  ;;  %2588 = vst [vmem:[%s4668_s7 + $0xcc] sm:$0xf] %v2745_v45  ;;  %2590 = vst [vmem:[%s4668_s7 + $0xd4] sm:$0x1] %v2745_v45 }
 0x1a1   : > { %v3187_v46 = vpop.f32.mrb[84].mxu0  ;;  %v3251_v29 = vpop.f32.mrb[84].mxu1 }
 0x1a2   : > { %v3188_v49 = vpop.f32.mrb[85].mxu0  ;;  %v3252_v43 = vpop.f32.mrb[85].mxu1 }
 0x1a3   : > { %v3189_v8 = vadd.f32 %v3188_v49, %v3187_v46  ;;  %v3253_v32 = vadd.f32 %v3252_v43, %v3251_v29  ;;  %v3190_v3 = vpop.f32.mrb[86].mxu0  ;;  %v3254_v47 = vpop.f32.mrb[86].mxu1 }
 0x1a4   : > { %v3191_v36 = vpop.f32.mrb[87].mxu0  ;;  %v3255_v54 = vpop.f32.mrb[87].mxu1 }
 0x1a5   : > { %v4652_v4 = vadd.f32 %v3189_v8, %v4558_v7  ;;  %v3192_v57 = vadd.f32 %v3191_v36, %v3190_v3  ;;  %v3256_v53 = vadd.f32 %v3255_v54, %v3254_v47  ;;  %v4655_v13 = vadd.f32 %v3253_v32, %v4561_v55 }
 0x1a6   : > { %v2746_v7 = vcombine.high %v3555_v62, %v3555_v62 }
 0x1a7   : > { %v4658_v35 = vadd.f32 %v3192_v57, %v4563_v14  ;;  %v4661_v26 = vadd.f32 %v3256_v53, %v4566_v21 }
 0x1a8   : > { %2538 = vst [vmem:[%s4668_s7 + $0x4] sm:$0xf] %v2746_v7  ;;  %2589 = vst [vmem:[%s4668_s7 + $0xd0] sm:$0xf] %v2746_v7 }
 0x1a9   : > { %v3193_v34 = vpop.f32.mrb[88].mxu0  ;;  %v3257_v27 = vpop.f32.mrb[88].mxu1 }
 0x1aa   : > { %v3194_v11 = vpop.f32.mrb[89].mxu0  ;;  %v3258_v22 = vpop.f32.mrb[89].mxu1 }
 0x1ab   : > { %v3195_v28 = vadd.f32 %v3194_v11, %v3193_v34  ;;  %v3259_v63 = vadd.f32 %v3258_v22, %v3257_v27  ;;  %v3196_v44 = vpop.f32.mrb[90].mxu0  ;;  %v3260_v15 = vpop.f32.mrb[90].mxu1 }
 0x1ac   : > { %v3197_v55 = vpop.f32.mrb[91].mxu0  ;;  %v3261_v14 = vpop.f32.mrb[91].mxu1 }
 0x1ad   : > { %v4677_v21 = vadd.f32 %v3195_v28, %v4569_v58  ;;  %v3198_v24 = vadd.f32 %v3197_v55, %v3196_v44  ;;  %v3262_v18 = vadd.f32 %v3261_v14, %v3260_v15  ;;  %v4680_v39 = vadd.f32 %v3259_v63, %v4572_v38 }
 0x1af   : > { %v4683_v37 = vadd.f32 %v3198_v24, %v4574_v1  ;;  %v4686_v52 = vadd.f32 %v3262_v18, %v4577_v10 }
 0x1b1   : > { %v3199_v0 = vpop.f32.mrb[92].mxu0  ;;  %v3263_v46 = vpop.f32.mrb[92].mxu1 }
 0x1b2   : > { %v3200_v29 = vpop.f32.mrb[93].mxu0  ;;  %v3264_v49 = vpop.f32.mrb[93].mxu1 }
 0x1b3   : > { %v3201_v43 = vadd.f32 %v3200_v29, %v3199_v0  ;;  %v3265_v8 = vadd.f32 %v3264_v49, %v3263_v46  ;;  %v3202_v32 = vpop.f32.mrb[94].mxu0  ;;  %v3266_v58 = vpop.f32.mrb[94].mxu1 }
 0x1b4   : > { %v3203_v3 = vpop.f32.mrb[95].mxu0  ;;  %v3267_v47 = vpop.f32.mrb[95].mxu1 }
 0x1b5   : > { %v4689_v36 = vadd.f32 %v3201_v43, %v4580_v48  ;;  %v3204_v38 = vadd.f32 %v3203_v3, %v3202_v32  ;;  %v3268_v54 = vadd.f32 %v3267_v47, %v3266_v58  ;;  %v4692_v1 = vadd.f32 %v3265_v8, %v4583_v17 }
 0x1b7   : > { %v4695_v10 = vadd.f32 %v3204_v38, %v4586_v60  ;;  %v4698_v57 = vadd.f32 %v3268_v54, %v4589_v33 }
 0x1b9   : > { %v3205_v53 = vpop.f32.mrb[96].mxu0  ;;  %v3269_v34 = vpop.f32.mrb[96].mxu1 }
 0x1ba   : > { %v3206_v27 = vpop.f32.mrb[97].mxu0  ;;  %v3270_v11 = vpop.f32.mrb[97].mxu1 }
 0x1bb   : > { %v3207_v22 = vadd.f32 %v3206_v27, %v3205_v53  ;;  %v3271_v62 = vadd.f32 %v3270_v11, %v3269_v34  ;;  %v3208_v45 = vpop.f32.mrb[98].mxu0  ;;  %v3272_v48 = vpop.f32.mrb[98].mxu1 }
 0x1bc   : > { %v3209_v7 = vpop.f32.mrb[99].mxu0  ;;  %v3273_v28 = vpop.f32.mrb[99].mxu1 }
 0x1bd   : > { %v4701_v63 = vadd.f32 %v3207_v22, %v4592_v5  ;;  %v3210_v17 = vadd.f32 %v3209_v7, %v3208_v45  ;;  %v3274_v44 = vadd.f32 %v3273_v28, %v3272_v48  ;;  %v4704_v60 = vadd.f32 %v3271_v62, %v4595_v41 }
 0x1bf   : > { %v4707_v33 = vadd.f32 %v3210_v17, %v4598_v19  ;;  %v4710_v15 = vadd.f32 %v3274_v44, %v4601_v23 }
 0x1c1   : > { %v3211_v55 = vpop.f32.mrb[100].mxu0  ;;  %v3275_v14 = vpop.f32.mrb[100].mxu1 }
 0x1c2   : > { %v3212_v24 = vpop.f32.mrb[101].mxu0  ;;  %v3276_v18 = vpop.f32.mrb[101].mxu1 }
 0x1c3   : > { %v3213_v0 = vadd.f32 %v3212_v24, %v3211_v55  ;;  %v3277_v46 = vadd.f32 %v3276_v18, %v3275_v14  ;;  %v3214_v29 = vpop.f32.mrb[102].mxu0  ;;  %v3278_v5 = vpop.f32.mrb[102].mxu1 }
 0x1c4   : > { %v3215_v49 = vpop.f32.mrb[103].mxu0  ;;  %v3279_v43 = vpop.f32.mrb[103].mxu1 }
 0x1c5   : > { %v4713_v8 = vadd.f32 %v3213_v0, %v4604_v61  ;;  %v3216_v41 = vadd.f32 %v3215_v49, %v3214_v29  ;;  %v3280_v32 = vadd.f32 %v3279_v43, %v3278_v5  ;;  %v4716_v19 = vadd.f32 %v3277_v46, %v4607_v59 }
 0x1c7   : > { %v4719_v23 = vadd.f32 %v3216_v41, %v4610_v12  ;;  %v4722_v58 = vadd.f32 %v3280_v32, %v4613_v50  ;;  %v4751_v41 = vld [vmem:[%s4977_s2] ss:$0 sm:$0xff] }
 0x1c9   : > { %v3217_v3 = vpop.f32.mrb[104].mxu0  ;;  %v3281_v47 = vpop.f32.mrb[104].mxu1 }
 0x1ca   : > { %v3218_v38 = vpop.f32.mrb[105].mxu0  ;;  %v3282_v54 = vpop.f32.mrb[105].mxu1 }
 0x1cb   : > { %v3219_v53 = vadd.f32 %v3218_v38, %v3217_v3  ;;  %v3283_v34 = vadd.f32 %v3282_v54, %v3281_v47  ;;  %v3220_v27 = vpop.f32.mrb[106].mxu0  ;;  %v3284_v61 = vpop.f32.mrb[106].mxu1 }
 0x1cc   : > { %v3221_v11 = vpop.f32.mrb[107].mxu0  ;;  %v3285_v22 = vpop.f32.mrb[107].mxu1 }
 0x1cd   : > { %v4725_v62 = vadd.f32 %v3219_v53, %v4616_v40  ;;  %v3222_v59 = vadd.f32 %v3221_v11, %v3220_v27  ;;  %v3286_v45 = vadd.f32 %v3285_v22, %v3284_v61  ;;  %v4728_v12 = vadd.f32 %v3283_v34, %v4619_v6 }
 0x1cf   : > { %v4731_v50 = vadd.f32 %v3222_v59, %v4622_v56  ;;  %v4734_v48 = vadd.f32 %v3286_v45, %v4625_v25 }
 0x1d1   : > { %v3223_v7 = vpop.f32.mrb[108].mxu0  ;;  %v3287_v28 = vpop.f32.mrb[108].mxu1 }
 0x1d2   : > { %v3224_v17 = vpop.f32.mrb[109].mxu0  ;;  %v3288_v44 = vpop.f32.mrb[109].mxu1 }
 0x1d3   : > { %v3225_v55 = vadd.f32 %v3224_v17, %v3223_v7  ;;  %v3289_v14 = vadd.f32 %v3288_v44, %v3287_v28  ;;  %v3226_v24 = vpop.f32.mrb[110].mxu0  ;;  %v3290_v40 = vpop.f32.mrb[110].mxu1 }
 0x1d4   : > { %v3227_v18 = vpop.f32.mrb[111].mxu0  ;;  %v3291_v0 = vpop.f32.mrb[111].mxu1 }
 0x1d5   : > { %v4737_v46 = vadd.f32 %v3225_v55, %v4628_v42  ;;  %v3228_v6 = vadd.f32 %v3227_v18, %v3226_v24  ;;  %v3292_v29 = vadd.f32 %v3291_v0, %v3290_v40  ;;  %v4740_v56 = vadd.f32 %v3289_v14, %v4631_v20  ;;  %v4757_v20 = vld [vmem:[%s4978_s3] ss:$0 sm:$0xff] }
 0x1d7   : > { %v4743_v25 = vadd.f32 %v3228_v6, %v4634_v16  ;;  %v4746_v5 = vadd.f32 %v3292_v29, %v4637_v9 }
 0x1d9   : > { %v3293_v49 = vpop.f32.mrb[112].mxu1  ;;  %v3383_v43 = vpop.f32.mrb[112].mxu0 }
 0x1da   : > { %v1932_v42 = vadd.f32 %v3383_v43, %v4655_v13  ;;  %v3294_v32 = vpop.f32.mrb[113].mxu1  ;;  %v1923_v3 = vpop.f32.mrb[113].mxu0 }
 0x1db   : > { %v3295_v16 = vadd.f32 %v3294_v32, %v3293_v49  ;;  %v1924_v9 = vadd.f32 %v1923_v3, %v4643_v31  ;;  %v3296_v47 = vpop.f32.mrb[114].mxu1  ;;  %v3384_v38 = vpop.f32.mrb[114].mxu0 }
 0x1dc   : > { %v2059_v54 = vmul.f32 %v4751_v41, %v1932_v42  ;;  %v1935_v53 = vadd.f32 %v3384_v38, %v4661_v26  ;;  %v3297_v34 = vpop.f32.mrb[115].mxu1  ;;  %v1926_v27 = vpop.f32.mrb[115].mxu0 }
 0x1dd   : > { %v2057_v13 = vmul.f32 %v4751_v41, %v1924_v9  ;;  %v3298_v61 = vadd.f32 %v3297_v34, %v3296_v47  ;;  %v1927_v11 = vadd.f32 %v1926_v27, %v4649_v30  ;;  %v4765_v22 = vadd.f32 %v3295_v16, %v4640_v2 }
 0x1de   : > { %v2098_v59 = vadd.f32 %v4757_v20, %v2059_v54  ;;  %v2060_v31 = vmul.f32 %v4751_v41, %v1935_v53 }
 0x1df   : > { %v2096_v45 = vadd.f32 %v4757_v20, %v2057_v13  ;;  %v2058_v7 = vmul.f32 %v4751_v41, %v1927_v11  ;;  %v4772_v26 = vadd.f32 %v3298_v61, %v4646_v51 }
 0x1e0   : > { %v2130_v28 = vmax.f32 %v2098_v59, 0.0  ;;  %v2099_v17 = vadd.f32 %v4757_v20, %v2060_v31 }
 0x1e1   : > { %v2128_v44 = vmax.f32 %v2096_v45, 0.0  ;;  %v2097_v30 = vadd.f32 %v4757_v20, %v2058_v7  ;;  %v3299_v2 = vpop.f32.mrb[116].mxu1  ;;  %v3387_v55 = vpop.f32.mrb[116].mxu0 }
 0x1e2   : > { %v2196_v14 = vrot.slane %v2130_v28, 7  ;;  %v2131_v24 = vmax.f32 %v2099_v17, 0.0  ;;  %v1948_v40 = vadd.f32 %v3387_v55, %v4692_v1  ;;  %v3300_v18 = vpop.f32.mrb[117].mxu1  ;;  %v1939_v0 = vpop.f32.mrb[117].mxu0 }
 0x1e3   : > { %v2193_v6 = vrot.slane %v2128_v44, 7  ;;  %v2129_v29 = vmax.f32 %v2097_v30, 0.0  ;;  %v3301_v49 = vadd.f32 %v3300_v18, %v3299_v2  ;;  %v1940_v51 = vadd.f32 %v1939_v0, %v4680_v39  ;;  %v3302_v43 = vpop.f32.mrb[118].mxu1  ;;  %v3388_v42 = vpop.f32.mrb[118].mxu0 }
 0x1e4   : > { %v2290_v32 = vsel %vm2192_vm2, 0.0, %v2196_v14  ;;  %v2197_v3 = vrot.slane %v2131_v24, 7  ;;  %v2063_v16 = vmul.f32 %v4751_v41, %v1948_v40  ;;  %v1951_v9 = vadd.f32 %v3388_v42, %v4698_v57  ;;  %v3303_v47 = vpop.f32.mrb[119].mxu1  ;;  %v1942_v38 = vpop.f32.mrb[119].mxu0 }
 0x1e5   : > { %v2289_v1 = vsel %vm2192_vm2, 0.0, %v2193_v6  ;;  %v2194_v54 = vrot.slane %v2129_v29, 7  ;;  %v2061_v53 = vmul.f32 %v4751_v41, %v1940_v51  ;;  %v3304_v39 = vadd.f32 %v3303_v47, %v3302_v43 }
 0x1e6   : > { %v2797_v34 = vpack.c.bf16 %v2289_v1, %v2289_v1  ;;  %v2198_v27 = vsel %vm2192_vm2, %v2196_v14, %v2197_v3  ;;  %v2306_v13 = vsel %vm2192_vm2, %v2197_v3, 0.0  ;;  %v2102_v61 = vadd.f32 %v4757_v20, %v2063_v16 }
 0x1e7   : > { %v2802_v11 = vpack.c.bf16 %v2306_v13, %v2306_v13  ;;  %v2848_v59 = vpack.c.bf16 %v2198_v27, %v2290_v32  ;;  %v2195_v57 = vsel %vm2192_vm2, %v2193_v6, %v2194_v54  ;;  %v2305_v31 = vsel %vm2192_vm2, %v2194_v54, 0.0 }
 0x1e8   : > { %2540 = vst [vmem:[%s4668_s7 + $0xc] sm:$0xf] %v2797_v34  ;;  %v2798_v45 = vpack.c.bf16 %v2195_v57, %v2195_v57  ;;  %v2799_v7 = vpack.c.bf16 %v2305_v31, %v2305_v31  ;;  %v2134_v28 = vmax.f32 %v2102_v61, 0.0  ;;  %v2100_v17 = vadd.f32 %v4757_v20, %v2061_v53 }
 0x1e9   : > { %2885 = vst [vmem:[%s4668_s7 + $0x18] sm:$0xff] %v2848_v59   ;;  %2545 = vst [vmem:[%s4668_s7 + $0x20] sm:$0x1] %v2802_v11  ;;  %v2064_v44 = vmul.f32 %v4751_v41, %v1951_v9  ;;  %v1943_v30 = vadd.f32 %v1942_v38, %v4686_v52  ;;  %v3305_v2 = vpop.f32.mrb[120].mxu1  ;;  %v3391_v55 = vpop.f32.mrb[120].mxu0  ;;  %v4795_v14 = vadd.f32 %v3301_v49, %v4652_v4 }
 0x1ea   : > { %v4798_v24 = vadd.f32 %v3304_v39, %v4658_v35  ;;  %2541 = vst [vmem:[%s4668_s7 + $0x10] sm:$0xf] %v2798_v45  ;;  %2542 = vst [vmem:[%s4668_s7 + $0x14] sm:$0x1] %v2799_v7  ;;  %v2202_v40 = vrot.slane %v2134_v28, 7  ;;  %v2132_v18 = vmax.f32 %v2100_v17, 0.0  ;;  %v1964_v0 = vadd.f32 %v3391_v55, %v4716_v19 }
 0x1eb   : > { %v3306_v6 = vpop.f32.mrb[121].mxu1  ;;  %v1955_v29 = vpop.f32.mrb[121].mxu0  ;;  %v2103_v51 = vadd.f32 %v4757_v20, %v2064_v44  ;;  %v2062_v52 = vmul.f32 %v4751_v41, %v1943_v30 }
 0x1ec   : > { %v3307_v43 = vadd.f32 %v3306_v6, %v3305_v2  ;;  %v1956_v42 = vadd.f32 %v1955_v29, %v4704_v60  ;;  %v3308_v4 = vpop.f32.mrb[122].mxu1  ;;  %v3392_v49 = vpop.f32.mrb[122].mxu0  ;;  %v2292_v35 = vsel %vm2192_vm2, 0.0, %v2202_v40  ;;  %v2199_v32 = vrot.slane %v2132_v18, 7 }
 0x1ed   : > { %v2067_v3 = vmul.f32 %v4751_v41, %v1964_v0  ;;  %v1967_v16 = vadd.f32 %v3392_v49, %v4722_v58  ;;  %v3309_v9 = vpop.f32.mrb[123].mxu1  ;;  %v1958_v19 = vpop.f32.mrb[123].mxu0  ;;  %v2135_v47 = vmax.f32 %v2103_v51, 0.0  ;;  %v2101_v38 = vadd.f32 %v4757_v20, %v2062_v52 }
 0x1ee   : > { %v2065_v1 = vmul.f32 %v4751_v41, %v1956_v42  ;;  %v4811_v54 = vadd.f32 %v3309_v9, %v3308_v4  ;;  %v2291_v60 = vsel %vm2192_vm2, 0.0, %v2199_v32  ;;  %v1959_v34 = vadd.f32 %v1958_v19, %v4710_v15 }
 0x1ef   : > { %v2106_v53 = vadd.f32 %v4757_v20, %v2067_v3  ;;  %v2068_v39 = vmul.f32 %v4751_v41, %v1967_v16  ;;  %v2803_v27 = vpack.c.bf16 %v2291_v60, %v2291_v60  ;;  %v2203_v58 = vrot.slane %v2135_v47, 7 }
 0x1f0   : > { %v2133_v13 = vmax.f32 %v2101_v38, 0.0  ;;  %v2104_v61 = vadd.f32 %v4757_v20, %v2065_v1  ;;  %v2066_v57 = vmul.f32 %v4751_v41, %v1959_v34  ;;  %v4821_v31 = vadd.f32 %v3307_v43, %v4677_v21 }
 0x1f1   : > { %v2138_v11 = vmax.f32 %v2106_v53, 0.0  ;;  %v2107_v59 = vadd.f32 %v4757_v20, %v2068_v39  ;;  %2546 = vst [vmem:[%s4668_s7 + $0x24] sm:$0xf] %v2803_v27  ;;  %v2204_v45 = vsel %vm2192_vm2, %v2202_v40, %v2203_v58  ;;  %v2308_v7 = vsel %vm2192_vm2, %v2203_v58, 0.0  ;;  %v3311_v17 = vpop.f32.mrb[124].mxu1  ;;  %v3395_v44 = vpop.f32.mrb[124].mxu0 }
 0x1f2   : > { %v2200_v28 = vrot.slane %v2133_v13, 7  ;;  %v2136_v15 = vmax.f32 %v2104_v61, 0.0  ;;  %v2808_v30 = vpack.c.bf16 %v2308_v7, %v2308_v7  ;;  %v2853_v2 = vpack.c.bf16 %v2204_v45, %v2292_v35  ;;  %v3312_v0 = vpop.f32.mrb[125].mxu1  ;;  %v1971_v6 = vpop.f32.mrb[125].mxu0 }
 0x1f3   : > { %v2208_v55 = vrot.slane %v2138_v11, 7  ;;  %v2139_v18 = vmax.f32 %v2107_v59, 0.0  ;;  %v2105_v40 = vadd.f32 %v4757_v20, %v2066_v57  ;;  %v3314_v52 = vpop.f32.mrb[126].mxu1  ;;  %v3396_v43 = vpop.f32.mrb[126].mxu0  ;;  %v1980_v19 = vadd.f32 %v3395_v44, %v4740_v56 }
 0x1f4   : > { %v2201_v21 = vsel %vm2192_vm2, %v2199_v32, %v2200_v28  ;;  %v2307_v29 = vsel %vm2192_vm2, %v2200_v28, 0.0  ;;  %v2205_v51 = vrot.slane %v2136_v15, 7  ;;  %2886 = vst [vmem:[%s4668_s7 + $0x30] sm:$0xff] %v2853_v2   ;;  %2551 = vst [vmem:[%s4668_s7 + $0x38] sm:$0x1] %v2808_v30  ;;  %v3315_v3 = vpop.f32.mrb[127].mxu1  ;;  %v3313_v47 = vadd.f32 %v3312_v0, %v3311_v17 }
 0x1f5   : > { %v2804_v42 = vpack.c.bf16 %v2201_v21, %v2201_v21  ;;  %v2805_v4 = vpack.c.bf16 %v2307_v29, %v2307_v29  ;;  %v2294_v49 = vsel %vm2192_vm2, 0.0, %v2208_v55  ;;  %v2209_v35 = vrot.slane %v2139_v18, 7  ;;  %v1974_v16 = vpop.f32.mrb[127].mxu0 }
 0x1f6   : > { %v2293_v32 = vsel %vm2192_vm2, 0.0, %v2205_v51  ;;  %v2137_v9 = vmax.f32 %v2105_v40, 0.0  ;;  %v1972_v53 = vadd.f32 %v1971_v6, %v4728_v12  ;;  %v2071_v58 = vmul.f32 %v4751_v41, %v1980_v19 }
 0x1f7   : > { %2547 = vst [vmem:[%s4668_s7 + $0x28] sm:$0xf] %v2804_v42  ;;  %2548 = vst [vmem:[%s4668_s7 + $0x2c] sm:$0x1] %v2805_v4  ;;  %v2809_v38 = vpack.c.bf16 %v2293_v32, %v2293_v32  ;;  %v2210_v1 = vsel %vm2192_vm2, %v2208_v55, %v2209_v35  ;;  %v2310_v60 = vsel %vm2192_vm2, %v2209_v35, 0.0  ;;  %v1983_v13 = vadd.f32 %v3396_v43, %v4746_v5 }
 0x1f8   : > { %v2814_v39 = vpack.c.bf16 %v2310_v60, %v2310_v60  ;;  %v2858_v34 = vpack.c.bf16 %v2210_v1, %v2294_v49  ;;  %v2206_v27 = vrot.slane %v2137_v9, 7  ;;  %v2069_v56 = vmul.f32 %v4751_v41, %v1972_v53 }
 0x1f9   : > { %2552 = vst [vmem:[%s4668_s7 + $0x3c] sm:$0xf] %v2809_v38  ;;  %v4843_v61 = vadd.f32 %v3315_v3, %v3314_v52  ;;  %v1975_v11 = vadd.f32 %v1974_v16, %v4734_v48  ;;  %v2110_v57 = vadd.f32 %v4757_v20, %v2071_v58  ;;  %v3317_v45 = vpop.f32.mrb[128].mxu1  ;;  %v3399_v7 = vpop.f32.mrb[128].mxu0  ;;  %v4852_v28 = vadd.f32 %v3313_v47, %v4689_v36 }
 0x1fa   : > { %2887 = vst [vmem:[%s4668_s7 + $0x48] sm:$0xff] %v2858_v34   ;;  %2557 = vst [vmem:[%s4668_s7 + $0x50] sm:$0x1] %v2814_v39  ;;  %v2207_v59 = vsel %vm2192_vm2, %v2205_v51, %v2206_v27  ;;  %v2309_v12 = vsel %vm2192_vm2, %v2206_v27, 0.0  ;;  %v2108_v17 = vadd.f32 %v4757_v20, %v2069_v56  ;;  %v2072_v48 = vmul.f32 %v4751_v41, %v1983_v13  ;;  %v3318_v44 = vpop.f32.mrb[129].mxu1  ;;  %v1987_v30 = vpop.f32.mrb[129].mxu0 }
 0x1fb   : > { %v2810_v5 = vpack.c.bf16 %v2207_v59, %v2207_v59  ;;  %v2811_v15 = vpack.c.bf16 %v2309_v12, %v2309_v12  ;;  %v2142_v2 = vmax.f32 %v2110_v57, 0.0  ;;  %v2070_v55 = vmul.f32 %v4751_v41, %v1975_v11  ;;  %v3320_v6 = vpop.f32.mrb[130].mxu1  ;;  %v3400_v21 = vpop.f32.mrb[130].mxu0 }
 0x1fc   : > { %v1996_v18 = vadd.f32 %v3399_v7, %v4795_v14  ;;  %v4858_v0 = vadd.f32 %v3318_v44, %v3317_v45  ;;  %v2140_v36 = vmax.f32 %v2108_v17, 0.0  ;;  %v2111_v29 = vadd.f32 %v4757_v20, %v2072_v48  ;;  %v3321_v52 = vpop.f32.mrb[131].mxu1  ;;  %v1990_v43 = vpop.f32.mrb[131].mxu0 }
 0x1fd   : > { %2553 = vst [vmem:[%s4668_s7 + $0x40] sm:$0xf] %v2810_v5  ;;  %2554 = vst [vmem:[%s4668_s7 + $0x44] sm:$0x1] %v2811_v15  ;;  %v1988_v51 = vadd.f32 %v1987_v30, %v4765_v22  ;;  %v1999_v40 = vadd.f32 %v3400_v21, %v4798_v24  ;;  %v2214_v42 = vrot.slane %v2142_v2, 7  ;;  %v2109_v4 = vadd.f32 %v4757_v20, %v2070_v55 }
 0x1fe   : > { %v2075_v14 = vmul.f32 %v4751_v41, %v1996_v18  ;;  %v4867_v49 = vadd.f32 %v3321_v52, %v3320_v6  ;;  %v2211_v35 = vrot.slane %v2140_v36, 7  ;;  %v2143_v3 = vmax.f32 %v2111_v29, 0.0 }
 0x1ff   : > { %v2073_v16 = vmul.f32 %v4751_v41, %v1988_v51  ;;  %v2076_v32 = vmul.f32 %v4751_v41, %v1999_v40  ;;  %v2296_v9 = vsel %vm2192_vm2, 0.0, %v2214_v42  ;;  %v2141_v22 = vmax.f32 %v2109_v4, 0.0 }
 0x200   : > { %v2114_v24 = vadd.f32 %v4757_v20, %v2075_v14  ;;  %v1991_v19 = vadd.f32 %v1990_v43, %v4772_v26  ;;  %v2295_v47 = vsel %vm2192_vm2, 0.0, %v2211_v35  ;;  %v2215_v38 = vrot.slane %v2143_v3, 7 }
 0x201   : > { %v2112_v1 = vadd.f32 %v4757_v20, %v2073_v16  ;;  %v2115_v60 = vadd.f32 %v4757_v20, %v2076_v32  ;;  %v2815_v53 = vpack.c.bf16 %v2295_v47, %v2295_v47  ;;  %v2212_v39 = vrot.slane %v2141_v22, 7  ;;  %v3323_v58 = vpop.f32.mrb[132].mxu1  ;;  %v3403_v56 = vpop.f32.mrb[132].mxu0 }
 0x202   : > { %v2146_v34 = vmax.f32 %v2114_v24, 0.0  ;;  %v2074_v27 = vmul.f32 %v4751_v41, %v1991_v19  ;;  %v2216_v13 = vsel %vm2192_vm2, %v2214_v42, %v2215_v38  ;;  %v2312_v11 = vsel %vm2192_vm2, %v2215_v38, 0.0  ;;  %v3324_v12 = vpop.f32.mrb[133].mxu1  ;;  %v2003_v57 = vpop.f32.mrb[133].mxu0 }
 0x203   : > { %v2144_v26 = vmax.f32 %v2112_v1, 0.0  ;;  %v2147_v59 = vmax.f32 %v2115_v60, 0.0  ;;  %2558 = vst [vmem:[%s4668_s7 + $0x54] sm:$0xf] %v2815_v53  ;;  %v2820_v45 = vpack.c.bf16 %v2312_v11, %v2312_v11  ;;  %v2863_v7 = vpack.c.bf16 %v2216_v13, %v2296_v9  ;;  %v3326_v17 = vpop.f32.mrb[134].mxu1  ;;  %v3404_v48 = vpop.f32.mrb[134].mxu0 }
 0x204   : > { %v2213_v5 = vsel %vm2192_vm2, %v2211_v35, %v2212_v39  ;;  %v2311_v15 = vsel %vm2192_vm2, %v2212_v39, 0.0  ;;  %v2220_v2 = vrot.slane %v2146_v34, 7  ;;  %v3327_v18 = vpop.f32.mrb[135].mxu1  ;;  %v2006_v6 = vpop.f32.mrb[135].mxu0  ;;  %v2113_v36 = vadd.f32 %v4757_v20, %v2074_v27 }
 0x205   : > { %v2816_v44 = vpack.c.bf16 %v2213_v5, %v2213_v5  ;;  %v2817_v30 = vpack.c.bf16 %v2311_v15, %v2311_v15  ;;  %v2217_v55 = vrot.slane %v2144_v26, 7  ;;  %2888 = vst [vmem:[%s4668_s7 + $0x60] sm:$0xff] %v2863_v7   ;;  %2563 = vst [vmem:[%s4668_s7 + $0x68] sm:$0x1] %v2820_v45  ;;  %v2221_v21 = vrot.slane %v2147_v59, 7 }
 0x206   : > { %v2012_v29 = vadd.f32 %v3403_v56, %v4852_v28  ;;  %v3325_v51 = vadd.f32 %v3324_v12, %v3323_v58  ;;  %v2298_v40 = vsel %vm2192_vm2, 0.0, %v2220_v2  ;;  %v2004_v43 = vadd.f32 %v2003_v57, %v4821_v31 }
 0x207   : > { %2559 = vst [vmem:[%s4668_s7 + $0x58] sm:$0xf] %v2816_v44  ;;  %2560 = vst [vmem:[%s4668_s7 + $0x5c] sm:$0x1] %v2817_v30  ;;  %v2297_v52 = vsel %vm2192_vm2, 0.0, %v2217_v55  ;;  %v1854_v42 = vadd.f32 %v4843_v61, %v4695_v10  ;;  %v2222_v14 = vsel %vm2192_vm2, %v2220_v2, %v2221_v21  ;;  %v2314_v28 = vsel %vm2192_vm2, %v2221_v21, 0.0 }
 0x208   : > { %v2821_v4 = vpack.c.bf16 %v2297_v52, %v2297_v52  ;;  %v2145_v35 = vmax.f32 %v2113_v36, 0.0  ;;  %v2826_v3 = vpack.c.bf16 %v2314_v28, %v2314_v28  ;;  %v2868_v16 = vpack.c.bf16 %v2222_v14, %v2298_v40 }
 0x209   : > { %v2079_v32 = vmul.f32 %v4751_v41, %v2012_v29  ;;  %v2077_v9 = vmul.f32 %v4751_v41, %v2004_v43  ;;  %v2015_v31 = vadd.f32 %v3404_v48, %v1854_v42  ;;  %v3328_v24 = vadd.f32 %v3327_v18, %v3326_v17  ;;  %v3329_v61 = vpop.f32.mrb[136].mxu1  ;;  %v3407_v19 = vpop.f32.mrb[136].mxu0 }
 0x20a   : > { %2564 = vst [vmem:[%s4668_s7 + $0x6c] sm:$0xf] %v2821_v4  ;;  %v2218_v22 = vrot.slane %v2145_v35, 7  ;;  %v1846_v10 = vadd.f32 %v4811_v54, %v4683_v37  ;;  %2889 = vst [vmem:[%s4668_s7 + $0x78] sm:$0xff] %v2868_v16   ;;  %v1867_v1 = vadd.f32 %v3325_v51, %v4713_v8  ;;  %v3330_v60 = vpop.f32.mrb[137].mxu1  ;;  %v1859_v53 = vadd.f32 %v4858_v0, %v4701_v63  ;;  %v2019_v39 = vpop.f32.mrb[137].mxu0 }
 0x20b   : > { %2569 = vst [vmem:[%s4668_s7 + $0x80] sm:$0x1] %v2826_v3  ;;  %v2118_v47 = vadd.f32 %v4757_v20, %v2079_v32  ;;  %v2116_v38 = vadd.f32 %v4757_v20, %v2077_v9  ;;  %v2080_v54 = vmul.f32 %v4751_v41, %v2015_v31  ;;  %v3332_v58 = vpop.f32.mrb[138].mxu1  ;;  %v3408_v56 = vpop.f32.mrb[138].mxu0  ;;  %v3331_v45 = vadd.f32 %v3330_v60, %v3329_v61 }
 0x20c   : > { %v2219_v34 = vsel %vm2192_vm2, %v2217_v55, %v2218_v22  ;;  %v2313_v37 = vsel %vm2192_vm2, %v2218_v22, 0.0  ;;  %v2007_v27 = vadd.f32 %v2006_v6, %v1846_v10  ;;  %v3333_v59 = vpop.f32.mrb[139].mxu1  ;;  %v2022_v12 = vpop.f32.mrb[139].mxu0  ;;  %v2028_v57 = vadd.f32 %v3407_v19, %v1867_v1 }
 0x20d   : > { %v2822_v13 = vpack.c.bf16 %v2219_v34, %v2219_v34  ;;  %v2823_v11 = vpack.c.bf16 %v2313_v37, %v2313_v37  ;;  %v2150_v26 = vmax.f32 %v2118_v47, 0.0  ;;  %v2148_v8 = vmax.f32 %v2116_v38, 0.0 }
 0x20e   : > { %v2119_v63 = vadd.f32 %v4757_v20, %v2080_v54  ;;  %v2078_v0 = vmul.f32 %v4751_v41, %v2007_v27  ;;  %v2020_v15 = vadd.f32 %v2019_v39, %v1859_v53  ;;  %v1870_v17 = vadd.f32 %v3328_v24, %v4719_v23 }
 0x20f   : > { %2565 = vst [vmem:[%s4668_s7 + $0x70] sm:$0xf] %v2822_v13  ;;  %2566 = vst [vmem:[%s4668_s7 + $0x74] sm:$0x1] %v2823_v11  ;;  %v2226_v7 = vrot.slane %v2150_v26, 7  ;;  %v2223_v5 = vrot.slane %v2148_v8, 7  ;;  %v2083_v30 = vmul.f32 %v4751_v41, %v2028_v57  ;;  %v3334_v2 = vadd.f32 %v3333_v59, %v3332_v58 }
 0x210   : > { %v2151_v48 = vmax.f32 %v2119_v63, 0.0  ;;  %v2117_v44 = vadd.f32 %v4757_v20, %v2078_v0  ;;  %v2081_v6 = vmul.f32 %v4751_v41, %v2020_v15  ;;  %v2031_v21 = vadd.f32 %v3408_v56, %v1870_v17 }
 0x211   : > { %v2300_v55 = vsel %vm2192_vm2, 0.0, %v2226_v7  ;;  %v2299_v18 = vsel %vm2192_vm2, 0.0, %v2223_v5  ;;  %v2122_v40 = vadd.f32 %v4757_v20, %v2083_v30  ;;  %v3335_v23 = vpop.f32.mrb[140].mxu1  ;;  %v3411_v52 = vpop.f32.mrb[140].mxu0  ;;  %v1862_v4 = vadd.f32 %v4867_v49, %v4707_v33 }
 0x212   : > { %v2827_v36 = vpack.c.bf16 %v2299_v18, %v2299_v18  ;;  %v2227_v29 = vrot.slane %v2151_v48, 7  ;;  %v2149_v51 = vmax.f32 %v2117_v44, 0.0  ;;  %v2120_v43 = vadd.f32 %v4757_v20, %v2081_v6  ;;  %v3336_v14 = vpop.f32.mrb[141].mxu1  ;;  %v2035_v35 = vpop.f32.mrb[141].mxu0 }
 0x213   : > { %v2084_v42 = vmul.f32 %v4751_v41, %v2031_v21  ;;  %v1875_v28 = vadd.f32 %v3331_v45, %v4725_v62  ;;  %v2154_v9 = vmax.f32 %v2122_v40, 0.0  ;;  %v3338_v22 = vpop.f32.mrb[142].mxu1  ;;  %v3412_v31 = vpop.f32.mrb[142].mxu0  ;;  %v2023_v1 = vadd.f32 %v2022_v12, %v1862_v4 }
 0x214   : > { %2570 = vst [vmem:[%s4668_s7 + $0x84] sm:$0xf] %v2827_v36  ;;  %v2228_v3 = vsel %vm2192_vm2, %v2226_v7, %v2227_v29  ;;  %v2316_v16 = vsel %vm2192_vm2, %v2227_v29, 0.0  ;;  %v2224_v32 = vrot.slane %v2149_v51, 7  ;;  %v2152_v61 = vmax.f32 %v2120_v43, 0.0  ;;  %v3339_v49 = vpop.f32.mrb[143].mxu1 }
 0x215   : > { %v2832_v24 = vpack.c.bf16 %v2316_v16, %v2316_v16  ;;  %v2873_v10 = vpack.c.bf16 %v2228_v3, %v2300_v55  ;;  %v2123_v33 = vadd.f32 %v4757_v20, %v2084_v42  ;;  %v2038_v62 = vpop.f32.mrb[143].mxu0  ;;  %v2232_v38 = vrot.slane %v2154_v9, 7 }
 0x216   : > { %v2225_v19 = vsel %vm2192_vm2, %v2223_v5, %v2224_v32  ;;  %v2315_v47 = vsel %vm2192_vm2, %v2224_v32, 0.0  ;;  %v2229_v39 = vrot.slane %v2152_v61, 7  ;;  %v2082_v54 = vmul.f32 %v4751_v41, %v2023_v1 }
 0x217   : > { %2890 = vst [vmem:[%s4668_s7 + $0x90] sm:$0xff] %v2873_v10   ;;  %2575 = vst [vmem:[%s4668_s7 + $0x98] sm:$0x1] %v2832_v24  ;;  %v2828_v60 = vpack.c.bf16 %v2225_v19, %v2225_v19  ;;  %v2829_v53 = vpack.c.bf16 %v2315_v47, %v2315_v47  ;;  %v2155_v34 = vmax.f32 %v2123_v33, 0.0  ;;  %v2302_v37 = vsel %vm2192_vm2, 0.0, %v2232_v38 }
 0x218   : > { %v3337_v27 = vadd.f32 %v3336_v14, %v3335_v23  ;;  %v2036_v58 = vadd.f32 %v2035_v35, %v1875_v28  ;;  %v2301_v56 = vsel %vm2192_vm2, 0.0, %v2229_v39  ;;  %v3340_v11 = vadd.f32 %v3339_v49, %v3338_v22 }
 0x219   : > { %2571 = vst [vmem:[%s4668_s7 + $0x88] sm:$0xf] %v2828_v60  ;;  %2572 = vst [vmem:[%s4668_s7 + $0x8c] sm:$0x1] %v2829_v53  ;;  %v2233_v13 = vrot.slane %v2155_v34, 7  ;;  %v1878_v26 = vadd.f32 %v3334_v2, %v4731_v50  ;;  %v2833_v8 = vpack.c.bf16 %v2301_v56, %v2301_v56  ;;  %v2121_v59 = vadd.f32 %v4757_v20, %v2082_v54 }
 0x21a   : > { %v1883_v12 = vadd.f32 %v3337_v27, %v4737_v46  ;;  %v2085_v63 = vmul.f32 %v4751_v41, %v2036_v58  ;;  %v1886_v45 = vadd.f32 %v3340_v11, %v4743_v25 }
 0x21b   : > { %v2234_v0 = vsel %vm2192_vm2, %v2232_v38, %v2233_v13  ;;  %v2318_v57 = vsel %vm2192_vm2, %v2233_v13, 0.0  ;;  %v2039_v7 = vadd.f32 %v2038_v62, %v1878_v26  ;;  %2576 = vst [vmem:[%s4668_s7 + $0x9c] sm:$0xf] %v2833_v8  ;;  %v2153_v50 = vmax.f32 %v2121_v59, 0.0 }
 0x21c   : > { %v2838_v5 = vpack.c.bf16 %v2318_v57, %v2318_v57  ;;  %v2878_v15 = vpack.c.bf16 %v2234_v0, %v2302_v37  ;;  %v2044_v17 = vadd.f32 %v3411_v52, %v1883_v12  ;;  %v2124_v48 = vadd.f32 %v4757_v20, %v2085_v63 }
 0x21d   : > { %v2047_v44 = vadd.f32 %v3412_v31, %v1886_v45  ;;  %v2086_v30 = vmul.f32 %v4751_v41, %v2039_v7  ;;  %v2230_v46 = vrot.slane %v2153_v50, 7 }
 0x21e   : > { %2891 = vst [vmem:[%s4668_s7 + $0xa8] sm:$0xff] %v2878_v15   ;;  %2581 = vst [vmem:[%s4668_s7 + $0xb0] sm:$0x1] %v2838_v5  ;;  %v2087_v2 = vmul.f32 %v4751_v41, %v2044_v17  ;;  %v2156_v55 = vmax.f32 %v2124_v48, 0.0 }
 0x21f   : > { %v2088_v25 = vmul.f32 %v4751_v41, %v2047_v44  ;;  %v2125_v18 = vadd.f32 %v4757_v20, %v2086_v30  ;;  %v2231_v6 = vsel %vm2192_vm2, %v2229_v39, %v2230_v46  ;;  %v2317_v21 = vsel %vm2192_vm2, %v2230_v46, 0.0 }
 0x220   : > { %v2126_v36 = vadd.f32 %v4757_v20, %v2087_v2  ;;  %v2834_v29 = vpack.c.bf16 %v2231_v6, %v2231_v6  ;;  %v2835_v51 = vpack.c.bf16 %v2317_v21, %v2317_v21  ;;  %v2235_v40 = vrot.slane %v2156_v55, 7 }
 0x221   : > { %v2127_v23 = vadd.f32 %v4757_v20, %v2088_v25  ;;  %v2157_v43 = vmax.f32 %v2125_v18, 0.0 }
 0x222   : > { %v2158_v52 = vmax.f32 %v2126_v36, 0.0  ;;  %2577 = vst [vmem:[%s4668_s7 + $0xa0] sm:$0xf] %v2834_v29  ;;  %2578 = vst [vmem:[%s4668_s7 + $0xa4] sm:$0x1] %v2835_v51  ;;  %v2303_v41 = vsel %vm2192_vm2, 0.0, %v2235_v40 }
 0x223   : > { %v2159_v42 = vmax.f32 %v2127_v23, 0.0  ;;  %v2839_v14 = vpack.c.bf16 %v2303_v41, %v2303_v41  ;;  %v2236_v28 = vrot.slane %v2157_v43, 7 }
 0x224   : > { %v2238_v4 = vrot.slane %v2158_v52, 7 }
 0x225   : > { %v2239_v35 = vrot.slane %v2159_v42, 7  ;;  %2582 = vst [vmem:[%s4668_s7 + $0xb4] sm:$0xf] %v2839_v14  ;;  %v2237_v20 = vsel %vm2192_vm2, %v2235_v40, %v2236_v28  ;;  %v2319_v16 = vsel %vm2192_vm2, %v2236_v28, 0.0 }
 0x226   : > { %v2304_v3 = vsel %vm2192_vm2, 0.0, %v2238_v4  ;;  %v2840_v22 = vpack.c.bf16 %v2237_v20, %v2237_v20  ;;  %v2841_v31 = vpack.c.bf16 %v2319_v16, %v2319_v16 }
 0x227   : > { %v2240_v32 = vsel %vm2192_vm2, %v2238_v4, %v2239_v35  ;;  %v2320_v9 = vsel %vm2192_vm2, %v2239_v35, 0.0 }
 0x228   : > { %v2844_v24 = vpack.c.bf16 %v2320_v9, %v2320_v9  ;;  %v2883_v10 = vpack.c.bf16 %v2240_v32, %v2304_v3  ;;  %2583 = vst [vmem:[%s4668_s7 + $0xb8] sm:$0xf] %v2840_v22  ;;  %2584 = vst [vmem:[%s4668_s7 + $0xbc] sm:$0x1] %v2841_v31 }
 0x22a   : > { %2892 = vst [vmem:[%s4668_s7 + $0xc0] sm:$0xff] %v2883_v10   ;;  %2587 = vst [vmem:[%s4668_s7 + $0xc8] sm:$0x1] %v2844_v24 }
 0x22b PF: > { %s14_s15 = sadd.s32 1, %s3553_s15  }
 0x22c   : > { %p11_p4 = scmp.ge.s32.totalorder %s14_s15, 6  }
 0x22e   :  { %13 = sbr.rel (!%p11_p4) target bundleno = 1 (0x1), region = 66 }

</bundles_post_ra>
